<compile_context>
chip_gen: v7x
topology: tpu7x:2x2x1
jax: 0.10.0
libtpu: 0.0.40
codegen_flags: <defaults>
</compile_context>

<pallas_src>
import functools

import jax
import jax.numpy as jnp
from jax.experimental import pallas as pl
from jax.experimental.pallas import tpu as pltpu


# ----------------------------------------------------------------------------
# Small helpers
# ----------------------------------------------------------------------------
def _round_up(x, m):
    return (x + m - 1) // m * m


def _pick_m_tile(n):
    """Tile for the (sublane) M axis; n is always a multiple of 8."""
    if n <= 512:
        return n
    for t in (512, 256, 128, 64, 32, 16, 8):
        if n % t == 0:
            return t
    return n


def _pick_lane_tile(d):
    """Tile for a lane-major axis; d is always a multiple of 128."""
    if d <= 512:
        return d
    for t in (512, 256, 128):
        if d % t == 0:
            return t
    return d


def _vmem_limit(nbytes):
    # explicit scoped-VMEM request: 2x headroom, floor 16 MiB, cap 64 MiB
    # (64 MiB = v7x physical; v5e/v6e have 128 MiB so this is always safe).
    return int(min(64 * 1024 * 1024, max(2 * nbytes, 16 * 1024 * 1024)))


# ----------------------------------------------------------------------------
# Pallas kernels
# ----------------------------------------------------------------------------
def _matmul_bias_kernel(x_ref, w_ref, b_ref, o_ref, acc_ref):
    """Tiled o = x @ w + b with f32 accumulator over the K grid axis."""
    @pl.when(pl.program_id(2) == 0)
    def _():
        acc_ref[...] = jnp.zeros_like(acc_ref)

    acc_ref[...] += jnp.dot(
        x_ref[...], w_ref[...], preferred_element_type=jnp.float32)

    @pl.when(pl.program_id(2) == pl.num_programs(2) - 1)
    def _():
        o_ref[...] = acc_ref[...] + b_ref[...]


def _lstm_recurrence_kernel(gin_ref, whh_ref, out_ref, h_scr, c_scr, *,
                            chunk, hidden_p):
    """Serial LSTM recurrence over one chunk of timesteps.

    gin_ref : [chunk, Bp, 4*Hp]  precomputed x@W_ih + bias (streamed by grid)
    whh_ref : [Hp, 4*Hp]         hidden->gates weight (resident)
    out_ref : [chunk, Bp, Hp]    hidden states for the chunk
    h_scr/c_scr : [Bp, Hp]       recurrent state, persists across grid steps
    """
    Hp = hidden_p

    @pl.when(pl.program_id(0) == 0)
    def _():
        h_scr[...] = jnp.zeros_like(h_scr)
        c_scr[...] = jnp.zeros_like(c_scr)

    whh = whh_ref[...]  # hoist weight load out of the unrolled time loop
    for t in range(chunk):  # statically unrolled -> LLO sees across steps
        gates = gin_ref[t] + jnp.dot(
            h_scr[...], whh, preferred_element_type=jnp.float32)
        # PyTorch gate order: i, f, g, o — each slice is 128-lane aligned.
        i = jax.nn.sigmoid(gates[:, 0 * Hp:1 * Hp])
        f = jax.nn.sigmoid(gates[:, 1 * Hp:2 * Hp])
        g = jnp.tanh(gates[:, 2 * Hp:3 * Hp])
        o = jax.nn.sigmoid(gates[:, 3 * Hp:4 * Hp])
        c = f * c_scr[...] + i * g
        h = o * jnp.tanh(c)
        c_scr[...] = c
        h_scr[...] = h
        out_ref[t] = h  # [Bp, Hp] lane-dense store


# ----------------------------------------------------------------------------
# Wrappers
# ----------------------------------------------------------------------------
def matmul_bias_pallas(x, w, b):
    """x:[N,K] @ w:[K,V] + b:[1,V] with a real (N,V,K) grid."""
    N, K = x.shape
    K2, V = w.shape
    assert K == K2 and b.shape == (1, V)
    tm = _pick_m_tile(N)
    tn = _pick_lane_tile(V)
    tk = _pick_lane_tile(K)
    grid = (N // tm, V // tn, K // tk)

    nbytes = 4 * (2 * (tm * tk + tk * tn + tn) + 2 * tm * tn + tm * tn)
    return pl.pallas_call(
        _matmul_bias_kernel,
        out_shape=jax.ShapeDtypeStruct((N, V), jnp.float32),
        grid_spec=pltpu.PrefetchScalarGridSpec(
            num_scalar_prefetch=0,
            grid=grid,
            in_specs=[
                pl.BlockSpec((tm, tk), lambda i, j, k: (i, k)),
                pl.BlockSpec((tk, tn), lambda i, j, k: (k, j)),
                pl.BlockSpec((1, tn), lambda i, j, k: (0, j)),
            ],
            out_specs=pl.BlockSpec((tm, tn), lambda i, j, k: (i, j)),
            scratch_shapes=[pltpu.VMEM((tm, tn), jnp.float32)],
        ),
        compiler_params=pltpu.CompilerParams(
            dimension_semantics=("parallel", "parallel", "arbitrary"),
            vmem_limit_bytes=_vmem_limit(nbytes)),
    )(x, w, b)


def lstm_recurrence_pallas(gates_in, whh_t, *, chunk):
    """gates_in:[Tp,Bp,4Hp], whh_t:[Hp,4Hp] -> hidden seq [Tp,Bp,Hp]."""
    Tp, Bp, G = gates_in.shape
    Hp = whh_t.shape[0]
    assert G == 4 * Hp and Tp % chunk == 0
    n_chunks = Tp // chunk

    kernel = functools.partial(
        _lstm_recurrence_kernel, chunk=chunk, hidden_p=Hp)

    nbytes = 4 * (2 * chunk * Bp * G      # streamed gate blocks (dbl-buffered)
                  + 2 * chunk * Bp * Hp   # output blocks
                  + 2 * Hp * G            # resident W_hh
                  + 2 * Bp * Hp)          # h/c scratch
    return pl.pallas_call(
        kernel,
        out_shape=jax.ShapeDtypeStruct((Tp, Bp, Hp), jnp.float32),
        grid_spec=pltpu.PrefetchScalarGridSpec(
            num_scalar_prefetch=0,
            grid=(n_chunks,),
            in_specs=[
                pl.BlockSpec((chunk, Bp, G), lambda c: (c, 0, 0)),
                pl.BlockSpec((Hp, G), lambda c: (0, 0)),
            ],
            out_specs=pl.BlockSpec((chunk, Bp, Hp), lambda c: (c, 0, 0)),
            scratch_shapes=[
                pltpu.VMEM((Bp, Hp), jnp.float32),
                pltpu.VMEM((Bp, Hp), jnp.float32),
            ],
        ),
        compiler_params=pltpu.CompilerParams(
            dimension_semantics=("arbitrary",),   # time recurrence is serial
            vmem_limit_bytes=_vmem_limit(nbytes)),
    )(gates_in, whh_t)


# ----------------------------------------------------------------------------
# Parameters
# ----------------------------------------------------------------------------
def init_params(key, embed_size, hidden_size, vocab_size, num_layers):
    """PyTorch-layout parameters (used by the pure-JAX reference)."""
    keys = jax.random.split(key, 3 + 4 * num_layers)
    params = {
        "embedding": 0.1 * jax.random.normal(
            keys[0], (vocab_size, embed_size), jnp.float32),
        "linear_w": 0.1 * jax.random.normal(
            keys[1], (vocab_size, hidden_size), jnp.float32),
        "linear_b": 0.1 * jax.random.normal(
            keys[2], (vocab_size,), jnp.float32),
        "lstm": [],
    }
    k = 3
    for layer in range(num_layers):
        in_size = embed_size if layer == 0 else hidden_size
        w_ih = 0.1 * jax.random.normal(
            keys[k + 0], (4 * hidden_size, in_size), jnp.float32)
        w_hh = 0.1 * jax.random.normal(
            keys[k + 1], (4 * hidden_size, hidden_size), jnp.float32)
        b_ih = 0.1 * jax.random.normal(
            keys[k + 2], (4 * hidden_size,), jnp.float32)
        b_hh = 0.1 * jax.random.normal(
            keys[k + 3], (4 * hidden_size,), jnp.float32)
        params["lstm"].append((w_ih, w_hh, b_ih, b_hh))
        k += 4
    return params


def prepare_kernel_params(params):
    """One-time layout work: transpose, sum biases, pad to (8,128) tiles."""
    vocab_size, embed_size = params["embedding"].shape
    hidden_size = params["lstm"][0][1].shape[1]
    Ep = _round_up(embed_size, 128)
    Hp = _round_up(hidden_size, 128)
    Vp = _round_up(vocab_size, 128)

    kp = {"embedding": params["embedding"]}  # gather stays in plain JAX

    lstm = []
    for layer, (w_ih, w_hh, b_ih, b_hh) in enumerate(params["lstm"]):
        in_size = embed_size if layer == 0 else hidden_size
        in_p = Ep if layer == 0 else Hp
        # [4H, in] -> [4, H, in] -> pad each gate block -> [in_p, 4*Hp]
        w4 = w_ih.reshape(4, hidden_size, in_size)
        w4 = jnp.pad(w4, ((0, 0), (0, Hp - hidden_size), (0, in_p - in_size)))
        wih_t = jnp.transpose(w4, (2, 0, 1)).reshape(in_p, 4 * Hp)
        w4h = w_hh.reshape(4, hidden_size, hidden_size)
        w4h = jnp.pad(
            w4h, ((0, 0), (0, Hp - hidden_size), (0, Hp - hidden_size)))
        whh_t = jnp.transpose(w4h, (2, 0, 1)).reshape(Hp, 4 * Hp)
        b = (b_ih + b_hh).reshape(4, hidden_size)
        b = jnp.pad(b, ((0, 0), (0, Hp - hidden_size))).reshape(1, 4 * Hp)
        lstm.append((wih_t, whh_t, b))
    kp["lstm"] = lstm

    lw = jnp.pad(params["linear_w"],
                 ((0, Vp - vocab_size), (0, Hp - hidden_size)))
    kp["linear_w_t"] = jnp.transpose(lw)                            # [Hp, Vp]
    kp["linear_b"] = jnp.pad(
        params["linear_b"], (0, Vp - vocab_size)).reshape(1, Vp)    # [1, Vp]
    return kp


# ----------------------------------------------------------------------------
# DecoderRNN forward
# ----------------------------------------------------------------------------
@jax.jit
def decoder_rnn_forward(kp, features, captions):
    """features: [B, E] f32, captions: [T, B] int32 -> [T+1, B, vocab] f32."""
    T, B = captions.shape
    vocab_size, embed_size = kp["embedding"].shape
    Ep = kp["lstm"][0][0].shape[0]
    Hp = kp["lstm"][0][1].shape[0]
    Vp = kp["linear_b"].shape[1]
    Bp = _round_up(B, 8)

    # Embedding lookup + concat (glue in plain JAX); dropout = identity (eval).
    embeddings = kp["embedding"][captions]                         # [T, B, E]
    x = jnp.concatenate([features[None, :, :], embeddings], axis=0)  # [T+1,B,E]

    Tt = T + 1
    chunk = Tt if Tt <= 16 else 8            # static (shape-derived)
    Tp = _round_up(Tt, chunk)
    # Pad once to (8,128)-aligned tiles; padding is mathematically inert and
    # the padded time steps trail the real ones (causality keeps them isolated).
    x = jnp.pad(x, ((0, Tp - Tt), (0, Bp - B), (0, Ep - embed_size)))

    for (wih_t, whh_t, bias) in kp["lstm"]:
        in_p = wih_t.shape[0]
        # Hoisted input projection: one big MXU-friendly matmul for all T.
        gates_in = matmul_bias_pallas(
            x.reshape(Tp * Bp, in_p), wih_t, bias)                 # [Tp*Bp,4Hp]
        gates_in = gates_in.reshape(Tp, Bp, 4 * Hp)
        # Serial recurrence: only h @ W_hh + nonlinearities per step.
        x = lstm_recurrence_pallas(gates_in, whh_t, chunk=chunk)   # [Tp,Bp,Hp]

    out = matmul_bias_pallas(
        x.reshape(Tp * Bp, Hp), kp["linear_w_t"], kp["linear_b"])  # [Tp*Bp,Vp]
    out = out.reshape(Tp, Bp, Vp)
    return out[:Tt, :B, :vocab_size]


# ----------------------------------------------------------------------------
# Pure-JAX reference (for correctness check)
# ----------------------------------------------------------------------------
def decoder_rnn_reference(params, features, captions):
    embeddings = params["embedding"][captions]
    x = jnp.concatenate([features[None, :, :], embeddings], axis=0)
    for (w_ih, w_hh, b_ih, b_hh) in params["lstm"]:
        T, B, _ = x.shape
        H = w_hh.shape[1]
        h = jnp.zeros((B, H), jnp.float32)
        c = jnp.zeros((B, H), jnp.float32)
        outs = []
        for t in range(T):
            gates = x[t] @ w_ih.T + b_ih + h @ w_hh.T + b_hh
            i = jax.nn.sigmoid(gates[:, 0 * H:1 * H])
            f = jax.nn.sigmoid(gates[:, 1 * H:2 * H])
            g = jnp.tanh(gates[:, 2 * H:3 * H])
            o = jax.nn.sigmoid(gates[:, 3 * H:4 * H])
            c = f * c + i * g
            h = o * jnp.tanh(c)
            outs.append(h)
        x = jnp.stack(outs, axis=0)
    return x @ params["linear_w"].T + params["linear_b"]


# ----------------------------------------------------------------------------
if __name__ == "__main__":
    embed_size, hidden_size, vocab_size, num_layers = 32, 32, 64, 2
    B, T = 2, 8  # batch, caption length

    key = jax.random.PRNGKey(0)
    k_params, k_feat, k_cap = jax.random.split(key, 3)

    params = init_params(k_params, embed_size, hidden_size, vocab_size,
                         num_layers)
    kparams = prepare_kernel_params(params)
    features = jax.random.normal(k_feat, (B, embed_size), jnp.float32)
    captions = jax.random.randint(k_cap, (T, B), 0, vocab_size, jnp.int32)

    out = decoder_rnn_forward(kparams, features, captions)
    out = jax.block_until_ready(out)

    ref = decoder_rnn_reference(params, features, captions)
    assert out.shape == (T + 1, B, vocab_size), out.shape
    assert jnp.allclose(out, ref, rtol=1e-3, atol=1e-3), (
        float(jnp.max(jnp.abs(out - ref))))

    print("KERNEL_OK")
</pallas_src>

<mosaic_0001>
module attributes {stable_mosaic.version = 11 : i64} {
  func.func @_matmul_bias_kernel(%arg0: i32, %arg1: i32, %arg2: i32, %arg3: memref<72x128xf32, #tpu.memory_space<vmem>>, %arg4: memref<128x512xf32, #tpu.memory_space<vmem>>, %arg5: memref<1x512xf32, #tpu.memory_space<vmem>>, %arg6: memref<72x512xf32, #tpu.memory_space<vmem>>, %arg7: memref<72x512xf32, #tpu.memory_space<vmem>>) attributes {dimension_semantics = [#tpu.dimension_semantics<parallel>, #tpu.dimension_semantics<parallel>, #tpu.dimension_semantics<arbitrary>], iteration_bounds = array<i64: 1, 1, 1>, scalar_prefetch = 0 : i64, scratch_operands = 1 : i64, tpu.core_type = #tpu.core_type<tc>, window_params = [{transform_indices = @transform_0, window_bounds = array<i64: 72, 128>}, {transform_indices = @transform_1, window_bounds = array<i64: 128, 512>}, {transform_indices = @transform_2, window_bounds = array<i64: 1, 512>}, {transform_indices = @transform_3, window_bounds = array<i64: 72, 512>}]} {
    %c0_i32 = arith.constant 0 : i32
    %0 = arith.cmpi eq, %arg2, %c0_i32 : i32
    %1 = arith.extui %0 : i1 to i32
    %c0_i32_0 = arith.constant 0 : i32
    %2 = arith.cmpi ne, %1, %c0_i32_0 : i32
    scf.if %2 {
      %cst_10 = arith.constant 0.000000e+00 : f32
      %12 = vector.broadcast %cst_10 : f32 to vector<72x512xf32>
      %c0_11 = arith.constant 0 : index
      %c0_12 = arith.constant 0 : index
      %13 = vector.load %arg7[%c0_11, %c0_12] : memref<72x512xf32, #tpu.memory_space<vmem>>, vector<72x512xf32>
      tpu.vector_store %arg7[%c0_11, %c0_12], %12 {strides = array<i32>} : memref<72x512xf32, #tpu.memory_space<vmem>>, vector<72x512xf32>,
    } else {
    }
    %c0 = arith.constant 0 : index
    %c0_1 = arith.constant 0 : index
    %3 = vector.load %arg7[%c0, %c0_1] : memref<72x512xf32, #tpu.memory_space<vmem>>, vector<72x512xf32>
    %c0_2 = arith.constant 0 : index
    %c0_3 = arith.constant 0 : index
    %4 = vector.load %arg3[%c0_2, %c0_3] : memref<72x128xf32, #tpu.memory_space<vmem>>, vector<72x128xf32>
    %c0_4 = arith.constant 0 : index
    %c0_5 = arith.constant 0 : index
    %5 = vector.load %arg4[%c0_4, %c0_5] : memref<128x512xf32, #tpu.memory_space<vmem>>, vector<128x512xf32>
    %cst = arith.constant dense<0.000000e+00> : vector<72x512xf32>
    %6 = tpu.matmul %4, %5, %cst {dimension_numbers = #tpu.dot_dimension_numbers<[1], [0], [0], [1], [0, 0, 1, 1], [], []>} : vector<72x128xf32>, vector<128x512xf32>, vector<72x512xf32> -> vector<72x512xf32>
    %7 = arith.addf %3, %6 : vector<72x512xf32>
    %c0_6 = arith.constant 0 : index
    %c0_7 = arith.constant 0 : index
    %8 = vector.load %arg7[%c0_6, %c0_7] : memref<72x512xf32, #tpu.memory_space<vmem>>, vector<72x512xf32>
    tpu.vector_store %arg7[%c0_6, %c0_7], %7 {strides = array<i32>} : memref<72x512xf32, #tpu.memory_space<vmem>>, vector<72x512xf32>,
    %c0_i32_8 = arith.constant 0 : i32
    %9 = arith.cmpi eq, %arg2, %c0_i32_8 : i32
    %10 = arith.extui %9 : i1 to i32
    %c0_i32_9 = arith.constant 0 : i32
    %11 = arith.cmpi ne, %10, %c0_i32_9 : i32
    scf.if %11 {
      %c0_10 = arith.constant 0 : index
      %c0_11 = arith.constant 0 : index
      %12 = vector.load %arg7[%c0_10, %c0_11] : memref<72x512xf32, #tpu.memory_space<vmem>>, vector<72x512xf32>
      %c0_12 = arith.constant 0 : index
      %c0_13 = arith.constant 0 : index
      %13 = vector.load %arg5[%c0_12, %c0_13] : memref<1x512xf32, #tpu.memory_space<vmem>>, vector<1x512xf32>
      %14 = vector.broadcast %13 : vector<1x512xf32> to vector<72x512xf32>
      %15 = arith.addf %12, %14 : vector<72x512xf32>
      %c0_14 = arith.constant 0 : index
      %c0_15 = arith.constant 0 : index
      %16 = vector.load %arg6[%c0_14, %c0_15] : memref<72x512xf32, #tpu.memory_space<vmem>>, vector<72x512xf32>
      tpu.vector_store %arg6[%c0_14, %c0_15], %15 {strides = array<i32>} : memref<72x512xf32, #tpu.memory_space<vmem>>, vector<72x512xf32>,
    } else {
    }
    return
  }
  func.func @transform_0(%arg0: i32, %arg1: i32, %arg2: i32) -> (i32, i32) {
    %c0_i32 = arith.constant 0 : i32
    return %arg0, %arg2 : i32, i32
  }
  func.func @transform_1(%arg0: i32, %arg1: i32, %arg2: i32) -> (i32, i32) {
    %c0_i32 = arith.constant 0 : i32
    return %arg2, %arg1 : i32, i32
  }
  func.func @transform_2(%arg0: i32, %arg1: i32, %arg2: i32) -> (i32, i32) {
    %c0_i32 = arith.constant 0 : i32
    %c0_i32_0 = arith.constant 0 : i32
    return %c0_i32, %arg1 : i32, i32
  }
  func.func @transform_3(%arg0: i32, %arg1: i32, %arg2: i32) -> (i32, i32) {
    %c0_i32 = arith.constant 0 : i32
    return %arg0, %arg1 : i32, i32
  }
}

module attributes {stable_mosaic.version = 11 : i64} {
  func.func @_matmul_bias_kernel(%arg0: i32, %arg1: i32, %arg2: i32, %arg3: memref<72x128xf32, #tpu.memory_space<vmem>>, %arg4: memref<128x128xf32, #tpu.memory_space<vmem>>, %arg5: memref<1x128xf32, #tpu.memory_space<vmem>>, %arg6: memref<72x128xf32, #tpu.memory_space<vmem>>, %arg7: memref<72x128xf32, #tpu.memory_space<vmem>>) attributes {dimension_semantics = [#tpu.dimension_semantics<parallel>, #tpu.dimension_semantics<parallel>, #tpu.dimension_semantics<arbitrary>], iteration_bounds = array<i64: 1, 1, 1>, scalar_prefetch = 0 : i64, scratch_operands = 1 : i64, tpu.core_type = #tpu.core_type<tc>, window_params = [{transform_indices = @transform_0, window_bounds = array<i64: 72, 128>}, {transform_indices = @transform_1, window_bounds = array<i64: 128, 128>}, {transform_indices = @transform_2, window_bounds = array<i64: 1, 128>}, {transform_indices = @transform_3, window_bounds = array<i64: 72, 128>}]} {
    %c0_i32 = arith.constant 0 : i32
    %0 = arith.cmpi eq, %arg2, %c0_i32 : i32
    %1 = arith.extui %0 : i1 to i32
    %c0_i32_0 = arith.constant 0 : i32
    %2 = arith.cmpi ne, %1, %c0_i32_0 : i32
    scf.if %2 {
      %cst_10 = arith.constant 0.000000e+00 : f32
      %12 = vector.broadcast %cst_10 : f32 to vector<72x128xf32>
      %c0_11 = arith.constant 0 : index
      %c0_12 = arith.constant 0 : index
      %13 = vector.load %arg7[%c0_11, %c0_12] : memref<72x128xf32, #tpu.memory_space<vmem>>, vector<72x128xf32>
      tpu.vector_store %arg7[%c0_11, %c0_12], %12 {strides = array<i32>} : memref<72x128xf32, #tpu.memory_space<vmem>>, vector<72x128xf32>,
    } else {
    }
    %c0 = arith.constant 0 : index
    %c0_1 = arith.constant 0 : index
    %3 = vector.load %arg7[%c0, %c0_1] : memref<72x128xf32, #tpu.memory_space<vmem>>, vector<72x128xf32>
    %c0_2 = arith.constant 0 : index
    %c0_3 = arith.constant 0 : index
    %4 = vector.load %arg3[%c0_2, %c0_3] : memref<72x128xf32, #tpu.memory_space<vmem>>, vector<72x128xf32>
    %c0_4 = arith.constant 0 : index
    %c0_5 = arith.constant 0 : index
    %5 = vector.load %arg4[%c0_4, %c0_5] : memref<128x128xf32, #tpu.memory_space<vmem>>, vector<128x128xf32>
    %cst = arith.constant dense<0.000000e+00> : vector<72x128xf32>
    %6 = tpu.matmul %4, %5, %cst {dimension_numbers = #tpu.dot_dimension_numbers<[1], [0], [0], [1], [0, 0, 1, 1], [], []>} : vector<72x128xf32>, vector<128x128xf32>, vector<72x128xf32> -> vector<72x128xf32>
    %7 = arith.addf %3, %6 : vector<72x128xf32>
    %c0_6 = arith.constant 0 : index
    %c0_7 = arith.constant 0 : index
    %8 = vector.load %arg7[%c0_6, %c0_7] : memref<72x128xf32, #tpu.memory_space<vmem>>, vector<72x128xf32>
    tpu.vector_store %arg7[%c0_6, %c0_7], %7 {strides = array<i32>} : memref<72x128xf32, #tpu.memory_space<vmem>>, vector<72x128xf32>,
    %c0_i32_8 = arith.constant 0 : i32
    %9 = arith.cmpi eq, %arg2, %c0_i32_8 : i32
    %10 = arith.extui %9 : i1 to i32
    %c0_i32_9 = arith.constant 0 : i32
    %11 = arith.cmpi ne, %10, %c0_i32_9 : i32
    scf.if %11 {
      %c0_10 = arith.constant 0 : index
      %c0_11 = arith.constant 0 : index
      %12 = vector.load %arg7[%c0_10, %c0_11] : memref<72x128xf32, #tpu.memory_space<vmem>>, vector<72x128xf32>
      %c0_12 = arith.constant 0 : index
      %c0_13 = arith.constant 0 : index
      %13 = vector.load %arg5[%c0_12, %c0_13] : memref<1x128xf32, #tpu.memory_space<vmem>>, vector<1x128xf32>
      %14 = vector.broadcast %13 : vector<1x128xf32> to vector<72x128xf32>
      %15 = arith.addf %12, %14 : vector<72x128xf32>
      %c0_14 = arith.constant 0 : index
      %c0_15 = arith.constant 0 : index
      %16 = vector.load %arg6[%c0_14, %c0_15] : memref<72x128xf32, #tpu.memory_space<vmem>>, vector<72x128xf32>
      tpu.vector_store %arg6[%c0_14, %c0_15], %15 {strides = array<i32>} : memref<72x128xf32, #tpu.memory_space<vmem>>, vector<72x128xf32>,
    } else {
    }
    return
  }
  func.func @transform_0(%arg0: i32, %arg1: i32, %arg2: i32) -> (i32, i32) {
    %c0_i32 = arith.constant 0 : i32
    return %arg0, %arg2 : i32, i32
  }
  func.func @transform_1(%arg0: i32, %arg1: i32, %arg2: i32) -> (i32, i32) {
    %c0_i32 = arith.constant 0 : i32
    return %arg2, %arg1 : i32, i32
  }
  func.func @transform_2(%arg0: i32, %arg1: i32, %arg2: i32) -> (i32, i32) {
    %c0_i32 = arith.constant 0 : i32
    %c0_i32_0 = arith.constant 0 : i32
    return %c0_i32, %arg1 : i32, i32
  }
  func.func @transform_3(%arg0: i32, %arg1: i32, %arg2: i32) -> (i32, i32) {
    %c0_i32 = arith.constant 0 : i32
    return %arg0, %arg1 : i32, i32
  }
}

module attributes {stable_mosaic.version = 11 : i64} {
  func.func @_matmul_bias_kernel(%arg0: i32, %arg1: i32, %arg2: i32, %arg3: memref<72x128xf32, #tpu.memory_space<vmem>>, %arg4: memref<128x512xf32, #tpu.memory_space<vmem>>, %arg5: memref<1x512xf32, #tpu.memory_space<vmem>>, %arg6: memref<72x512xf32, #tpu.memory_space<vmem>>, %arg7: memref<72x512xf32, #tpu.memory_space<vmem>>) attributes {dimension_semantics = [#tpu.dimension_semantics<parallel>, #tpu.dimension_semantics<parallel>, #tpu.dimension_semantics<arbitrary>], iteration_bounds = array<i64: 1, 1, 1>, scalar_prefetch = 0 : i64, scratch_operands = 1 : i64, tpu.core_type = #tpu.core_type<tc>, window_params = [{transform_indices = @transform_0, window_bounds = array<i64: 72, 128>}, {transform_indices = @transform_1, window_bounds = array<i64: 128, 512>}, {transform_indices = @transform_2, window_bounds = array<i64: 1, 512>}, {transform_indices = @transform_3, window_bounds = array<i64: 72, 512>}]} {
    %c0_i32 = arith.constant 0 : i32
    %0 = arith.cmpi eq, %arg2, %c0_i32 : i32
    %1 = arith.extui %0 : i1 to i32
    %c0_i32_0 = arith.constant 0 : i32
    %2 = arith.cmpi ne, %1, %c0_i32_0 : i32
    scf.if %2 {
      %cst_10 = arith.constant 0.000000e+00 : f32
      %12 = vector.broadcast %cst_10 : f32 to vector<72x512xf32>
      %c0_11 = arith.constant 0 : index
      %c0_12 = arith.constant 0 : index
      %13 = vector.load %arg7[%c0_11, %c0_12] : memref<72x512xf32, #tpu.memory_space<vmem>>, vector<72x512xf32>
      tpu.vector_store %arg7[%c0_11, %c0_12], %12 {strides = array<i32>} : memref<72x512xf32, #tpu.memory_space<vmem>>, vector<72x512xf32>,
    } else {
    }
    %c0 = arith.constant 0 : index
    %c0_1 = arith.constant 0 : index
    %3 = vector.load %arg7[%c0, %c0_1] : memref<72x512xf32, #tpu.memory_space<vmem>>, vector<72x512xf32>
    %c0_2 = arith.constant 0 : index
    %c0_3 = arith.constant 0 : index
    %4 = vector.load %arg3[%c0_2, %c0_3] : memref<72x128xf32, #tpu.memory_space<vmem>>, vector<72x128xf32>
    %c0_4 = arith.constant 0 : index
    %c0_5 = arith.constant 0 : index
    %5 = vector.load %arg4[%c0_4, %c0_5] : memref<128x512xf32, #tpu.memory_space<vmem>>, vector<128x512xf32>
    %cst = arith.constant dense<0.000000e+00> : vector<72x512xf32>
    %6 = tpu.matmul %4, %5, %cst {dimension_numbers = #tpu.dot_dimension_numbers<[1], [0], [0], [1], [0, 0, 1, 1], [], []>} : vector<72x128xf32>, vector<128x512xf32>, vector<72x512xf32> -> vector<72x512xf32>
    %7 = arith.addf %3, %6 : vector<72x512xf32>
    %c0_6 = arith.constant 0 : index
    %c0_7 = arith.constant 0 : index
    %8 = vector.load %arg7[%c0_6, %c0_7] : memref<72x512xf32, #tpu.memory_space<vmem>>, vector<72x512xf32>
    tpu.vector_store %arg7[%c0_6, %c0_7], %7 {strides = array<i32>} : memref<72x512xf32, #tpu.memory_space<vmem>>, vector<72x512xf32>,
    %c0_i32_8 = arith.constant 0 : i32
    %9 = arith.cmpi eq, %arg2, %c0_i32_8 : i32
    %10 = arith.extui %9 : i1 to i32
    %c0_i32_9 = arith.constant 0 : i32
    %11 = arith.cmpi ne, %10, %c0_i32_9 : i32
    scf.if %11 {
      %c0_10 = arith.constant 0 : index
      %c0_11 = arith.constant 0 : index
      %12 = vector.load %arg7[%c0_10, %c0_11] : memref<72x512xf32, #tpu.memory_space<vmem>>, vector<72x512xf32>
      %c0_12 = arith.constant 0 : index
      %c0_13 = arith.constant 0 : index
      %13 = vector.load %arg5[%c0_12, %c0_13] : memref<1x512xf32, #tpu.memory_space<vmem>>, vector<1x512xf32>
      %14 = vector.broadcast %13 : vector<1x512xf32> to vector<72x512xf32>
      %15 = arith.addf %12, %14 : vector<72x512xf32>
      %c0_14 = arith.constant 0 : index
      %c0_15 = arith.constant 0 : index
      %16 = vector.load %arg6[%c0_14, %c0_15] : memref<72x512xf32, #tpu.memory_space<vmem>>, vector<72x512xf32>
      tpu.vector_store %arg6[%c0_14, %c0_15], %15 {strides = array<i32>} : memref<72x512xf32, #tpu.memory_space<vmem>>, vector<72x512xf32>,
    } else {
    }
    return
  }
  func.func @transform_0(%arg0: i32, %arg1: i32, %arg2: i32) -> (i32, i32) {
    %c0_i32 = arith.constant 0 : i32
    return %arg0, %arg2 : i32, i32
  }
  func.func @transform_1(%arg0: i32, %arg1: i32, %arg2: i32) -> (i32, i32) {
    %c0_i32 = arith.constant 0 : i32
    return %arg2, %arg1 : i32, i32
  }
  func.func @transform_2(%arg0: i32, %arg1: i32, %arg2: i32) -> (i32, i32) {
    %c0_i32 = arith.constant 0 : i32
    %c0_i32_0 = arith.constant 0 : i32
    return %c0_i32, %arg1 : i32, i32
  }
  func.func @transform_3(%arg0: i32, %arg1: i32, %arg2: i32) -> (i32, i32) {
    %c0_i32 = arith.constant 0 : i32
    return %arg0, %arg1 : i32, i32
  }
}

module attributes {stable_mosaic.version = 11 : i64} {
  func.func @_lstm_recurrence_kernel(%arg0: i32, %arg1: memref<9x8x512xf32, #tpu.memory_space<vmem>>, %arg2: memref<128x512xf32, #tpu.memory_space<vmem>>, %arg3: memref<9x8x128xf32, #tpu.memory_space<vmem>>, %arg4: memref<8x128xf32, #tpu.memory_space<vmem>>, %arg5: memref<8x128xf32, #tpu.memory_space<vmem>>) attributes {dimension_semantics = [#tpu.dimension_semantics<arbitrary>], iteration_bounds = array<i64: 1>, scalar_prefetch = 0 : i64, scratch_operands = 2 : i64, tpu.core_type = #tpu.core_type<tc>, window_params = [{transform_indices = @transform_0, window_bounds = array<i64: 9, 8, 512>}, {pipeline_mode = #tpu.pipeline_mode<synchronous>, transform_indices = @transform_1, window_bounds = array<i64: 128, 512>}, {transform_indices = @transform_2, window_bounds = array<i64: 9, 8, 128>}]} {
    %c0_i32 = arith.constant 0 : i32
    %0 = arith.cmpi eq, %arg0, %c0_i32 : i32
    %1 = arith.extui %0 : i1 to i32
    %c0_i32_0 = arith.constant 0 : i32
    %2 = arith.cmpi ne, %1, %c0_i32_0 : i32
    scf.if %2 {
      %cst_155 = arith.constant 0.000000e+00 : f32
      %328 = vector.broadcast %cst_155 : f32 to vector<8x128xf32>
      %c0_156 = arith.constant 0 : index
      %c0_157 = arith.constant 0 : index
      %329 = vector.load %arg4[%c0_156, %c0_157] : memref<8x128xf32, #tpu.memory_space<vmem>>, vector<8x128xf32>
      tpu.vector_store %arg4[%c0_156, %c0_157], %328 {strides = array<i32>} : memref<8x128xf32, #tpu.memory_space<vmem>>, vector<8x128xf32>,
      %cst_158 = arith.constant 0.000000e+00 : f32
      %330 = vector.broadcast %cst_158 : f32 to vector<8x128xf32>
      %c0_159 = arith.constant 0 : index
      %c0_160 = arith.constant 0 : index
      %331 = vector.load %arg5[%c0_159, %c0_160] : memref<8x128xf32, #tpu.memory_space<vmem>>, vector<8x128xf32>
      tpu.vector_store %arg5[%c0_159, %c0_160], %330 {strides = array<i32>} : memref<8x128xf32, #tpu.memory_space<vmem>>, vector<8x128xf32>,
    } else {
    }
    %c0 = arith.constant 0 : index
    %c0_1 = arith.constant 0 : index
    %3 = vector.load %arg2[%c0, %c0_1] : memref<128x512xf32, #tpu.memory_space<vmem>>, vector<128x512xf32>
    %c0_2 = arith.constant 0 : index
    %c0_3 = arith.constant 0 : index
    %c0_4 = arith.constant 0 : index
    %4 = vector.load %arg1[%c0_2, %c0_3, %c0_4] : memref<9x8x512xf32, #tpu.memory_space<vmem>>, vector<1x8x512xf32>
    %5 = vector.shape_cast %4 : vector<1x8x512xf32> to vector<8x512xf32>
    %c0_5 = arith.constant 0 : index
    %c0_6 = arith.constant 0 : index
    %6 = vector.load %arg4[%c0_5, %c0_6] : memref<8x128xf32, #tpu.memory_space<vmem>>, vector<8x128xf32>
    %cst = arith.constant dense<0.000000e+00> : vector<8x512xf32>
    %7 = tpu.matmul %6, %3, %cst {dimension_numbers = #tpu.dot_dimension_numbers<[1], [0], [0], [1], [0, 0, 1, 1], [], []>} : vector<8x128xf32>, vector<128x512xf32>, vector<8x512xf32> -> vector<8x512xf32>
    %8 = arith.addf %5, %7 : vector<8x512xf32>
    %9 = vector.extract_strided_slice %8 {offsets = [0, 0], sizes = [8, 128], strides = [1, 1]} : vector<8x512xf32> to vector<8x128xf32>
    %10 = arith.negf %9 : vector<8x128xf32>
    %11 = math.exp %10 : vector<8x128xf32>
    %cst_7 = arith.constant 1.000000e+00 : f32
    %12 = vector.broadcast %cst_7 : f32 to vector<8x128xf32>
    %13 = arith.addf %12, %11 : vector<8x128xf32>
    %14 = arith.divf %12, %13 : vector<8x128xf32>
    %15 = vector.extract_strided_slice %8 {offsets = [0, 128], sizes = [8, 128], strides = [1, 1]} : vector<8x512xf32> to vector<8x128xf32>
    %16 = arith.negf %15 : vector<8x128xf32>
    %17 = math.exp %16 : vector<8x128xf32>
    %cst_8 = arith.constant 1.000000e+00 : f32
    %18 = vector.broadcast %cst_8 : f32 to vector<8x128xf32>
    %19 = arith.addf %18, %17 : vector<8x128xf32>
    %20 = arith.divf %18, %19 : vector<8x128xf32>
    %21 = vector.extract_strided_slice %8 {offsets = [0, 256], sizes = [8, 128], strides = [1, 1]} : vector<8x512xf32> to vector<8x128xf32>
    %22 = math.tanh %21 : vector<8x128xf32>
    %23 = vector.extract_strided_slice %8 {offsets = [0, 384], sizes = [8, 128], strides = [1, 1]} : vector<8x512xf32> to vector<8x128xf32>
    %24 = arith.negf %23 : vector<8x128xf32>
    %25 = math.exp %24 : vector<8x128xf32>
    %cst_9 = arith.constant 1.000000e+00 : f32
    %26 = vector.broadcast %cst_9 : f32 to vector<8x128xf32>
    %27 = arith.addf %26, %25 : vector<8x128xf32>
    %28 = arith.divf %26, %27 : vector<8x128xf32>
    %c0_10 = arith.constant 0 : index
    %c0_11 = arith.constant 0 : index
    %29 = vector.load %arg5[%c0_10, %c0_11] : memref<8x128xf32, #tpu.memory_space<vmem>>, vector<8x128xf32>
    %30 = arith.mulf %20, %29 : vector<8x128xf32>
    %31 = arith.mulf %14, %22 : vector<8x128xf32>
    %32 = arith.addf %30, %31 : vector<8x128xf32>
    %33 = math.tanh %32 : vector<8x128xf32>
    %34 = arith.mulf %28, %33 : vector<8x128xf32>
    %c0_12 = arith.constant 0 : index
    %c0_13 = arith.constant 0 : index
    %35 = vector.load %arg5[%c0_12, %c0_13] : memref<8x128xf32, #tpu.memory_space<vmem>>, vector<8x128xf32>
    tpu.vector_store %arg5[%c0_12, %c0_13], %32 {strides = array<i32>} : memref<8x128xf32, #tpu.memory_space<vmem>>, vector<8x128xf32>,
    %c0_14 = arith.constant 0 : index
    %c0_15 = arith.constant 0 : index
    %36 = vector.load %arg4[%c0_14, %c0_15] : memref<8x128xf32, #tpu.memory_space<vmem>>, vector<8x128xf32>
    tpu.vector_store %arg4[%c0_14, %c0_15], %34 {strides = array<i32>} : memref<8x128xf32, #tpu.memory_space<vmem>>, vector<8x128xf32>,
    %c0_16 = arith.constant 0 : index
    %c0_17 = arith.constant 0 : index
    %c0_18 = arith.constant 0 : index
    %37 = vector.load %arg3[%c0_16, %c0_17, %c0_18] : memref<9x8x128xf32, #tpu.memory_space<vmem>>, vector<1x8x128xf32>
    %38 = vector.shape_cast %37 : vector<1x8x128xf32> to vector<8x128xf32>
    %39 = vector.shape_cast %34 : vector<8x128xf32> to vector<1x8x128xf32>
    tpu.vector_store %arg3[%c0_16, %c0_17, %c0_18], %39 {strides = array<i32>} : memref<9x8x128xf32, #tpu.memory_space<vmem>>, vector<1x8x128xf32>,
    %c1 = arith.constant 1 : index
    %c0_19 = arith.constant 0 : index
    %c0_20 = arith.constant 0 : index
    %40 = vector.load %arg1[%c1, %c0_19, %c0_20] : memref<9x8x512xf32, #tpu.memory_space<vmem>>, vector<1x8x512xf32>
    %41 = vector.shape_cast %40 : vector<1x8x512xf32> to vector<8x512xf32>
    %c0_21 = arith.constant 0 : index
    %c0_22 = arith.constant 0 : index
    %42 = vector.load %arg4[%c0_21, %c0_22] : memref<8x128xf32, #tpu.memory_space<vmem>>, vector<8x128xf32>
    %cst_23 = arith.constant dense<0.000000e+00> : vector<8x512xf32>
    %43 = tpu.matmul %42, %3, %cst_23 {dimension_numbers = #tpu.dot_dimension_numbers<[1], [0], [0], [1], [0, 0, 1, 1], [], []>} : vector<8x128xf32>, vector<128x512xf32>, vector<8x512xf32> -> vector<8x512xf32>
    %44 = arith.addf %41, %43 : vector<8x512xf32>
    %45 = vector.extract_strided_slice %44 {offsets = [0, 0], sizes = [8, 128], strides = [1, 1]} : vector<8x512xf32> to vector<8x128xf32>
    %46 = arith.negf %45 : vector<8x128xf32>
    %47 = math.exp %46 : vector<8x128xf32>
    %cst_24 = arith.constant 1.000000e+00 : f32
    %48 = vector.broadcast %cst_24 : f32 to vector<8x128xf32>
    %49 = arith.addf %48, %47 : vector<8x128xf32>
    %50 = arith.divf %48, %49 : vector<8x128xf32>
    %51 = vector.extract_strided_slice %44 {offsets = [0, 128], sizes = [8, 128], strides = [1, 1]} : vector<8x512xf32> to vector<8x128xf32>
    %52 = arith.negf %51 : vector<8x128xf32>
    %53 = math.exp %52 : vector<8x128xf32>
    %cst_25 = arith.constant 1.000000e+00 : f32
    %54 = vector.broadcast %cst_25 : f32 to vector<8x128xf32>
    %55 = arith.addf %54, %53 : vector<8x128xf32>
    %56 = arith.divf %54, %55 : vector<8x128xf32>
    %57 = vector.extract_strided_slice %44 {offsets = [0, 256], sizes = [8, 128], strides = [1, 1]} : vector<8x512xf32> to vector<8x128xf32>
    %58 = math.tanh %57 : vector<8x128xf32>
    %59 = vector.extract_strided_slice %44 {offsets = [0, 384], sizes = [8, 128], strides = [1, 1]} : vector<8x512xf32> to vector<8x128xf32>
    %60 = arith.negf %59 : vector<8x128xf32>
    %61 = math.exp %60 : vector<8x128xf32>
    %cst_26 = arith.constant 1.000000e+00 : f32
    %62 = vector.broadcast %cst_26 : f32 to vector<8x128xf32>
    %63 = arith.addf %62, %61 : vector<8x128xf32>
    %64 = arith.divf %62, %63 : vector<8x128xf32>
    %c0_27 = arith.constant 0 : index
    %c0_28 = arith.constant 0 : index
    %65 = vector.load %arg5[%c0_27, %c0_28] : memref<8x128xf32, #tpu.memory_space<vmem>>, vector<8x128xf32>
    %66 = arith.mulf %56, %65 : vector<8x128xf32>
    %67 = arith.mulf %50, %58 : vector<8x128xf32>
    %68 = arith.addf %66, %67 : vector<8x128xf32>
    %69 = math.tanh %68 : vector<8x128xf32>
    %70 = arith.mulf %64, %69 : vector<8x128xf32>
    %c0_29 = arith.constant 0 : index
    %c0_30 = arith.constant 0 : index
    %71 = vector.load %arg5[%c0_29, %c0_30] : memref<8x128xf32, #tpu.memory_space<vmem>>, vector<8x128xf32>
    tpu.vector_store %arg5[%c0_29, %c0_30], %68 {strides = array<i32>} : memref<8x128xf32, #tpu.memory_space<vmem>>, vector<8x128xf32>,
    %c0_31 = arith.constant 0 : index
    %c0_32 = arith.constant 0 : index
    %72 = vector.load %arg4[%c0_31, %c0_32] : memref<8x128xf32, #tpu.memory_space<vmem>>, vector<8x128xf32>
    tpu.vector_store %arg4[%c0_31, %c0_32], %70 {strides = array<i32>} : memref<8x128xf32, #tpu.memory_space<vmem>>, vector<8x128xf32>,
    %c1_33 = arith.constant 1 : index
    %c0_34 = arith.constant 0 : index
    %c0_35 = arith.constant 0 : index
    %73 = vector.load %arg3[%c1_33, %c0_34, %c0_35] : memref<9x8x128xf32, #tpu.memory_space<vmem>>, vector<1x8x128xf32>
    %74 = vector.shape_cast %73 : vector<1x8x128xf32> to vector<8x128xf32>
    %75 = vector.shape_cast %70 : vector<8x128xf32> to vector<1x8x128xf32>
    tpu.vector_store %arg3[%c1_33, %c0_34, %c0_35], %75 {strides = array<i32>} : memref<9x8x128xf32, #tpu.memory_space<vmem>>, vector<1x8x128xf32>,
    %c2 = arith.constant 2 : index
    %c0_36 = arith.constant 0 : index
    %c0_37 = arith.constant 0 : index
    %76 = vector.load %arg1[%c2, %c0_36, %c0_37] : memref<9x8x512xf32, #tpu.memory_space<vmem>>, vector<1x8x512xf32>
    %77 = vector.shape_cast %76 : vector<1x8x512xf32> to vector<8x512xf32>
    %c0_38 = arith.constant 0 : index
    %c0_39 = arith.constant 0 : index
    %78 = vector.load %arg4[%c0_38, %c0_39] : memref<8x128xf32, #tpu.memory_space<vmem>>, vector<8x128xf32>
    %cst_40 = arith.constant dense<0.000000e+00> : vector<8x512xf32>
    %79 = tpu.matmul %78, %3, %cst_40 {dimension_numbers = #tpu.dot_dimension_numbers<[1], [0], [0], [1], [0, 0, 1, 1], [], []>} : vector<8x128xf32>, vector<128x512xf32>, vector<8x512xf32> -> vector<8x512xf32>
    %80 = arith.addf %77, %79 : vector<8x512xf32>
    %81 = vector.extract_strided_slice %80 {offsets = [0, 0], sizes = [8, 128], strides = [1, 1]} : vector<8x512xf32> to vector<8x128xf32>
    %82 = arith.negf %81 : vector<8x128xf32>
    %83 = math.exp %82 : vector<8x128xf32>
    %cst_41 = arith.constant 1.000000e+00 : f32
    %84 = vector.broadcast %cst_41 : f32 to vector<8x128xf32>
    %85 = arith.addf %84, %83 : vector<8x128xf32>
    %86 = arith.divf %84, %85 : vector<8x128xf32>
    %87 = vector.extract_strided_slice %80 {offsets = [0, 128], sizes = [8, 128], strides = [1, 1]} : vector<8x512xf32> to vector<8x128xf32>
    %88 = arith.negf %87 : vector<8x128xf32>
    %89 = math.exp %88 : vector<8x128xf32>
    %cst_42 = arith.constant 1.000000e+00 : f32
    %90 = vector.broadcast %cst_42 : f32 to vector<8x128xf32>
    %91 = arith.addf %90, %89 : vector<8x128xf32>
    %92 = arith.divf %90, %91 : vector<8x128xf32>
    %93 = vector.extract_strided_slice %80 {offsets = [0, 256], sizes = [8, 128], strides = [1, 1]} : vector<8x512xf32> to vector<8x128xf32>
    %94 = math.tanh %93 : vector<8x128xf32>
    %95 = vector.extract_strided_slice %80 {offsets = [0, 384], sizes = [8, 128], strides = [1, 1]} : vector<8x512xf32> to vector<8x128xf32>
    %96 = arith.negf %95 : vector<8x128xf32>
    %97 = math.exp %96 : vector<8x128xf32>
    %cst_43 = arith.constant 1.000000e+00 : f32
    %98 = vector.broadcast %cst_43 : f32 to vector<8x128xf32>
    %99 = arith.addf %98, %97 : vector<8x128xf32>
    %100 = arith.divf %98, %99 : vector<8x128xf32>
    %c0_44 = arith.constant 0 : index
    %c0_45 = arith.constant 0 : index
    %101 = vector.load %arg5[%c0_44, %c0_45] : memref<8x128xf32, #tpu.memory_space<vmem>>, vector<8x128xf32>
    %102 = arith.mulf %92, %101 : vector<8x128xf32>
    %103 = arith.mulf %86, %94 : vector<8x128xf32>
    %104 = arith.addf %102, %103 : vector<8x128xf32>
    %105 = math.tanh %104 : vector<8x128xf32>
    %106 = arith.mulf %100, %105 : vector<8x128xf32>
    %c0_46 = arith.constant 0 : index
    %c0_47 = arith.constant 0 : index
    %107 = vector.load %arg5[%c0_46, %c0_47] : memref<8x128xf32, #tpu.memory_space<vmem>>, vector<8x128xf32>
    tpu.vector_store %arg5[%c0_46, %c0_47], %104 {strides = array<i32>} : memref<8x128xf32, #tpu.memory_space<vmem>>, vector<8x128xf32>,
    %c0_48 = arith.constant 0 : index
    %c0_49 = arith.constant 0 : index
    %108 = vector.load %arg4[%c0_48, %c0_49] : memref<8x128xf32, #tpu.memory_space<vmem>>, vector<8x128xf32>
    tpu.vector_store %arg4[%c0_48, %c0_49], %106 {strides = array<i32>} : memref<8x128xf32, #tpu.memory_space<vmem>>, vector<8x128xf32>,
    %c2_50 = arith.constant 2 : index
    %c0_51 = arith.constant 0 : index
    %c0_52 = arith.constant 0 : index
    %109 = vector.load %arg3[%c2_50, %c0_51, %c0_52] : memref<9x8x128xf32, #tpu.memory_space<vmem>>, vector<1x8x128xf32>
    %110 = vector.shape_cast %109 : vector<1x8x128xf32> to vector<8x128xf32>
    %111 = vector.shape_cast %106 : vector<8x128xf32> to vector<1x8x128xf32>
    tpu.vector_store %arg3[%c2_50, %c0_51, %c0_52], %111 {strides = array<i32>} : memref<9x8x128xf32, #tpu.memory_space<vmem>>, vector<1x8x128xf32>,
    %c3 = arith.constant 3 : index
    %c0_53 = arith.constant 0 : index
    %c0_54 = arith.constant 0 : index
    %112 = vector.load %arg1[%c3, %c0_53, %c0_54] : memref<9x8x512xf32, #tpu.memory_space<vmem>>, vector<1x8x512xf32>
    %113 = vector.shape_cast %112 : vector<1x8x512xf32> to vector<8x512xf32>
    %c0_55 = arith.constant 0 : index
    %c0_56 = arith.constant 0 : index
    %114 = vector.load %arg4[%c0_55, %c0_56] : memref<8x128xf32, #tpu.memory_space<vmem>>, vector<8x128xf32>
    %cst_57 = arith.constant dense<0.000000e+00> : vector<8x512xf32>
    %115 = tpu.matmul %114, %3, %cst_57 {dimension_numbers = #tpu.dot_dimension_numbers<[1], [0], [0], [1], [0, 0, 1, 1], [], []>} : vector<8x128xf32>, vector<128x512xf32>, vector<8x512xf32> -> vector<8x512xf32>
    %116 = arith.addf %113, %115 : vector<8x512xf32>
    %117 = vector.extract_strided_slice %116 {offsets = [0, 0], sizes = [8, 128], strides = [1, 1]} : vector<8x512xf32> to vector<8x128xf32>
    %118 = arith.negf %117 : vector<8x128xf32>
    %119 = math.exp %118 : vector<8x128xf32>
    %cst_58 = arith.constant 1.000000e+00 : f32
    %120 = vector.broadcast %cst_58 : f32 to vector<8x128xf32>
    %121 = arith.addf %120, %119 : vector<8x128xf32>
    %122 = arith.divf %120, %121 : vector<8x128xf32>
    %123 = vector.extract_strided_slice %116 {offsets = [0, 128], sizes = [8, 128], strides = [1, 1]} : vector<8x512xf32> to vector<8x128xf32>
    %124 = arith.negf %123 : vector<8x128xf32>
    %125 = math.exp %124 : vector<8x128xf32>
    %cst_59 = arith.constant 1.000000e+00 : f32
    %126 = vector.broadcast %cst_59 : f32 to vector<8x128xf32>
    %127 = arith.addf %126, %125 : vector<8x128xf32>
    %128 = arith.divf %126, %127 : vector<8x128xf32>
    %129 = vector.extract_strided_slice %116 {offsets = [0, 256], sizes = [8, 128], strides = [1, 1]} : vector<8x512xf32> to vector<8x128xf32>
    %130 = math.tanh %129 : vector<8x128xf32>
    %131 = vector.extract_strided_slice %116 {offsets = [0, 384], sizes = [8, 128], strides = [1, 1]} : vector<8x512xf32> to vector<8x128xf32>
    %132 = arith.negf %131 : vector<8x128xf32>
    %133 = math.exp %132 : vector<8x128xf32>
    %cst_60 = arith.constant 1.000000e+00 : f32
    %134 = vector.broadcast %cst_60 : f32 to vector<8x128xf32>
    %135 = arith.addf %134, %133 : vector<8x128xf32>
    %136 = arith.divf %134, %135 : vector<8x128xf32>
    %c0_61 = arith.constant 0 : index
    %c0_62 = arith.constant 0 : index
    %137 = vector.load %arg5[%c0_61, %c0_62] : memref<8x128xf32, #tpu.memory_space<vmem>>, vector<8x128xf32>
    %138 = arith.mulf %128, %137 : vector<8x128xf32>
    %139 = arith.mulf %122, %130 : vector<8x128xf32>
    %140 = arith.addf %138, %139 : vector<8x128xf32>
    %141 = math.tanh %140 : vector<8x128xf32>
    %142 = arith.mulf %136, %141 : vector<8x128xf32>
    %c0_63 = arith.constant 0 : index
    %c0_64 = arith.constant 0 : index
    %143 = vector.load %arg5[%c0_63, %c0_64] : memref<8x128xf32, #tpu.memory_space<vmem>>, vector<8x128xf32>
    tpu.vector_store %arg5[%c0_63, %c0_64], %140 {strides = array<i32>} : memref<8x128xf32, #tpu.memory_space<vmem>>, vector<8x128xf32>,
    %c0_65 = arith.constant 0 : index
    %c0_66 = arith.constant 0 : index
    %144 = vector.load %arg4[%c0_65, %c0_66] : memref<8x128xf32, #tpu.memory_space<vmem>>, vector<8x128xf32>
    tpu.vector_store %arg4[%c0_65, %c0_66], %142 {strides = array<i32>} : memref<8x128xf32, #tpu.memory_space<vmem>>, vector<8x128xf32>,
    %c3_67 = arith.constant 3 : index
    %c0_68 = arith.constant 0 : index
    %c0_69 = arith.constant 0 : index
    %145 = vector.load %arg3[%c3_67, %c0_68, %c0_69] : memref<9x8x128xf32, #tpu.memory_space<vmem>>, vector<1x8x128xf32>
    %146 = vector.shape_cast %145 : vector<1x8x128xf32> to vector<8x128xf32>
    %147 = vector.shape_cast %142 : vector<8x128xf32> to vector<1x8x128xf32>
    tpu.vector_store %arg3[%c3_67, %c0_68, %c0_69], %147 {strides = array<i32>} : memref<9x8x128xf32, #tpu.memory_space<vmem>>, vector<1x8x128xf32>,
    %c4 = arith.constant 4 : index
    %c0_70 = arith.constant 0 : index
    %c0_71 = arith.constant 0 : index
    %148 = vector.load %arg1[%c4, %c0_70, %c0_71] : memref<9x8x512xf32, #tpu.memory_space<vmem>>, vector<1x8x512xf32>
    %149 = vector.shape_cast %148 : vector<1x8x512xf32> to vector<8x512xf32>
    %c0_72 = arith.constant 0 : index
    %c0_73 = arith.constant 0 : index
    %150 = vector.load %arg4[%c0_72, %c0_73] : memref<8x128xf32, #tpu.memory_space<vmem>>, vector<8x128xf32>
    %cst_74 = arith.constant dense<0.000000e+00> : vector<8x512xf32>
    %151 = tpu.matmul %150, %3, %cst_74 {dimension_numbers = #tpu.dot_dimension_numbers<[1], [0], [0], [1], [0, 0, 1, 1], [], []>} : vector<8x128xf32>, vector<128x512xf32>, vector<8x512xf32> -> vector<8x512xf32>
    %152 = arith.addf %149, %151 : vector<8x512xf32>
    %153 = vector.extract_strided_slice %152 {offsets = [0, 0], sizes = [8, 128], strides = [1, 1]} : vector<8x512xf32> to vector<8x128xf32>
    %154 = arith.negf %153 : vector<8x128xf32>
    %155 = math.exp %154 : vector<8x128xf32>
    %cst_75 = arith.constant 1.000000e+00 : f32
    %156 = vector.broadcast %cst_75 : f32 to vector<8x128xf32>
    %157 = arith.addf %156, %155 : vector<8x128xf32>
    %158 = arith.divf %156, %157 : vector<8x128xf32>
    %159 = vector.extract_strided_slice %152 {offsets = [0, 128], sizes = [8, 128], strides = [1, 1]} : vector<8x512xf32> to vector<8x128xf32>
    %160 = arith.negf %159 : vector<8x128xf32>
    %161 = math.exp %160 : vector<8x128xf32>
    %cst_76 = arith.constant 1.000000e+00 : f32
    %162 = vector.broadcast %cst_76 : f32 to vector<8x128xf32>
    %163 = arith.addf %162, %161 : vector<8x128xf32>
    %164 = arith.divf %162, %163 : vector<8x128xf32>
    %165 = vector.extract_strided_slice %152 {offsets = [0, 256], sizes = [8, 128], strides = [1, 1]} : vector<8x512xf32> to vector<8x128xf32>
    %166 = math.tanh %165 : vector<8x128xf32>
    %167 = vector.extract_strided_slice %152 {offsets = [0, 384], sizes = [8, 128], strides = [1, 1]} : vector<8x512xf32> to vector<8x128xf32>
    %168 = arith.negf %167 : vector<8x128xf32>
    %169 = math.exp %168 : vector<8x128xf32>
    %cst_77 = arith.constant 1.000000e+00 : f32
    %170 = vector.broadcast %cst_77 : f32 to vector<8x128xf32>
    %171 = arith.addf %170, %169 : vector<8x128xf32>
    %172 = arith.divf %170, %171 : vector<8x128xf32>
    %c0_78 = arith.constant 0 : index
    %c0_79 = arith.constant 0 : index
    %173 = vector.load %arg5[%c0_78, %c0_79] : memref<8x128xf32, #tpu.memory_space<vmem>>, vector<8x128xf32>
    %174 = arith.mulf %164, %173 : vector<8x128xf32>
    %175 = arith.mulf %158, %166 : vector<8x128xf32>
    %176 = arith.addf %174, %175 : vector<8x128xf32>
    %177 = math.tanh %176 : vector<8x128xf32>
    %178 = arith.mulf %172, %177 : vector<8x128xf32>
    %c0_80 = arith.constant 0 : index
    %c0_81 = arith.constant 0 : index
    %179 = vector.load %arg5[%c0_80, %c0_81] : memref<8x128xf32, #tpu.memory_space<vmem>>, vector<8x128xf32>
    tpu.vector_store %arg5[%c0_80, %c0_81], %176 {strides = array<i32>} : memref<8x128xf32, #tpu.memory_space<vmem>>, vector<8x128xf32>,
    %c0_82 = arith.constant 0 : index
    %c0_83 = arith.constant 0 : index
    %180 = vector.load %arg4[%c0_82, %c0_83] : memref<8x128xf32, #tpu.memory_space<vmem>>, vector<8x128xf32>
    tpu.vector_store %arg4[%c0_82, %c0_83], %178 {strides = array<i32>} : memref<8x128xf32, #tpu.memory_space<vmem>>, vector<8x128xf32>,
    %c4_84 = arith.constant 4 : index
    %c0_85 = arith.constant 0 : index
    %c0_86 = arith.constant 0 : index
    %181 = vector.load %arg3[%c4_84, %c0_85, %c0_86] : memref<9x8x128xf32, #tpu.memory_space<vmem>>, vector<1x8x128xf32>
    %182 = vector.shape_cast %181 : vector<1x8x128xf32> to vector<8x128xf32>
    %183 = vector.shape_cast %178 : vector<8x128xf32> to vector<1x8x128xf32>
    tpu.vector_store %arg3[%c4_84, %c0_85, %c0_86], %183 {strides = array<i32>} : memref<9x8x128xf32, #tpu.memory_space<vmem>>, vector<1x8x128xf32>,
    %c5 = arith.constant 5 : index
    %c0_87 = arith.constant 0 : index
    %c0_88 = arith.constant 0 : index
    %184 = vector.load %arg1[%c5, %c0_87, %c0_88] : memref<9x8x512xf32, #tpu.memory_space<vmem>>, vector<1x8x512xf32>
    %185 = vector.shape_cast %184 : vector<1x8x512xf32> to vector<8x512xf32>
    %c0_89 = arith.constant 0 : index
    %c0_90 = arith.constant 0 : index
    %186 = vector.load %arg4[%c0_89, %c0_90] : memref<8x128xf32, #tpu.memory_space<vmem>>, vector<8x128xf32>
    %cst_91 = arith.constant dense<0.000000e+00> : vector<8x512xf32>
    %187 = tpu.matmul %186, %3, %cst_91 {dimension_numbers = #tpu.dot_dimension_numbers<[1], [0], [0], [1], [0, 0, 1, 1], [], []>} : vector<8x128xf32>, vector<128x512xf32>, vector<8x512xf32> -> vector<8x512xf32>
    %188 = arith.addf %185, %187 : vector<8x512xf32>
    %189 = vector.extract_strided_slice %188 {offsets = [0, 0], sizes = [8, 128], strides = [1, 1]} : vector<8x512xf32> to vector<8x128xf32>
    %190 = arith.negf %189 : vector<8x128xf32>
    %191 = math.exp %190 : vector<8x128xf32>
    %cst_92 = arith.constant 1.000000e+00 : f32
    %192 = vector.broadcast %cst_92 : f32 to vector<8x128xf32>
    %193 = arith.addf %192, %191 : vector<8x128xf32>
    %194 = arith.divf %192, %193 : vector<8x128xf32>
    %195 = vector.extract_strided_slice %188 {offsets = [0, 128], sizes = [8, 128], strides = [1, 1]} : vector<8x512xf32> to vector<8x128xf32>
    %196 = arith.negf %195 : vector<8x128xf32>
    %197 = math.exp %196 : vector<8x128xf32>
    %cst_93 = arith.constant 1.000000e+00 : f32
    %198 = vector.broadcast %cst_93 : f32 to vector<8x128xf32>
    %199 = arith.addf %198, %197 : vector<8x128xf32>
    %200 = arith.divf %198, %199 : vector<8x128xf32>
    %201 = vector.extract_strided_slice %188 {offsets = [0, 256], sizes = [8, 128], strides = [1, 1]} : vector<8x512xf32> to vector<8x128xf32>
    %202 = math.tanh %201 : vector<8x128xf32>
    %203 = vector.extract_strided_slice %188 {offsets = [0, 384], sizes = [8, 128], strides = [1, 1]} : vector<8x512xf32> to vector<8x128xf32>
    %204 = arith.negf %203 : vector<8x128xf32>
    %205 = math.exp %204 : vector<8x128xf32>
    %cst_94 = arith.constant 1.000000e+00 : f32
    %206 = vector.broadcast %cst_94 : f32 to vector<8x128xf32>
    %207 = arith.addf %206, %205 : vector<8x128xf32>
    %208 = arith.divf %206, %207 : vector<8x128xf32>
    %c0_95 = arith.constant 0 : index
    %c0_96 = arith.constant 0 : index
    %209 = vector.load %arg5[%c0_95, %c0_96] : memref<8x128xf32, #tpu.memory_space<vmem>>, vector<8x128xf32>
    %210 = arith.mulf %200, %209 : vector<8x128xf32>
    %211 = arith.mulf %194, %202 : vector<8x128xf32>
    %212 = arith.addf %210, %211 : vector<8x128xf32>
    %213 = math.tanh %212 : vector<8x128xf32>
    %214 = arith.mulf %208, %213 : vector<8x128xf32>
    %c0_97 = arith.constant 0 : index
    %c0_98 = arith.constant 0 : index
    %215 = vector.load %arg5[%c0_97, %c0_98] : memref<8x128xf32, #tpu.memory_space<vmem>>, vector<8x128xf32>
    tpu.vector_store %arg5[%c0_97, %c0_98], %212 {strides = array<i32>} : memref<8x128xf32, #tpu.memory_space<vmem>>, vector<8x128xf32>,
    %c0_99 = arith.constant 0 : index
    %c0_100 = arith.constant 0 : index
    %216 = vector.load %arg4[%c0_99, %c0_100] : memref<8x128xf32, #tpu.memory_space<vmem>>, vector<8x128xf32>
    tpu.vector_store %arg4[%c0_99, %c0_100], %214 {strides = array<i32>} : memref<8x128xf32, #tpu.memory_space<vmem>>, vector<8x128xf32>,
    %c5_101 = arith.constant 5 : index
    %c0_102 = arith.constant 0 : index
    %c0_103 = arith.constant 0 : index
    %217 = vector.load %arg3[%c5_101, %c0_102, %c0_103] : memref<9x8x128xf32, #tpu.memory_space<vmem>>, vector<1x8x128xf32>
    %218 = vector.shape_cast %217 : vector<1x8x128xf32> to vector<8x128xf32>
    %219 = vector.shape_cast %214 : vector<8x128xf32> to vector<1x8x128xf32>
    tpu.vector_store %arg3[%c5_101, %c0_102, %c0_103], %219 {strides = array<i32>} : memref<9x8x128xf32, #tpu.memory_space<vmem>>, vector<1x8x128xf32>,
    %c6 = arith.constant 6 : index
    %c0_104 = arith.constant 0 : index
    %c0_105 = arith.constant 0 : index
    %220 = vector.load %arg1[%c6, %c0_104, %c0_105] : memref<9x8x512xf32, #tpu.memory_space<vmem>>, vector<1x8x512xf32>
    %221 = vector.shape_cast %220 : vector<1x8x512xf32> to vector<8x512xf32>
    %c0_106 = arith.constant 0 : index
    %c0_107 = arith.constant 0 : index
    %222 = vector.load %arg4[%c0_106, %c0_107] : memref<8x128xf32, #tpu.memory_space<vmem>>, vector<8x128xf32>
    %cst_108 = arith.constant dense<0.000000e+00> : vector<8x512xf32>
    %223 = tpu.matmul %222, %3, %cst_108 {dimension_numbers = #tpu.dot_dimension_numbers<[1], [0], [0], [1], [0, 0, 1, 1], [], []>} : vector<8x128xf32>, vector<128x512xf32>, vector<8x512xf32> -> vector<8x512xf32>
    %224 = arith.addf %221, %223 : vector<8x512xf32>
    %225 = vector.extract_strided_slice %224 {offsets = [0, 0], sizes = [8, 128], strides = [1, 1]} : vector<8x512xf32> to vector<8x128xf32>
    %226 = arith.negf %225 : vector<8x128xf32>
    %227 = math.exp %226 : vector<8x128xf32>
    %cst_109 = arith.constant 1.000000e+00 : f32
    %228 = vector.broadcast %cst_109 : f32 to vector<8x128xf32>
    %229 = arith.addf %228, %227 : vector<8x128xf32>
    %230 = arith.divf %228, %229 : vector<8x128xf32>
    %231 = vector.extract_strided_slice %224 {offsets = [0, 128], sizes = [8, 128], strides = [1, 1]} : vector<8x512xf32> to vector<8x128xf32>
    %232 = arith.negf %231 : vector<8x128xf32>
    %233 = math.exp %232 : vector<8x128xf32>
    %cst_110 = arith.constant 1.000000e+00 : f32
    %234 = vector.broadcast %cst_110 : f32 to vector<8x128xf32>
    %235 = arith.addf %234, %233 : vector<8x128xf32>
    %236 = arith.divf %234, %235 : vector<8x128xf32>
    %237 = vector.extract_strided_slice %224 {offsets = [0, 256], sizes = [8, 128], strides = [1, 1]} : vector<8x512xf32> to vector<8x128xf32>
    %238 = math.tanh %237 : vector<8x128xf32>
    %239 = vector.extract_strided_slice %224 {offsets = [0, 384], sizes = [8, 128], strides = [1, 1]} : vector<8x512xf32> to vector<8x128xf32>
    %240 = arith.negf %239 : vector<8x128xf32>
    %241 = math.exp %240 : vector<8x128xf32>
    %cst_111 = arith.constant 1.000000e+00 : f32
    %242 = vector.broadcast %cst_111 : f32 to vector<8x128xf32>
    %243 = arith.addf %242, %241 : vector<8x128xf32>
    %244 = arith.divf %242, %243 : vector<8x128xf32>
    %c0_112 = arith.constant 0 : index
    %c0_113 = arith.constant 0 : index
    %245 = vector.load %arg5[%c0_112, %c0_113] : memref<8x128xf32, #tpu.memory_space<vmem>>, vector<8x128xf32>
    %246 = arith.mulf %236, %245 : vector<8x128xf32>
    %247 = arith.mulf %230, %238 : vector<8x128xf32>
    %248 = arith.addf %246, %247 : vector<8x128xf32>
    %249 = math.tanh %248 : vector<8x128xf32>
    %250 = arith.mulf %244, %249 : vector<8x128xf32>
    %c0_114 = arith.constant 0 : index
    %c0_115 = arith.constant 0 : index
    %251 = vector.load %arg5[%c0_114, %c0_115] : memref<8x128xf32, #tpu.memory_space<vmem>>, vector<8x128xf32>
    tpu.vector_store %arg5[%c0_114, %c0_115], %248 {strides = array<i32>} : memref<8x128xf32, #tpu.memory_space<vmem>>, vector<8x128xf32>,
    %c0_116 = arith.constant 0 : index
    %c0_117 = arith.constant 0 : index
    %252 = vector.load %arg4[%c0_116, %c0_117] : memref<8x128xf32, #tpu.memory_space<vmem>>, vector<8x128xf32>
    tpu.vector_store %arg4[%c0_116, %c0_117], %250 {strides = array<i32>} : memref<8x128xf32, #tpu.memory_space<vmem>>, vector<8x128xf32>,
    %c6_118 = arith.constant 6 : index
    %c0_119 = arith.constant 0 : index
    %c0_120 = arith.constant 0 : index
    %253 = vector.load %arg3[%c6_118, %c0_119, %c0_120] : memref<9x8x128xf32, #tpu.memory_space<vmem>>, vector<1x8x128xf32>
    %254 = vector.shape_cast %253 : vector<1x8x128xf32> to vector<8x128xf32>
    %255 = vector.shape_cast %250 : vector<8x128xf32> to vector<1x8x128xf32>
    tpu.vector_store %arg3[%c6_118, %c0_119, %c0_120], %255 {strides = array<i32>} : memref<9x8x128xf32, #tpu.memory_space<vmem>>, vector<1x8x128xf32>,
    %c7 = arith.constant 7 : index
    %c0_121 = arith.constant 0 : index
    %c0_122 = arith.constant 0 : index
    %256 = vector.load %arg1[%c7, %c0_121, %c0_122] : memref<9x8x512xf32, #tpu.memory_space<vmem>>, vector<1x8x512xf32>
    %257 = vector.shape_cast %256 : vector<1x8x512xf32> to vector<8x512xf32>
    %c0_123 = arith.constant 0 : index
    %c0_124 = arith.constant 0 : index
    %258 = vector.load %arg4[%c0_123, %c0_124] : memref<8x128xf32, #tpu.memory_space<vmem>>, vector<8x128xf32>
    %cst_125 = arith.constant dense<0.000000e+00> : vector<8x512xf32>
    %259 = tpu.matmul %258, %3, %cst_125 {dimension_numbers = #tpu.dot_dimension_numbers<[1], [0], [0], [1], [0, 0, 1, 1], [], []>} : vector<8x128xf32>, vector<128x512xf32>, vector<8x512xf32> -> vector<8x512xf32>
    %260 = arith.addf %257, %259 : vector<8x512xf32>
    %261 = vector.extract_strided_slice %260 {offsets = [0, 0], sizes = [8, 128], strides = [1, 1]} : vector<8x512xf32> to vector<8x128xf32>
    %262 = arith.negf %261 : vector<8x128xf32>
    %263 = math.exp %262 : vector<8x128xf32>
    %cst_126 = arith.constant 1.000000e+00 : f32
    %264 = vector.broadcast %cst_126 : f32 to vector<8x128xf32>
    %265 = arith.addf %264, %263 : vector<8x128xf32>
    %266 = arith.divf %264, %265 : vector<8x128xf32>
    %267 = vector.extract_strided_slice %260 {offsets = [0, 128], sizes = [8, 128], strides = [1, 1]} : vector<8x512xf32> to vector<8x128xf32>
    %268 = arith.negf %267 : vector<8x128xf32>
    %269 = math.exp %268 : vector<8x128xf32>
    %cst_127 = arith.constant 1.000000e+00 : f32
    %270 = vector.broadcast %cst_127 : f32 to vector<8x128xf32>
    %271 = arith.addf %270, %269 : vector<8x128xf32>
    %272 = arith.divf %270, %271 : vector<8x128xf32>
    %273 = vector.extract_strided_slice %260 {offsets = [0, 256], sizes = [8, 128], strides = [1, 1]} : vector<8x512xf32> to vector<8x128xf32>
    %274 = math.tanh %273 : vector<8x128xf32>
    %275 = vector.extract_strided_slice %260 {offsets = [0, 384], sizes = [8, 128], strides = [1, 1]} : vector<8x512xf32> to vector<8x128xf32>
    %276 = arith.negf %275 : vector<8x128xf32>
    %277 = math.exp %276 : vector<8x128xf32>
    %cst_128 = arith.constant 1.000000e+00 : f32
    %278 = vector.broadcast %cst_128 : f32 to vector<8x128xf32>
    %279 = arith.addf %278, %277 : vector<8x128xf32>
    %280 = arith.divf %278, %279 : vector<8x128xf32>
    %c0_129 = arith.constant 0 : index
    %c0_130 = arith.constant 0 : index
    %281 = vector.load %arg5[%c0_129, %c0_130] : memref<8x128xf32, #tpu.memory_space<vmem>>, vector<8x128xf32>
    %282 = arith.mulf %272, %281 : vector<8x128xf32>
    %283 = arith.mulf %266, %274 : vector<8x128xf32>
    %284 = arith.addf %282, %283 : vector<8x128xf32>
    %285 = math.tanh %284 : vector<8x128xf32>
    %286 = arith.mulf %280, %285 : vector<8x128xf32>
    %c0_131 = arith.constant 0 : index
    %c0_132 = arith.constant 0 : index
    %287 = vector.load %arg5[%c0_131, %c0_132] : memref<8x128xf32, #tpu.memory_space<vmem>>, vector<8x128xf32>
    tpu.vector_store %arg5[%c0_131, %c0_132], %284 {strides = array<i32>} : memref<8x128xf32, #tpu.memory_space<vmem>>, vector<8x128xf32>,
    %c0_133 = arith.constant 0 : index
    %c0_134 = arith.constant 0 : index
    %288 = vector.load %arg4[%c0_133, %c0_134] : memref<8x128xf32, #tpu.memory_space<vmem>>, vector<8x128xf32>
    tpu.vector_store %arg4[%c0_133, %c0_134], %286 {strides = array<i32>} : memref<8x128xf32, #tpu.memory_space<vmem>>, vector<8x128xf32>,
    %c7_135 = arith.constant 7 : index
    %c0_136 = arith.constant 0 : index
    %c0_137 = arith.constant 0 : index
    %289 = vector.load %arg3[%c7_135, %c0_136, %c0_137] : memref<9x8x128xf32, #tpu.memory_space<vmem>>, vector<1x8x128xf32>
    %290 = vector.shape_cast %289 : vector<1x8x128xf32> to vector<8x128xf32>
    %291 = vector.shape_cast %286 : vector<8x128xf32> to vector<1x8x128xf32>
    tpu.vector_store %arg3[%c7_135, %c0_136, %c0_137], %291 {strides = array<i32>} : memref<9x8x128xf32, #tpu.memory_space<vmem>>, vector<1x8x128xf32>,
    %c8 = arith.constant 8 : index
    %c0_138 = arith.constant 0 : index
    %c0_139 = arith.constant 0 : index
    %292 = vector.load %arg1[%c8, %c0_138, %c0_139] : memref<9x8x512xf32, #tpu.memory_space<vmem>>, vector<1x8x512xf32>
    %293 = vector.shape_cast %292 : vector<1x8x512xf32> to vector<8x512xf32>
    %c0_140 = arith.constant 0 : index
    %c0_141 = arith.constant 0 : index
    %294 = vector.load %arg4[%c0_140, %c0_141] : memref<8x128xf32, #tpu.memory_space<vmem>>, vector<8x128xf32>
    %cst_142 = arith.constant dense<0.000000e+00> : vector<8x512xf32>
    %295 = tpu.matmul %294, %3, %cst_142 {dimension_numbers = #tpu.dot_dimension_numbers<[1], [0], [0], [1], [0, 0, 1, 1], [], []>} : vector<8x128xf32>, vector<128x512xf32>, vector<8x512xf32> -> vector<8x512xf32>
    %296 = arith.addf %293, %295 : vector<8x512xf32>
    %297 = vector.extract_strided_slice %296 {offsets = [0, 0], sizes = [8, 128], strides = [1, 1]} : vector<8x512xf32> to vector<8x128xf32>
    %298 = arith.negf %297 : vector<8x128xf32>
    %299 = math.exp %298 : vector<8x128xf32>
    %cst_143 = arith.constant 1.000000e+00 : f32
    %300 = vector.broadcast %cst_143 : f32 to vector<8x128xf32>
    %301 = arith.addf %300, %299 : vector<8x128xf32>
    %302 = arith.divf %300, %301 : vector<8x128xf32>
    %303 = vector.extract_strided_slice %296 {offsets = [0, 128], sizes = [8, 128], strides = [1, 1]} : vector<8x512xf32> to vector<8x128xf32>
    %304 = arith.negf %303 : vector<8x128xf32>
    %305 = math.exp %304 : vector<8x128xf32>
    %cst_144 = arith.constant 1.000000e+00 : f32
    %306 = vector.broadcast %cst_144 : f32 to vector<8x128xf32>
    %307 = arith.addf %306, %305 : vector<8x128xf32>
    %308 = arith.divf %306, %307 : vector<8x128xf32>
    %309 = vector.extract_strided_slice %296 {offsets = [0, 256], sizes = [8, 128], strides = [1, 1]} : vector<8x512xf32> to vector<8x128xf32>
    %310 = math.tanh %309 : vector<8x128xf32>
    %311 = vector.extract_strided_slice %296 {offsets = [0, 384], sizes = [8, 128], strides = [1, 1]} : vector<8x512xf32> to vector<8x128xf32>
    %312 = arith.negf %311 : vector<8x128xf32>
    %313 = math.exp %312 : vector<8x128xf32>
    %cst_145 = arith.constant 1.000000e+00 : f32
    %314 = vector.broadcast %cst_145 : f32 to vector<8x128xf32>
    %315 = arith.addf %314, %313 : vector<8x128xf32>
    %316 = arith.divf %314, %315 : vector<8x128xf32>
    %c0_146 = arith.constant 0 : index
    %c0_147 = arith.constant 0 : index
    %317 = vector.load %arg5[%c0_146, %c0_147] : memref<8x128xf32, #tpu.memory_space<vmem>>, vector<8x128xf32>
    %318 = arith.mulf %308, %317 : vector<8x128xf32>
    %319 = arith.mulf %302, %310 : vector<8x128xf32>
    %320 = arith.addf %318, %319 : vector<8x128xf32>
    %321 = math.tanh %320 : vector<8x128xf32>
    %322 = arith.mulf %316, %321 : vector<8x128xf32>
    %c0_148 = arith.constant 0 : index
    %c0_149 = arith.constant 0 : index
    %323 = vector.load %arg5[%c0_148, %c0_149] : memref<8x128xf32, #tpu.memory_space<vmem>>, vector<8x128xf32>
    tpu.vector_store %arg5[%c0_148, %c0_149], %320 {strides = array<i32>} : memref<8x128xf32, #tpu.memory_space<vmem>>, vector<8x128xf32>,
    %c0_150 = arith.constant 0 : index
    %c0_151 = arith.constant 0 : index
    %324 = vector.load %arg4[%c0_150, %c0_151] : memref<8x128xf32, #tpu.memory_space<vmem>>, vector<8x128xf32>
    tpu.vector_store %arg4[%c0_150, %c0_151], %322 {strides = array<i32>} : memref<8x128xf32, #tpu.memory_space<vmem>>, vector<8x128xf32>,
    %c8_152 = arith.constant 8 : index
    %c0_153 = arith.constant 0 : index
    %c0_154 = arith.constant 0 : index
    %325 = vector.load %arg3[%c8_152, %c0_153, %c0_154] : memref<9x8x128xf32, #tpu.memory_space<vmem>>, vector<1x8x128xf32>
    %326 = vector.shape_cast %325 : vector<1x8x128xf32> to vector<8x128xf32>
    %327 = vector.shape_cast %322 : vector<8x128xf32> to vector<1x8x128xf32>
    tpu.vector_store %arg3[%c8_152, %c0_153, %c0_154], %327 {strides = array<i32>} : memref<9x8x128xf32, #tpu.memory_space<vmem>>, vector<1x8x128xf32>,
    return
  }
  func.func @transform_0(%arg0: i32) -> (i32, i32, i32) {
    %c0_i32 = arith.constant 0 : i32
    %c0_i32_0 = arith.constant 0 : i32
    %c0_i32_1 = arith.constant 0 : i32
    return %arg0, %c0_i32, %c0_i32_0 : i32, i32, i32
  }
  func.func @transform_1(%arg0: i32) -> (i32, i32) {
    %c0_i32 = arith.constant 0 : i32
    %c0_i32_0 = arith.constant 0 : i32
    %c0_i32_1 = arith.constant 0 : i32
    return %c0_i32, %c0_i32_0 : i32, i32
  }
  func.func @transform_2(%arg0: i32) -> (i32, i32, i32) {
    %c0_i32 = arith.constant 0 : i32
    %c0_i32_0 = arith.constant 0 : i32
    %c0_i32_1 = arith.constant 0 : i32
    return %arg0, %c0_i32, %c0_i32_0 : i32, i32, i32
  }
}

</mosaic_0001>

<bundles_post_ra>
// kernel: decoder_rnn_forward.9
= control target key start
LH: loop header
LB: loop body
LE: loop exit
PB: predicated region body
PF: predicated region fallthrough
CT: control target
= control target key end

     0   :  { %v358_v0 = vmov 0.0|0.0   ;;  %vm359_vm0 = vmmov 0   ;;  %v360_v6 = vmov 0.0   ;;  %s504_s1 = inlined_call_operand.vmem [shape: f32[128,128], index: 1, kind: input, shape index: {}]   ;;  %s505_s0 = inlined_call_operand.vmem [shape: f32[72,128], index: 0, kind: input, shape index: {}]   ;;  %s506_s2 = inlined_call_operand.vmem [shape: f32[1,128], index: 2, kind: input, shape index: {}]   ;;  %s507_s3 = inlined_call_operand.vmem [shape: f32[72,128], index: 3, kind: output, shape index: {}]  }
   0x1   :  { %315 = vmatprep.subr.bf16.mxu0 %v358_v0  ;;  %v45_v1 = vld [vmem:[%s504_s1] sm:$0xff]  ;;  %v46_v2 = vld [vmem:[%s504_s1 + $0x8] sm:$0xff]  ;;  %339 = vmatprep.subr.bf16.mxu1 %v358_v0  ;;  %v47_v3 = vld [vmem:[%s504_s1 + $0x10] sm:$0xff] }
   0x2   :  { %v316_v4 = vpack.c.bf16 %v46_v2, %v45_v1  ;;  %v48_v5 = vld [vmem:[%s504_s1 + $0x18] sm:$0xff]  ;;  %288 = vmatprep.mubr.msk.f32.mxu0 %vm359_vm0, %v360_v6  ;;  %303 = vmatprep.mubr.msk.f32.mxu1 %vm359_vm0, %v360_v6  ;;  %v49_v8 = vld [vmem:[%s504_s1 + $0x20] sm:$0xff]  ;;  %v50_v9 = vld [vmem:[%s504_s1 + $0x28] sm:$0xff] }
   0x3   :  { %v319_v7 = vpack.c.bf16 %v48_v5, %v47_v3  ;;  %v322_v10 = vpack.c.bf16 %v50_v9, %v49_v8  ;;  %v51_v11 = vld [vmem:[%s504_s1 + $0x30] sm:$0xff]  ;;  %v52_v12 = vld [vmem:[%s504_s1 + $0x38] sm:$0xff]  ;;  %v53_v14 = vld [vmem:[%s504_s1 + $0x40] sm:$0xff] }
   0x4   :  { %317 = vmatpush3.bf16.msra.mxu0 %v316_v4  ;;  %347 = vmatpush3.bf16.msra.mxu1 %v316_v4  ;;  %v325_v13 = vpack.c.bf16 %v52_v12, %v51_v11  ;;  %v54_v15 = vld [vmem:[%s504_s1 + $0x48] sm:$0xff]  ;;  %v55_v17 = vld [vmem:[%s504_s1 + $0x50] sm:$0xff]  ;;  %v56_v18 = vld [vmem:[%s504_s1 + $0x58] sm:$0xff] }
   0x5   :  { %318 = vmatprep.subr.bf16.mxu0 %v358_v0  ;;  %340 = vmatprep.subr.bf16.mxu1 %v358_v0  ;;  %v328_v16 = vpack.c.bf16 %v54_v15, %v53_v14  ;;  %v331_v19 = vpack.c.bf16 %v56_v18, %v55_v17  ;;  %v57_v20 = vld [vmem:[%s504_s1 + $0x60] sm:$0xff]  ;;  %v58_v21 = vld [vmem:[%s504_s1 + $0x68] sm:$0xff]  ;;  %v59_v23 = vld [vmem:[%s504_s1 + $0x70] sm:$0xff] }
   0x6   :  { %v334_v22 = vpack.c.bf16 %v58_v21, %v57_v20  ;;  %v60_v24 = vld [vmem:[%s504_s1 + $0x78] sm:$0xff]  ;;  %v36_v26 = vld [vmem:[%s505_s0] sm:$0xff]  ;;  %v41_v27 = vld [vmem:[%s505_s0 + $0x28] sm:$0xff] }
   0x7   :  { %v337_v25 = vpack.c.bf16 %v60_v24, %v59_v23  ;;  %v37_v28 = vld [vmem:[%s505_s0 + $0x8] sm:$0xff]  ;;  %v42_v29 = vld [vmem:[%s505_s0 + $0x30] sm:$0xff]  ;;  %v43_v31 = vld [vmem:[%s505_s0 + $0x38] sm:$0xff] }
   0x8   :  { %320 = vmatpush3.bf16.msra.mxu0 %v319_v7  ;;  %348 = vmatpush3.bf16.msra.mxu1 %v319_v7  ;;  %v38_v30 = vld [vmem:[%s505_s0 + $0x10] sm:$0xff]  ;;  %v39_v32 = vld [vmem:[%s505_s0 + $0x18] sm:$0xff]  ;;  %v44_v33 = vld [vmem:[%s505_s0 + $0x40] sm:$0xff] }
   0x9   :  { %321 = vmatprep.subr.bf16.mxu0 %v358_v0  ;;  %341 = vmatprep.subr.bf16.mxu1 %v358_v0  ;;  %v40_v34 = vld [vmem:[%s505_s0 + $0x20] sm:$0xff] }
   0xa   :  { %v230_v35 = vld [vmem:[%s506_s2] ss:$0 sm:$0xff] }
   0xc   :  { %323 = vmatpush3.bf16.msra.mxu0 %v322_v10  ;;  %349 = vmatpush3.bf16.msra.mxu1 %v322_v10 }
   0xd   :  { %324 = vmatprep.subr.bf16.mxu0 %v358_v0  ;;  %342 = vmatprep.subr.bf16.mxu1 %v358_v0 }
  0x10   :  { %326 = vmatpush3.bf16.msra.mxu0 %v325_v13  ;;  %350 = vmatpush3.bf16.msra.mxu1 %v325_v13 }
  0x11   :  { %327 = vmatprep.subr.bf16.mxu0 %v358_v0  ;;  %343 = vmatprep.subr.bf16.mxu1 %v358_v0 }
  0x14   :  { %329 = vmatpush3.bf16.msra.mxu0 %v328_v16  ;;  %351 = vmatpush3.bf16.msra.mxu1 %v328_v16 }
  0x15   :  { %330 = vmatprep.subr.bf16.mxu0 %v358_v0  ;;  %344 = vmatprep.subr.bf16.mxu1 %v358_v0 }
  0x18   :  { %332 = vmatpush3.bf16.msra.mxu0 %v331_v19  ;;  %352 = vmatpush3.bf16.msra.mxu1 %v331_v19 }
  0x19   :  { %333 = vmatprep.subr.bf16.mxu0 %v358_v0  ;;  %345 = vmatprep.subr.bf16.mxu1 %v358_v0 }
  0x1c   :  { %335 = vmatpush3.bf16.msra.mxu0 %v334_v22  ;;  %353 = vmatpush3.bf16.msra.mxu1 %v334_v22 }
  0x1d   :  { %336 = vmatprep.subr.bf16.mxu0 %v358_v0  ;;  %346 = vmatprep.subr.bf16.mxu1 %v358_v0 }
  0x20   :  { %338 = vmatpush3.bf16.msra.mxu0 %v337_v25  ;;  %354 = vmatpush3.bf16.msra.mxu1 %v337_v25 }
  0x23   :  { %289 = vmatmul.mubr.f32.vlgmr.msra.gmra.mrb[0].mxu0 %v36_v26  ;;  %304 = vmatmul.mubr.f32.vlgmr.msra.gmra.mrb[0].mxu1 %v41_v27 }
  0x24   :  { %291 = vmatprep.mubr.msk.f32.mxu0 %vm359_vm0, %v360_v6  ;;  %306 = vmatprep.mubr.msk.f32.mxu1 %vm359_vm0, %v360_v6 }
  0x27   :  { %292 = vmatmul.mubr.f32.gmra.mrb[2].mxu0 %v37_v28  ;;  %307 = vmatmul.mubr.f32.gmra.mrb[2].mxu1 %v42_v29 }
  0x28   :  { %294 = vmatprep.mubr.msk.f32.mxu0 %vm359_vm0, %v360_v6  ;;  %309 = vmatprep.mubr.msk.f32.mxu1 %vm359_vm0, %v360_v6 }
  0x2b   :  { %295 = vmatmul.mubr.f32.gmra.mrb[4].mxu0 %v38_v30  ;;  %310 = vmatmul.mubr.f32.gmra.mrb[4].mxu1 %v43_v31 }
  0x2c   :  { %297 = vmatprep.mubr.msk.f32.mxu0 %vm359_vm0, %v360_v6  ;;  %312 = vmatprep.mubr.msk.f32.mxu1 %vm359_vm0, %v360_v6 }
  0x2f   :  { %298 = vmatmul.mubr.f32.gmra.mrb[6].mxu0 %v39_v32  ;;  %313 = vmatmul.mubr.f32.gmra.mrb[6].mxu1 %v44_v33 }
  0x30   :  { %300 = vmatprep.mubr.msk.f32.mxu0 %vm359_vm0, %v360_v6 }
  0x33   :  { %301 = vmatmul.mubr.f32.gmra.mrb[8].mxu0 %v40_v34 }
  0xf6   :  { %v127_v36 = vpop.f32.mrb[0].mxu0  ;;  %v152_v37 = vpop.f32.mrb[0].mxu1 }
  0xf7   :  { %v208_v38 = vadd.f32 %v230_v35, %v127_v36  ;;  %v290_v39 = vpop.f32.mrb[1].mxu0  ;;  %v213_v40 = vadd.f32 %v230_v35, %v152_v37  ;;  %v305_v41 = vpop.f32.mrb[1].mxu1 }
  0xf9   :  { %217 = vst [vmem:[%s507_s3] sm:$0xff] %v208_v38  ;;  %222 = vst [vmem:[%s507_s3 + $0x28] sm:$0xff] %v213_v40 }
  0xfa   :  { %v132_v42 = vpop.f32.mrb[2].mxu0  ;;  %v157_v43 = vpop.f32.mrb[2].mxu1 }
  0xfb   :  { %v209_v44 = vadd.f32 %v230_v35, %v132_v42  ;;  %v293_v45 = vpop.f32.mrb[3].mxu0  ;;  %v214_v46 = vadd.f32 %v230_v35, %v157_v43  ;;  %v308_v47 = vpop.f32.mrb[3].mxu1 }
  0xfd   :  { %218 = vst [vmem:[%s507_s3 + $0x8] sm:$0xff] %v209_v44  ;;  %223 = vst [vmem:[%s507_s3 + $0x30] sm:$0xff] %v214_v46 }
  0xfe   :  { %v137_v48 = vpop.f32.mrb[4].mxu0  ;;  %v162_v49 = vpop.f32.mrb[4].mxu1 }
  0xff   :  { %v210_v50 = vadd.f32 %v230_v35, %v137_v48  ;;  %v296_v51 = vpop.f32.mrb[5].mxu0  ;;  %v215_v52 = vadd.f32 %v230_v35, %v162_v49  ;;  %v311_v53 = vpop.f32.mrb[5].mxu1 }
 0x101   :  { %219 = vst [vmem:[%s507_s3 + $0x10] sm:$0xff] %v210_v50  ;;  %224 = vst [vmem:[%s507_s3 + $0x38] sm:$0xff] %v215_v52 }
 0x102   :  { %v142_v54 = vpop.f32.mrb[6].mxu0  ;;  %v167_v55 = vpop.f32.mrb[6].mxu1 }
 0x103   :  { %v211_v56 = vadd.f32 %v230_v35, %v142_v54  ;;  %v299_v57 = vpop.f32.mrb[7].mxu0  ;;  %v216_v58 = vadd.f32 %v230_v35, %v167_v55  ;;  %v314_v59 = vpop.f32.mrb[7].mxu1 }
 0x105   :  { %220 = vst [vmem:[%s507_s3 + $0x18] sm:$0xff] %v211_v56  ;;  %225 = vst [vmem:[%s507_s3 + $0x40] sm:$0xff] %v216_v58 }
 0x106   :  { %v147_v60 = vpop.f32.mrb[8].mxu0 }
 0x107   :  { %v212_v61 = vadd.f32 %v230_v35, %v147_v60  ;;  %v302_v62 = vpop.f32.mrb[9].mxu0 }
 0x109   :  { %221 = vst [vmem:[%s507_s3 + $0x20] sm:$0xff] %v212_v61 }

// kernel: decoder_rnn_forward.5
= control target key start
LH: loop header
LB: loop body
LE: loop exit
PB: predicated region body
PF: predicated region fallthrough
CT: control target
= control target key end

     0   :  { %8 = vsyncpa [#allocation4], 0  ;;  %s717_s12 = smov [#allocation3]   ;;  %s953_s0 = inlined_call_operand.vmem [shape: f32[72,128], index: 0, kind: input, shape index: {}]   ;;  %s954_s1 = inlined_call_operand.hbm [shape: f32[128,512], index: 1, kind: input, shape index: {}]   ;;  %s955_s2 = inlined_call_operand.vmem [shape: f32[1,512], index: 2, kind: input, shape index: {}]   ;;  %s956_s3 = inlined_call_operand.vmem [shape: f32[72,512], index: 3, kind: output, shape index: {}]  }
   0x1   :  { %s16_s13 = sshll.u32 %s717_s12, 4  ;;  %s693_s16 = scalar_lea.hbm %s954_s1, 8192  ;;  %s17_s13 = int_to_ptr.vmem [resolvable:$true] %s16_s13 }
   0x2   :  { %p694_p0 = scmp.ne.s32.totalorder %s954_s1, %s693_s16  ;;  %p697_p1 = scmp.lt.u32.totalorder %s693_s16, %s954_s1 }
   0x4   :  { %p699_p2 = pnand %p697_p1, %p694_p0 }
   0x6   :  { %702 = shalt.err (!%p699_p2)
}
   0x7   :  { %s703_s21 = scalar_lea.vmem %s17_s13, 8192  ;;  %p708_p4 = scmp.lt.s32.totalorder %s17_s13, %s17_s13 }
   0x8   :  { %p704_p3 = scmp.ne.s32.totalorder %s17_s13, %s703_s21  ;;  %p709_p5 = scmp.lt.s32.totalorder %s703_s21, %s703_s21 }
   0xa   :  { %p710_p6 = por %p709_p5, %p708_p4 }
   0xc   :  { %p711_p7 = pnand %p710_p6, %p704_p3 }
   0xe   :  { %714 = shalt.err (!%p711_p7)
}
   0xf   :  { %s718_s22 = smov 512   ;;  %s719_s23 = smov 32  }
  0x10   :  { %22 = dma.hbm_to_vmem [thread:$0]  %s954_s1, 8192, %s17_s13, [#allocation4], %s718_s22, %s718_s22, %s719_s23  }
  0x11   :  { %715 = dma.done.wait [#allocation4], 8192  }
  0x12   :  { %716 = vsyncadd [#allocation4], 4294959104  ;;  %v720_v0 = vmov 0.0   ;;  %v114_v1 = vld [vmem:[#allocation3 + $0x8] sm:$0xff]  ;;  %v116_v3 = vld [vmem:[#allocation3 + $0x18] sm:$0xff] }
  0x13   :  { %241 = vmatprep.mubr.f32.mxu0 %v720_v0  ;;  %360 = vmatprep.mubr.f32.mxu1 %v720_v0  ;;  %v118_v2 = vld [vmem:[#allocation3 + $0x28] sm:$0xff]  ;;  %v120_v5 = vld [vmem:[#allocation3 + $0x38] sm:$0xff]  ;;  %v113_v6 = vld [vmem:[#allocation3] sm:$0xff] }
  0x14   :  { %v625_v4 = vpack.c.bf16 %v118_v2, %v114_v1  ;;  %v117_v7 = vld [vmem:[#allocation3 + $0x20] sm:$0xff]  ;;  %v657_v8 = vpack.c.bf16 %v120_v5, %v116_v3  ;;  %v115_v10 = vld [vmem:[#allocation3 + $0x10] sm:$0xff]  ;;  %v122_v12 = vld [vmem:[#allocation3 + $0x48] sm:$0xff] }
  0x15   :  { %v627_v9 = vpack.c.bf16 %v117_v7, %v113_v6  ;;  %v119_v11 = vld [vmem:[#allocation3 + $0x30] sm:$0xff]  ;;  %v126_v14 = vld [vmem:[#allocation3 + $0x68] sm:$0xff]  ;;  %v124_v15 = vld [vmem:[#allocation3 + $0x58] sm:$0xff] }
  0x16   :  { %626 = vmatprep.subr.bf16.mxu0 %v625_v4  ;;  %v659_v13 = vpack.c.bf16 %v119_v11, %v115_v10  ;;  %v128_v16 = vld [vmem:[#allocation3 + $0x78] sm:$0xff]  ;;  %658 = vmatprep.subr.bf16.mxu1 %v657_v8  ;;  %v629_v17 = vpack.c.bf16 %v126_v14, %v122_v12  ;;  %v121_v19 = vld [vmem:[#allocation3 + $0x40] sm:$0xff]  ;;  %v123_v21 = vld [vmem:[#allocation3 + $0x50] sm:$0xff] }
  0x17   :  { %628 = vmatpush1.bf16.msra.mxu0 %v627_v9  ;;  %v661_v18 = vpack.c.bf16 %v128_v16, %v124_v15  ;;  %v125_v20 = vld [vmem:[#allocation3 + $0x60] sm:$0xff]  ;;  %v127_v23 = vld [vmem:[#allocation3 + $0x70] sm:$0xff]  ;;  %v130_v24 = vld [vmem:[#allocation3 + $0x88] sm:$0xff] }
  0x18   :  { %660 = vmatpush1.bf16.msra.mxu1 %v659_v13  ;;  %v631_v22 = vpack.c.bf16 %v125_v20, %v121_v19  ;;  %v134_v25 = vld [vmem:[#allocation3 + $0xa8] sm:$0xff]  ;;  %630 = vmatprep.subr.bf16.mxu0 %v629_v17  ;;  %v663_v26 = vpack.c.bf16 %v127_v23, %v123_v21  ;;  %v132_v28 = vld [vmem:[#allocation3 + $0x98] sm:$0xff]  ;;  %v129_v30 = vld [vmem:[#allocation3 + $0x80] sm:$0xff] }
  0x19   :  { %662 = vmatprep.subr.bf16.mxu1 %v661_v18  ;;  %v633_v27 = vpack.c.bf16 %v134_v25, %v130_v24  ;;  %v136_v29 = vld [vmem:[#allocation3 + $0xb8] sm:$0xff]  ;;  %v133_v32 = vld [vmem:[#allocation3 + $0xa0] sm:$0xff]  ;;  %v131_v33 = vld [vmem:[#allocation3 + $0x90] sm:$0xff] }
  0x1a   :  { %v665_v31 = vpack.c.bf16 %v136_v29, %v132_v28  ;;  %v135_v34 = vld [vmem:[#allocation3 + $0xb0] sm:$0xff]  ;;  %v635_v35 = vpack.c.bf16 %v133_v32, %v129_v30  ;;  %v138_v36 = vld [vmem:[#allocation3 + $0xc8] sm:$0xff]  ;;  %v140_v38 = vld [vmem:[#allocation3 + $0xd8] sm:$0xff] }
  0x1b   :  { %632 = vmatpush1.bf16.msra.mxu0 %v631_v22  ;;  %v142_v37 = vld [vmem:[#allocation3 + $0xe8] sm:$0xff]  ;;  %v667_v39 = vpack.c.bf16 %v135_v34, %v131_v33  ;;  %v144_v41 = vld [vmem:[#allocation3 + $0xf8] sm:$0xff]  ;;  %v137_v42 = vld [vmem:[#allocation3 + $0xc0] sm:$0xff] }
  0x1c   :  { %664 = vmatpush1.bf16.msra.mxu1 %v663_v26  ;;  %634 = vmatprep.subr.bf16.mxu0 %v633_v27  ;;  %v637_v40 = vpack.c.bf16 %v142_v37, %v138_v36  ;;  %v141_v43 = vld [vmem:[#allocation3 + $0xe0] sm:$0xff]  ;;  %v669_v44 = vpack.c.bf16 %v144_v41, %v140_v38  ;;  %v139_v45 = vld [vmem:[#allocation3 + $0xd0] sm:$0xff]  ;;  %v146_v47 = vld [vmem:[#allocation3 + $0x108] sm:$0xff] }
  0x1d   :  { %666 = vmatprep.subr.bf16.mxu1 %v665_v31  ;;  %v143_v46 = vld [vmem:[#allocation3 + $0xf0] sm:$0xff]  ;;  %v150_v48 = vld [vmem:[#allocation3 + $0x128] sm:$0xff]  ;;  %v148_v49 = vld [vmem:[#allocation3 + $0x118] sm:$0xff]  ;;  %v639_v51 = vpack.c.bf16 %v141_v43, %v137_v42  ;;  %v528_v43 = vlaneseq }
  0x1e   :  { %v152_v50 = vld [vmem:[#allocation3 + $0x138] sm:$0xff]  ;;  %v671_v52 = vpack.c.bf16 %v143_v46, %v139_v45  ;;  %v641_v53 = vpack.c.bf16 %v150_v48, %v146_v47  ;;  %v145_v54 = vld [vmem:[#allocation3 + $0x100] sm:$0xff]  ;;  %v147_v56 = vld [vmem:[#allocation3 + $0x110] sm:$0xff] }
  0x1f   :  { %636 = vmatpush1.bf16.msra.mxu0 %v635_v35  ;;  %v149_v55 = vld [vmem:[#allocation3 + $0x120] sm:$0xff]  ;;  %v673_v57 = vpack.c.bf16 %v152_v50, %v148_v49  ;;  %v151_v58 = vld [vmem:[#allocation3 + $0x130] sm:$0xff]  ;;  %v154_v59 = vld [vmem:[#allocation3 + $0x148] sm:$0xff] }
  0x20   :  { %668 = vmatpush1.bf16.msra.mxu1 %v667_v39  ;;  %638 = vmatprep.subr.bf16.mxu0 %v637_v40  ;;  %v158_v60 = vld [vmem:[#allocation3 + $0x168] sm:$0xff]  ;;  %v156_v61 = vld [vmem:[#allocation3 + $0x158] sm:$0xff]  ;;  %v643_v63 = vpack.c.bf16 %v149_v55, %v145_v54  ;;  %v675_v1 = vpack.c.bf16 %v151_v58, %v147_v56  ;;  %v153_v3 = vld [vmem:[#allocation3 + $0x140] sm:$0xff] }
  0x21   :  { %670 = vmatprep.subr.bf16.mxu1 %v669_v44  ;;  %v160_v62 = vld [vmem:[#allocation3 + $0x178] sm:$0xff]  ;;  %v645_v2 = vpack.c.bf16 %v158_v60, %v154_v59  ;;  %v157_v4 = vld [vmem:[#allocation3 + $0x160] sm:$0xff]  ;;  %v155_v5 = vld [vmem:[#allocation3 + $0x150] sm:$0xff]  ;;  %v529_v44 = vshrl.u32 %v528_v43, 7 }
  0x22   :  { %v677_v6 = vpack.c.bf16 %v160_v62, %v156_v61  ;;  %v159_v7 = vld [vmem:[#allocation3 + $0x170] sm:$0xff]  ;;  %v162_v8 = vld [vmem:[#allocation3 + $0x188] sm:$0xff]  ;;  %v164_v10 = vld [vmem:[#allocation3 + $0x198] sm:$0xff]  ;;  %v647_v12 = vpack.c.bf16 %v157_v4, %v153_v3 }
  0x23   :  { %640 = vmatpush1.bf16.msra.mxu0 %v639_v51  ;;  %v166_v9 = vld [vmem:[#allocation3 + $0x1a8] sm:$0xff]  ;;  %v168_v11 = vld [vmem:[#allocation3 + $0x1b8] sm:$0xff]  ;;  %v679_v13 = vpack.c.bf16 %v159_v7, %v155_v5  ;;  %v161_v15 = vld [vmem:[#allocation3 + $0x180] sm:$0xff]  ;;  %v530_v45 = vsub.s32 0, %v529_v44  ;;  %v538_v47 = vsub.s32 2, %v529_v44  ;;  %v534_v48 = vsub.s32 1, %v529_v44 }
  0x24   :  { %672 = vmatpush1.bf16.msra.mxu1 %v671_v52  ;;  %642 = vmatprep.subr.bf16.mxu0 %v641_v53  ;;  %v649_v14 = vpack.c.bf16 %v166_v9, %v162_v8  ;;  %v165_v16 = vld [vmem:[#allocation3 + $0x1a0] sm:$0xff]  ;;  %v163_v17 = vld [vmem:[#allocation3 + $0x190] sm:$0xff]  ;;  %v681_v18 = vpack.c.bf16 %v168_v11, %v164_v10  ;;  %v170_v20 = vld [vmem:[#allocation3 + $0x1c8] sm:$0xff]  ;;  %v542_v49 = vsub.s32 3, %v529_v44 }
  0x25   :  { %674 = vmatprep.subr.bf16.mxu1 %v673_v57  ;;  %v167_v19 = vld [vmem:[#allocation3 + $0x1b0] sm:$0xff]  ;;  %v174_v21 = vld [vmem:[#allocation3 + $0x1e8] sm:$0xff]  ;;  %v172_v22 = vld [vmem:[#allocation3 + $0x1d8] sm:$0xff]  ;;  %v651_v24 = vpack.c.bf16 %v165_v16, %v161_v15 }
  0x26   :  { %v176_v23 = vld [vmem:[#allocation3 + $0x1f8] sm:$0xff]  ;;  %v683_v25 = vpack.c.bf16 %v167_v19, %v163_v17  ;;  %v653_v26 = vpack.c.bf16 %v174_v21, %v170_v20  ;;  %v169_v27 = vld [vmem:[#allocation3 + $0x1c0] sm:$0xff]  ;;  %v171_v30 = vld [vmem:[#allocation3 + $0x1d0] sm:$0xff] }
  0x27   :  { %644 = vmatpush1.bf16.msra.mxu0 %v643_v63  ;;  %v173_v28 = vld [vmem:[#allocation3 + $0x1e0] sm:$0xff]  ;;  %v685_v29 = vpack.c.bf16 %v176_v23, %v172_v22  ;;  %v175_v31 = vld [vmem:[#allocation3 + $0x1f0] sm:$0xff]  ;;  %v105_v35 = vld [vmem:[%s953_s0 + $0x8] sm:$0xff] }
  0x28   :  { %676 = vmatpush1.bf16.msra.mxu1 %v675_v1  ;;  %646 = vmatprep.subr.bf16.mxu0 %v645_v2  ;;  %v655_v32 = vpack.c.bf16 %v173_v28, %v169_v27  ;;  %v687_v33 = vpack.c.bf16 %v175_v31, %v171_v30  ;;  %v104_v34 = vld [vmem:[%s953_s0] sm:$0xff]  ;;  %v106_v36 = vld [vmem:[%s953_s0 + $0x10] sm:$0xff]  ;;  %v107_v37 = vld [vmem:[%s953_s0 + $0x18] sm:$0xff] }
  0x29   :  { %678 = vmatprep.subr.bf16.mxu1 %v677_v6  ;;  %v108_v38 = vld [vmem:[%s953_s0 + $0x20] sm:$0xff]  ;;  %v109_v39 = vld [vmem:[%s953_s0 + $0x28] sm:$0xff]  ;;  %v110_v40 = vld [vmem:[%s953_s0 + $0x30] sm:$0xff] }
  0x2a   :  { %v111_v41 = vld [vmem:[%s953_s0 + $0x38] sm:$0xff]  ;;  %v112_v42 = vld [vmem:[%s953_s0 + $0x40] sm:$0xff] }
  0x2b   :  { %648 = vmatpush1.bf16.msra.mxu0 %v647_v12  ;;  %v526_v46 = vld [vmem:[%s955_s2] sm:$0xf] }
  0x2c   :  { %680 = vmatpush1.bf16.msra.mxu1 %v679_v13  ;;  %650 = vmatprep.subr.bf16.mxu0 %v649_v14  ;;  %v801_v50 = vrot.slane %v526_v46, %v530_v45  ;;  %v803_v51 = vrot.slane %v526_v46, %v538_v47  ;;  %v805_v52 = vrot.slane %v526_v46, %v534_v48 }
  0x2d   :  { %682 = vmatprep.subr.bf16.mxu1 %v681_v18  ;;  %v807_v53 = vrot.slane %v526_v46, %v542_v49 }
  0x2f   :  { %652 = vmatpush1.bf16.msra.mxu0 %v651_v24 }
  0x30   :  { %684 = vmatpush1.bf16.msra.mxu1 %v683_v25  ;;  %654 = vmatprep.subr.bf16.mxu0 %v653_v26 }
  0x31   :  { %686 = vmatprep.subr.bf16.mxu1 %v685_v29 }
  0x33   :  { %656 = vmatpush1.bf16.msra.mxu0 %v655_v32 }
  0x34   :  { %688 = vmatpush1.bf16.msra.mxu1 %v687_v33 }
  0x36   :  { %242 = vmatmul.mubr.f32.vlgmr.msra.gmra.mrb[0].mxu0 %v104_v34 }
  0x37   :  { %361 = vmatmul.mubr.f32.vlgmr.msra.gmra.mrb[0].mxu1 %v104_v34  ;;  %247 = vmatprep.mubr.f32.mxu0 %v720_v0 }
  0x38   :  { %366 = vmatprep.mubr.f32.mxu1 %v720_v0 }
  0x3a   :  { %248 = vmatmul.mubr.f32.gmra.mrb[2].mxu0 %v105_v35 }
  0x3b   :  { %367 = vmatmul.mubr.f32.gmra.mrb[2].mxu1 %v105_v35  ;;  %253 = vmatprep.mubr.f32.mxu0 %v720_v0 }
  0x3c   :  { %372 = vmatprep.mubr.f32.mxu1 %v720_v0 }
  0x3e   :  { %254 = vmatmul.mubr.f32.gmra.mrb[4].mxu0 %v106_v36 }
  0x3f   :  { %373 = vmatmul.mubr.f32.gmra.mrb[4].mxu1 %v106_v36  ;;  %259 = vmatprep.mubr.f32.mxu0 %v720_v0 }
  0x40   :  { %378 = vmatprep.mubr.f32.mxu1 %v720_v0 }
  0x42   :  { %260 = vmatmul.mubr.f32.gmra.mrb[6].mxu0 %v107_v37 }
  0x43   :  { %379 = vmatmul.mubr.f32.gmra.mrb[6].mxu1 %v107_v37  ;;  %265 = vmatprep.mubr.f32.mxu0 %v720_v0 }
  0x44   :  { %384 = vmatprep.mubr.f32.mxu1 %v720_v0 }
  0x46   :  { %266 = vmatmul.mubr.f32.gmra.mrb[8].mxu0 %v108_v38 }
  0x47   :  { %385 = vmatmul.mubr.f32.gmra.mrb[8].mxu1 %v108_v38  ;;  %271 = vmatprep.mubr.f32.mxu0 %v720_v0 }
  0x48   :  { %390 = vmatprep.mubr.f32.mxu1 %v720_v0 }
  0x4a   :  { %272 = vmatmul.mubr.f32.gmra.mrb[10].mxu0 %v109_v39 }
  0x4b   :  { %391 = vmatmul.mubr.f32.gmra.mrb[10].mxu1 %v109_v39  ;;  %277 = vmatprep.mubr.f32.mxu0 %v720_v0 }
  0x4c   :  { %396 = vmatprep.mubr.f32.mxu1 %v720_v0 }
  0x4e   :  { %278 = vmatmul.mubr.f32.gmra.mrb[12].mxu0 %v110_v40 }
  0x4f   :  { %397 = vmatmul.mubr.f32.gmra.mrb[12].mxu1 %v110_v40  ;;  %283 = vmatprep.mubr.f32.mxu0 %v720_v0 }
  0x50   :  { %402 = vmatprep.mubr.f32.mxu1 %v720_v0 }
  0x52   :  { %284 = vmatmul.mubr.f32.gmra.mrb[14].mxu0 %v111_v41 }
  0x53   :  { %403 = vmatmul.mubr.f32.gmra.mrb[14].mxu1 %v111_v41  ;;  %289 = vmatprep.mubr.f32.mxu0 %v720_v0 }
  0x54   :  { %408 = vmatprep.mubr.f32.mxu1 %v720_v0 }
  0x56   :  { %290 = vmatmul.mubr.f32.gmra.mrb[16].mxu0 %v112_v42 }
  0x57   :  { %409 = vmatmul.mubr.f32.gmra.mrb[16].mxu1 %v112_v42 }
 0x109   :  { %v243_v0 = vpop.f32.mrb[0].mxu0 }
 0x10a   :  { %v548_v54 = vadd.f32 %v801_v50, %v243_v0  ;;  %v362_v55 = vpop.f32.mrb[0].mxu1  ;;  %v245_v56 = vpop.f32.mrb[1].mxu0 }
 0x10b   :  { %v550_v57 = vadd.f32 %v803_v51, %v362_v55  ;;  %v549_v58 = vadd.f32 %v805_v52, %v245_v56  ;;  %v364_v59 = vpop.f32.mrb[1].mxu1 }
 0x10c   :  { %584 = vst [vmem:[%s956_s3] sm:$0xff] %v548_v54  ;;  %v551_v60 = vadd.f32 %v807_v53, %v364_v59 }
 0x10d   :  { %586 = vst [vmem:[%s956_s3 + $0x10] sm:$0xff] %v550_v57  ;;  %585 = vst [vmem:[%s956_s3 + $0x8] sm:$0xff] %v549_v58  ;;  %v249_v61 = vpop.f32.mrb[2].mxu0 }
 0x10e   :  { %587 = vst [vmem:[%s956_s3 + $0x18] sm:$0xff] %v551_v60  ;;  %v552_v62 = vadd.f32 %v801_v50, %v249_v61  ;;  %v368_v63 = vpop.f32.mrb[2].mxu1  ;;  %v251_v1 = vpop.f32.mrb[3].mxu0 }
 0x10f   :  { %v554_v2 = vadd.f32 %v803_v51, %v368_v63  ;;  %v553_v3 = vadd.f32 %v805_v52, %v251_v1  ;;  %v370_v4 = vpop.f32.mrb[3].mxu1 }
 0x110   :  { %588 = vst [vmem:[%s956_s3 + $0x20] sm:$0xff] %v552_v62  ;;  %v555_v5 = vadd.f32 %v807_v53, %v370_v4 }
 0x111   :  { %590 = vst [vmem:[%s956_s3 + $0x30] sm:$0xff] %v554_v2  ;;  %589 = vst [vmem:[%s956_s3 + $0x28] sm:$0xff] %v553_v3  ;;  %v255_v6 = vpop.f32.mrb[4].mxu0 }
 0x112   :  { %591 = vst [vmem:[%s956_s3 + $0x38] sm:$0xff] %v555_v5  ;;  %v556_v7 = vadd.f32 %v801_v50, %v255_v6  ;;  %v374_v8 = vpop.f32.mrb[4].mxu1  ;;  %v257_v9 = vpop.f32.mrb[5].mxu0 }
 0x113   :  { %v558_v10 = vadd.f32 %v803_v51, %v374_v8  ;;  %v557_v11 = vadd.f32 %v805_v52, %v257_v9  ;;  %v376_v12 = vpop.f32.mrb[5].mxu1 }
 0x114   :  { %592 = vst [vmem:[%s956_s3 + $0x40] sm:$0xff] %v556_v7  ;;  %v559_v13 = vadd.f32 %v807_v53, %v376_v12 }
 0x115   :  { %594 = vst [vmem:[%s956_s3 + $0x50] sm:$0xff] %v558_v10  ;;  %593 = vst [vmem:[%s956_s3 + $0x48] sm:$0xff] %v557_v11  ;;  %v261_v14 = vpop.f32.mrb[6].mxu0 }
 0x116   :  { %595 = vst [vmem:[%s956_s3 + $0x58] sm:$0xff] %v559_v13  ;;  %v560_v15 = vadd.f32 %v801_v50, %v261_v14  ;;  %v380_v16 = vpop.f32.mrb[6].mxu1  ;;  %v263_v17 = vpop.f32.mrb[7].mxu0 }
 0x117   :  { %v562_v18 = vadd.f32 %v803_v51, %v380_v16  ;;  %v561_v19 = vadd.f32 %v805_v52, %v263_v17  ;;  %v382_v20 = vpop.f32.mrb[7].mxu1 }
 0x118   :  { %596 = vst [vmem:[%s956_s3 + $0x60] sm:$0xff] %v560_v15  ;;  %v563_v21 = vadd.f32 %v807_v53, %v382_v20 }
 0x119   :  { %598 = vst [vmem:[%s956_s3 + $0x70] sm:$0xff] %v562_v18  ;;  %597 = vst [vmem:[%s956_s3 + $0x68] sm:$0xff] %v561_v19  ;;  %v267_v22 = vpop.f32.mrb[8].mxu0 }
 0x11a   :  { %599 = vst [vmem:[%s956_s3 + $0x78] sm:$0xff] %v563_v21  ;;  %v564_v23 = vadd.f32 %v801_v50, %v267_v22  ;;  %v386_v24 = vpop.f32.mrb[8].mxu1  ;;  %v269_v25 = vpop.f32.mrb[9].mxu0 }
 0x11b   :  { %v566_v26 = vadd.f32 %v803_v51, %v386_v24  ;;  %v565_v27 = vadd.f32 %v805_v52, %v269_v25  ;;  %v388_v28 = vpop.f32.mrb[9].mxu1 }
 0x11c   :  { %600 = vst [vmem:[%s956_s3 + $0x80] sm:$0xff] %v564_v23  ;;  %v567_v29 = vadd.f32 %v807_v53, %v388_v28 }
 0x11d   :  { %602 = vst [vmem:[%s956_s3 + $0x90] sm:$0xff] %v566_v26  ;;  %601 = vst [vmem:[%s956_s3 + $0x88] sm:$0xff] %v565_v27  ;;  %v273_v30 = vpop.f32.mrb[10].mxu0 }
 0x11e   :  { %603 = vst [vmem:[%s956_s3 + $0x98] sm:$0xff] %v567_v29  ;;  %v568_v31 = vadd.f32 %v801_v50, %v273_v30  ;;  %v392_v32 = vpop.f32.mrb[10].mxu1  ;;  %v275_v33 = vpop.f32.mrb[11].mxu0 }
 0x11f   :  { %v570_v34 = vadd.f32 %v803_v51, %v392_v32  ;;  %v569_v35 = vadd.f32 %v805_v52, %v275_v33  ;;  %v394_v36 = vpop.f32.mrb[11].mxu1 }
 0x120   :  { %604 = vst [vmem:[%s956_s3 + $0xa0] sm:$0xff] %v568_v31  ;;  %v571_v37 = vadd.f32 %v807_v53, %v394_v36 }
 0x121   :  { %606 = vst [vmem:[%s956_s3 + $0xb0] sm:$0xff] %v570_v34  ;;  %605 = vst [vmem:[%s956_s3 + $0xa8] sm:$0xff] %v569_v35  ;;  %v279_v38 = vpop.f32.mrb[12].mxu0 }
 0x122   :  { %607 = vst [vmem:[%s956_s3 + $0xb8] sm:$0xff] %v571_v37  ;;  %v572_v39 = vadd.f32 %v801_v50, %v279_v38  ;;  %v398_v40 = vpop.f32.mrb[12].mxu1  ;;  %v281_v41 = vpop.f32.mrb[13].mxu0 }
 0x123   :  { %v574_v42 = vadd.f32 %v803_v51, %v398_v40  ;;  %v573_v43 = vadd.f32 %v805_v52, %v281_v41  ;;  %v400_v44 = vpop.f32.mrb[13].mxu1 }
 0x124   :  { %608 = vst [vmem:[%s956_s3 + $0xc0] sm:$0xff] %v572_v39  ;;  %v575_v45 = vadd.f32 %v807_v53, %v400_v44 }
 0x125   :  { %610 = vst [vmem:[%s956_s3 + $0xd0] sm:$0xff] %v574_v42  ;;  %609 = vst [vmem:[%s956_s3 + $0xc8] sm:$0xff] %v573_v43  ;;  %v285_v46 = vpop.f32.mrb[14].mxu0 }
 0x126   :  { %611 = vst [vmem:[%s956_s3 + $0xd8] sm:$0xff] %v575_v45  ;;  %v576_v47 = vadd.f32 %v801_v50, %v285_v46  ;;  %v404_v48 = vpop.f32.mrb[14].mxu1  ;;  %v287_v49 = vpop.f32.mrb[15].mxu0 }
 0x127   :  { %v578_v0 = vadd.f32 %v803_v51, %v404_v48  ;;  %v577_v54 = vadd.f32 %v805_v52, %v287_v49  ;;  %v406_v55 = vpop.f32.mrb[15].mxu1 }
 0x128   :  { %612 = vst [vmem:[%s956_s3 + $0xe0] sm:$0xff] %v576_v47  ;;  %v579_v56 = vadd.f32 %v807_v53, %v406_v55 }
 0x129   :  { %614 = vst [vmem:[%s956_s3 + $0xf0] sm:$0xff] %v578_v0  ;;  %613 = vst [vmem:[%s956_s3 + $0xe8] sm:$0xff] %v577_v54  ;;  %v291_v57 = vpop.f32.mrb[16].mxu0 }
 0x12a   :  { %615 = vst [vmem:[%s956_s3 + $0xf8] sm:$0xff] %v579_v56  ;;  %v580_v58 = vadd.f32 %v801_v50, %v291_v57  ;;  %v410_v59 = vpop.f32.mrb[16].mxu1  ;;  %v293_v60 = vpop.f32.mrb[17].mxu0 }
 0x12b   :  { %v582_v61 = vadd.f32 %v803_v51, %v410_v59  ;;  %v581_v62 = vadd.f32 %v805_v52, %v293_v60  ;;  %v412_v63 = vpop.f32.mrb[17].mxu1 }
 0x12c   :  { %616 = vst [vmem:[%s956_s3 + $0x100] sm:$0xff] %v580_v58  ;;  %v583_v1 = vadd.f32 %v807_v53, %v412_v63 }
 0x12d   :  { %618 = vst [vmem:[%s956_s3 + $0x110] sm:$0xff] %v582_v61  ;;  %617 = vst [vmem:[%s956_s3 + $0x108] sm:$0xff] %v581_v62 }
 0x12e   :  { %619 = vst [vmem:[%s956_s3 + $0x118] sm:$0xff] %v583_v1 }
 0x12f   :  { %624 = vsyncpa [#allocation4], 1 }

// kernel: decoder_rnn_forward.7
= control target key start
LH: loop header
LB: loop body
LE: loop exit
PB: predicated region body
PF: predicated region fallthrough
CT: control target
= control target key end

     0   :  { %v675_v3 = vmov 0.0   ;;  %s1088_s1 = inlined_call_operand.vmem [shape: f32[128,512], index: 1, kind: input, shape index: {}]   ;;  %s1089_s0 = inlined_call_operand.vmem [shape: f32[72,128], index: 0, kind: input, shape index: {}]   ;;  %s1090_s2 = inlined_call_operand.vmem [shape: f32[1,512], index: 2, kind: input, shape index: {}]   ;;  %s1091_s3 = inlined_call_operand.vmem [shape: f32[72,512], index: 3, kind: output, shape index: {}]  }
   0x1   :  { %v100_v0 = vld [vmem:[%s1088_s1 + $0x8] sm:$0xff]  ;;  %v102_v2 = vld [vmem:[%s1088_s1 + $0x18] sm:$0xff]  ;;  %227 = vmatprep.mubr.f32.mxu0 %v675_v3  ;;  %346 = vmatprep.mubr.f32.mxu1 %v675_v3  ;;  %v99_v6 = vld [vmem:[%s1088_s1] sm:$0xff] }
   0x2   :  { %v104_v1 = vld [vmem:[%s1088_s1 + $0x28] sm:$0xff]  ;;  %v106_v5 = vld [vmem:[%s1088_s1 + $0x38] sm:$0xff]  ;;  %v103_v7 = vld [vmem:[%s1088_s1 + $0x20] sm:$0xff] }
   0x3   :  { %v610_v4 = vpack.c.bf16 %v104_v1, %v100_v0  ;;  %v642_v8 = vpack.c.bf16 %v106_v5, %v102_v2  ;;  %v612_v9 = vpack.c.bf16 %v103_v7, %v99_v6  ;;  %v101_v10 = vld [vmem:[%s1088_s1 + $0x10] sm:$0xff]  ;;  %v108_v12 = vld [vmem:[%s1088_s1 + $0x48] sm:$0xff]  ;;  %v110_v15 = vld [vmem:[%s1088_s1 + $0x58] sm:$0xff] }
   0x4   :  { %v105_v11 = vld [vmem:[%s1088_s1 + $0x30] sm:$0xff]  ;;  %v112_v14 = vld [vmem:[%s1088_s1 + $0x68] sm:$0xff]  ;;  %v114_v16 = vld [vmem:[%s1088_s1 + $0x78] sm:$0xff] }
   0x5   :  { %611 = vmatprep.subr.bf16.mxu0 %v610_v4  ;;  %v644_v13 = vpack.c.bf16 %v105_v11, %v101_v10  ;;  %643 = vmatprep.subr.bf16.mxu1 %v642_v8  ;;  %v614_v17 = vpack.c.bf16 %v112_v14, %v108_v12  ;;  %v646_v18 = vpack.c.bf16 %v114_v16, %v110_v15  ;;  %v107_v19 = vld [vmem:[%s1088_s1 + $0x40] sm:$0xff]  ;;  %v109_v21 = vld [vmem:[%s1088_s1 + $0x50] sm:$0xff]  ;;  %v116_v24 = vld [vmem:[%s1088_s1 + $0x88] sm:$0xff] }
   0x6   :  { %613 = vmatpush1.bf16.msra.mxu0 %v612_v9  ;;  %v111_v20 = vld [vmem:[%s1088_s1 + $0x60] sm:$0xff]  ;;  %v113_v23 = vld [vmem:[%s1088_s1 + $0x70] sm:$0xff]  ;;  %v120_v25 = vld [vmem:[%s1088_s1 + $0xa8] sm:$0xff] }
   0x7   :  { %645 = vmatpush1.bf16.msra.mxu1 %v644_v13  ;;  %v616_v22 = vpack.c.bf16 %v111_v20, %v107_v19  ;;  %615 = vmatprep.subr.bf16.mxu0 %v614_v17  ;;  %v648_v26 = vpack.c.bf16 %v113_v23, %v109_v21  ;;  %v618_v27 = vpack.c.bf16 %v120_v25, %v116_v24  ;;  %v118_v28 = vld [vmem:[%s1088_s1 + $0x98] sm:$0xff]  ;;  %v115_v30 = vld [vmem:[%s1088_s1 + $0x80] sm:$0xff]  ;;  %v117_v33 = vld [vmem:[%s1088_s1 + $0x90] sm:$0xff] }
   0x8   :  { %647 = vmatprep.subr.bf16.mxu1 %v646_v18  ;;  %v122_v29 = vld [vmem:[%s1088_s1 + $0xb8] sm:$0xff]  ;;  %v119_v32 = vld [vmem:[%s1088_s1 + $0xa0] sm:$0xff]  ;;  %v121_v34 = vld [vmem:[%s1088_s1 + $0xb0] sm:$0xff] }
   0x9   :  { %v650_v31 = vpack.c.bf16 %v122_v29, %v118_v28  ;;  %v620_v35 = vpack.c.bf16 %v119_v32, %v115_v30  ;;  %v124_v36 = vld [vmem:[%s1088_s1 + $0xc8] sm:$0xff]  ;;  %v126_v38 = vld [vmem:[%s1088_s1 + $0xd8] sm:$0xff]  ;;  %v652_v39 = vpack.c.bf16 %v121_v34, %v117_v33  ;;  %v123_v42 = vld [vmem:[%s1088_s1 + $0xc0] sm:$0xff] }
   0xa   :  { %617 = vmatpush1.bf16.msra.mxu0 %v616_v22  ;;  %v128_v37 = vld [vmem:[%s1088_s1 + $0xe8] sm:$0xff]  ;;  %v130_v41 = vld [vmem:[%s1088_s1 + $0xf8] sm:$0xff]  ;;  %v127_v43 = vld [vmem:[%s1088_s1 + $0xe0] sm:$0xff] }
   0xb   :  { %649 = vmatpush1.bf16.msra.mxu1 %v648_v26  ;;  %619 = vmatprep.subr.bf16.mxu0 %v618_v27  ;;  %v622_v40 = vpack.c.bf16 %v128_v37, %v124_v36  ;;  %v654_v44 = vpack.c.bf16 %v130_v41, %v126_v38  ;;  %v125_v45 = vld [vmem:[%s1088_s1 + $0xd0] sm:$0xff]  ;;  %v132_v47 = vld [vmem:[%s1088_s1 + $0x108] sm:$0xff]  ;;  %v134_v49 = vld [vmem:[%s1088_s1 + $0x118] sm:$0xff]  ;;  %v624_v51 = vpack.c.bf16 %v127_v43, %v123_v42  ;;  %v514_v43 = vlaneseq }
   0xc   :  { %651 = vmatprep.subr.bf16.mxu1 %v650_v31  ;;  %v129_v46 = vld [vmem:[%s1088_s1 + $0xf0] sm:$0xff]  ;;  %v136_v48 = vld [vmem:[%s1088_s1 + $0x128] sm:$0xff]  ;;  %v138_v50 = vld [vmem:[%s1088_s1 + $0x138] sm:$0xff] }
   0xd   :  { %v656_v52 = vpack.c.bf16 %v129_v46, %v125_v45  ;;  %v626_v53 = vpack.c.bf16 %v136_v48, %v132_v47  ;;  %v131_v54 = vld [vmem:[%s1088_s1 + $0x100] sm:$0xff]  ;;  %v133_v56 = vld [vmem:[%s1088_s1 + $0x110] sm:$0xff]  ;;  %v658_v57 = vpack.c.bf16 %v138_v50, %v134_v49  ;;  %v140_v59 = vld [vmem:[%s1088_s1 + $0x148] sm:$0xff] }
   0xe   :  { %621 = vmatpush1.bf16.msra.mxu0 %v620_v35  ;;  %v135_v55 = vld [vmem:[%s1088_s1 + $0x120] sm:$0xff]  ;;  %v137_v58 = vld [vmem:[%s1088_s1 + $0x130] sm:$0xff]  ;;  %v144_v60 = vld [vmem:[%s1088_s1 + $0x168] sm:$0xff] }
   0xf   :  { %653 = vmatpush1.bf16.msra.mxu1 %v652_v39  ;;  %623 = vmatprep.subr.bf16.mxu0 %v622_v40  ;;  %v142_v61 = vld [vmem:[%s1088_s1 + $0x158] sm:$0xff]  ;;  %v628_v63 = vpack.c.bf16 %v135_v55, %v131_v54  ;;  %v660_v0 = vpack.c.bf16 %v137_v58, %v133_v56  ;;  %v630_v1 = vpack.c.bf16 %v144_v60, %v140_v59  ;;  %v139_v2 = vld [vmem:[%s1088_s1 + $0x140] sm:$0xff]  ;;  %v141_v5 = vld [vmem:[%s1088_s1 + $0x150] sm:$0xff] }
  0x10   :  { %655 = vmatprep.subr.bf16.mxu1 %v654_v44  ;;  %v146_v62 = vld [vmem:[%s1088_s1 + $0x178] sm:$0xff]  ;;  %v143_v4 = vld [vmem:[%s1088_s1 + $0x160] sm:$0xff]  ;;  %v145_v7 = vld [vmem:[%s1088_s1 + $0x170] sm:$0xff]  ;;  %v515_v44 = vshrl.u32 %v514_v43, 7 }
  0x11   :  { %v662_v6 = vpack.c.bf16 %v146_v62, %v142_v61  ;;  %v148_v8 = vld [vmem:[%s1088_s1 + $0x188] sm:$0xff]  ;;  %v150_v10 = vld [vmem:[%s1088_s1 + $0x198] sm:$0xff]  ;;  %v632_v12 = vpack.c.bf16 %v143_v4, %v139_v2  ;;  %v664_v13 = vpack.c.bf16 %v145_v7, %v141_v5  ;;  %v147_v15 = vld [vmem:[%s1088_s1 + $0x180] sm:$0xff] }
  0x12   :  { %625 = vmatpush1.bf16.msra.mxu0 %v624_v51  ;;  %v152_v9 = vld [vmem:[%s1088_s1 + $0x1a8] sm:$0xff]  ;;  %v154_v11 = vld [vmem:[%s1088_s1 + $0x1b8] sm:$0xff]  ;;  %v151_v16 = vld [vmem:[%s1088_s1 + $0x1a0] sm:$0xff]  ;;  %v516_v45 = vsub.s32 0, %v515_v44  ;;  %v524_v47 = vsub.s32 2, %v515_v44  ;;  %v520_v48 = vsub.s32 1, %v515_v44 }
  0x13   :  { %657 = vmatpush1.bf16.msra.mxu1 %v656_v52  ;;  %627 = vmatprep.subr.bf16.mxu0 %v626_v53  ;;  %v634_v14 = vpack.c.bf16 %v152_v9, %v148_v8  ;;  %v149_v17 = vld [vmem:[%s1088_s1 + $0x190] sm:$0xff]  ;;  %v666_v18 = vpack.c.bf16 %v154_v11, %v150_v10  ;;  %v156_v20 = vld [vmem:[%s1088_s1 + $0x1c8] sm:$0xff]  ;;  %v158_v22 = vld [vmem:[%s1088_s1 + $0x1d8] sm:$0xff]  ;;  %v636_v24 = vpack.c.bf16 %v151_v16, %v147_v15  ;;  %v528_v49 = vsub.s32 3, %v515_v44 }
  0x14   :  { %659 = vmatprep.subr.bf16.mxu1 %v658_v57  ;;  %v153_v19 = vld [vmem:[%s1088_s1 + $0x1b0] sm:$0xff]  ;;  %v160_v21 = vld [vmem:[%s1088_s1 + $0x1e8] sm:$0xff]  ;;  %v162_v23 = vld [vmem:[%s1088_s1 + $0x1f8] sm:$0xff] }
  0x15   :  { %v668_v25 = vpack.c.bf16 %v153_v19, %v149_v17  ;;  %v638_v26 = vpack.c.bf16 %v160_v21, %v156_v20  ;;  %v155_v27 = vld [vmem:[%s1088_s1 + $0x1c0] sm:$0xff]  ;;  %v670_v29 = vpack.c.bf16 %v162_v23, %v158_v22  ;;  %v157_v30 = vld [vmem:[%s1088_s1 + $0x1d0] sm:$0xff]  ;;  %v91_v35 = vld [vmem:[%s1089_s0 + $0x8] sm:$0xff] }
  0x16   :  { %629 = vmatpush1.bf16.msra.mxu0 %v628_v63  ;;  %v159_v28 = vld [vmem:[%s1088_s1 + $0x1e0] sm:$0xff]  ;;  %v161_v31 = vld [vmem:[%s1088_s1 + $0x1f0] sm:$0xff]  ;;  %v93_v37 = vld [vmem:[%s1089_s0 + $0x18] sm:$0xff] }
  0x17   :  { %661 = vmatpush1.bf16.msra.mxu1 %v660_v0  ;;  %631 = vmatprep.subr.bf16.mxu0 %v630_v1  ;;  %v640_v32 = vpack.c.bf16 %v159_v28, %v155_v27  ;;  %v672_v33 = vpack.c.bf16 %v161_v31, %v157_v30  ;;  %v90_v34 = vld [vmem:[%s1089_s0] sm:$0xff]  ;;  %v92_v36 = vld [vmem:[%s1089_s0 + $0x10] sm:$0xff]  ;;  %v95_v39 = vld [vmem:[%s1089_s0 + $0x28] sm:$0xff] }
  0x18   :  { %663 = vmatprep.subr.bf16.mxu1 %v662_v6  ;;  %v94_v38 = vld [vmem:[%s1089_s0 + $0x20] sm:$0xff]  ;;  %v96_v40 = vld [vmem:[%s1089_s0 + $0x30] sm:$0xff]  ;;  %v97_v41 = vld [vmem:[%s1089_s0 + $0x38] sm:$0xff] }
  0x19   :  { %v98_v42 = vld [vmem:[%s1089_s0 + $0x40] sm:$0xff] }
  0x1a   :  { %633 = vmatpush1.bf16.msra.mxu0 %v632_v12  ;;  %v512_v46 = vld [vmem:[%s1090_s2] sm:$0xf] }
  0x1b   :  { %665 = vmatpush1.bf16.msra.mxu1 %v664_v13  ;;  %635 = vmatprep.subr.bf16.mxu0 %v634_v14  ;;  %v936_v50 = vrot.slane %v512_v46, %v516_v45  ;;  %v938_v51 = vrot.slane %v512_v46, %v524_v47  ;;  %v940_v52 = vrot.slane %v512_v46, %v520_v48 }
  0x1c   :  { %667 = vmatprep.subr.bf16.mxu1 %v666_v18  ;;  %v942_v53 = vrot.slane %v512_v46, %v528_v49 }
  0x1e   :  { %637 = vmatpush1.bf16.msra.mxu0 %v636_v24 }
  0x1f   :  { %669 = vmatpush1.bf16.msra.mxu1 %v668_v25  ;;  %639 = vmatprep.subr.bf16.mxu0 %v638_v26 }
  0x20   :  { %671 = vmatprep.subr.bf16.mxu1 %v670_v29 }
  0x22   :  { %641 = vmatpush1.bf16.msra.mxu0 %v640_v32 }
  0x23   :  { %673 = vmatpush1.bf16.msra.mxu1 %v672_v33 }
  0x25   :  { %228 = vmatmul.mubr.f32.vlgmr.msra.gmra.mrb[0].mxu0 %v90_v34 }
  0x26   :  { %347 = vmatmul.mubr.f32.vlgmr.msra.gmra.mrb[0].mxu1 %v90_v34  ;;  %233 = vmatprep.mubr.f32.mxu0 %v675_v3 }
  0x27   :  { %352 = vmatprep.mubr.f32.mxu1 %v675_v3 }
  0x29   :  { %234 = vmatmul.mubr.f32.gmra.mrb[2].mxu0 %v91_v35 }
  0x2a   :  { %353 = vmatmul.mubr.f32.gmra.mrb[2].mxu1 %v91_v35  ;;  %239 = vmatprep.mubr.f32.mxu0 %v675_v3 }
  0x2b   :  { %358 = vmatprep.mubr.f32.mxu1 %v675_v3 }
  0x2d   :  { %240 = vmatmul.mubr.f32.gmra.mrb[4].mxu0 %v92_v36 }
  0x2e   :  { %359 = vmatmul.mubr.f32.gmra.mrb[4].mxu1 %v92_v36  ;;  %245 = vmatprep.mubr.f32.mxu0 %v675_v3 }
  0x2f   :  { %364 = vmatprep.mubr.f32.mxu1 %v675_v3 }
  0x31   :  { %246 = vmatmul.mubr.f32.gmra.mrb[6].mxu0 %v93_v37 }
  0x32   :  { %365 = vmatmul.mubr.f32.gmra.mrb[6].mxu1 %v93_v37  ;;  %251 = vmatprep.mubr.f32.mxu0 %v675_v3 }
  0x33   :  { %370 = vmatprep.mubr.f32.mxu1 %v675_v3 }
  0x35   :  { %252 = vmatmul.mubr.f32.gmra.mrb[8].mxu0 %v94_v38 }
  0x36   :  { %371 = vmatmul.mubr.f32.gmra.mrb[8].mxu1 %v94_v38  ;;  %257 = vmatprep.mubr.f32.mxu0 %v675_v3 }
  0x37   :  { %376 = vmatprep.mubr.f32.mxu1 %v675_v3 }
  0x39   :  { %258 = vmatmul.mubr.f32.gmra.mrb[10].mxu0 %v95_v39 }
  0x3a   :  { %377 = vmatmul.mubr.f32.gmra.mrb[10].mxu1 %v95_v39  ;;  %263 = vmatprep.mubr.f32.mxu0 %v675_v3 }
  0x3b   :  { %382 = vmatprep.mubr.f32.mxu1 %v675_v3 }
  0x3d   :  { %264 = vmatmul.mubr.f32.gmra.mrb[12].mxu0 %v96_v40 }
  0x3e   :  { %383 = vmatmul.mubr.f32.gmra.mrb[12].mxu1 %v96_v40  ;;  %269 = vmatprep.mubr.f32.mxu0 %v675_v3 }
  0x3f   :  { %388 = vmatprep.mubr.f32.mxu1 %v675_v3 }
  0x41   :  { %270 = vmatmul.mubr.f32.gmra.mrb[14].mxu0 %v97_v41 }
  0x42   :  { %389 = vmatmul.mubr.f32.gmra.mrb[14].mxu1 %v97_v41  ;;  %275 = vmatprep.mubr.f32.mxu0 %v675_v3 }
  0x43   :  { %394 = vmatprep.mubr.f32.mxu1 %v675_v3 }
  0x45   :  { %276 = vmatmul.mubr.f32.gmra.mrb[16].mxu0 %v98_v42 }
  0x46   :  { %395 = vmatmul.mubr.f32.gmra.mrb[16].mxu1 %v98_v42 }
  0xf8   :  { %v229_v3 = vpop.f32.mrb[0].mxu0 }
  0xf9   :  { %v534_v54 = vadd.f32 %v936_v50, %v229_v3  ;;  %v348_v55 = vpop.f32.mrb[0].mxu1  ;;  %v231_v56 = vpop.f32.mrb[1].mxu0 }
  0xfa   :  { %v536_v57 = vadd.f32 %v938_v51, %v348_v55  ;;  %v535_v58 = vadd.f32 %v940_v52, %v231_v56  ;;  %v350_v59 = vpop.f32.mrb[1].mxu1 }
  0xfb   :  { %570 = vst [vmem:[%s1091_s3] sm:$0xff] %v534_v54  ;;  %v537_v60 = vadd.f32 %v942_v53, %v350_v59 }
  0xfc   :  { %572 = vst [vmem:[%s1091_s3 + $0x10] sm:$0xff] %v536_v57  ;;  %571 = vst [vmem:[%s1091_s3 + $0x8] sm:$0xff] %v535_v58  ;;  %v235_v61 = vpop.f32.mrb[2].mxu0 }
  0xfd   :  { %573 = vst [vmem:[%s1091_s3 + $0x18] sm:$0xff] %v537_v60  ;;  %v538_v62 = vadd.f32 %v936_v50, %v235_v61  ;;  %v354_v63 = vpop.f32.mrb[2].mxu1  ;;  %v237_v0 = vpop.f32.mrb[3].mxu0 }
  0xfe   :  { %v540_v1 = vadd.f32 %v938_v51, %v354_v63  ;;  %v539_v2 = vadd.f32 %v940_v52, %v237_v0  ;;  %v356_v4 = vpop.f32.mrb[3].mxu1 }
  0xff   :  { %574 = vst [vmem:[%s1091_s3 + $0x20] sm:$0xff] %v538_v62  ;;  %v541_v5 = vadd.f32 %v942_v53, %v356_v4 }
 0x100   :  { %576 = vst [vmem:[%s1091_s3 + $0x30] sm:$0xff] %v540_v1  ;;  %575 = vst [vmem:[%s1091_s3 + $0x28] sm:$0xff] %v539_v2  ;;  %v241_v6 = vpop.f32.mrb[4].mxu0 }
 0x101   :  { %577 = vst [vmem:[%s1091_s3 + $0x38] sm:$0xff] %v541_v5  ;;  %v542_v7 = vadd.f32 %v936_v50, %v241_v6  ;;  %v360_v8 = vpop.f32.mrb[4].mxu1  ;;  %v243_v9 = vpop.f32.mrb[5].mxu0 }
 0x102   :  { %v544_v10 = vadd.f32 %v938_v51, %v360_v8  ;;  %v543_v11 = vadd.f32 %v940_v52, %v243_v9  ;;  %v362_v12 = vpop.f32.mrb[5].mxu1 }
 0x103   :  { %578 = vst [vmem:[%s1091_s3 + $0x40] sm:$0xff] %v542_v7  ;;  %v545_v13 = vadd.f32 %v942_v53, %v362_v12 }
 0x104   :  { %580 = vst [vmem:[%s1091_s3 + $0x50] sm:$0xff] %v544_v10  ;;  %579 = vst [vmem:[%s1091_s3 + $0x48] sm:$0xff] %v543_v11  ;;  %v247_v14 = vpop.f32.mrb[6].mxu0 }
 0x105   :  { %581 = vst [vmem:[%s1091_s3 + $0x58] sm:$0xff] %v545_v13  ;;  %v546_v15 = vadd.f32 %v936_v50, %v247_v14  ;;  %v366_v16 = vpop.f32.mrb[6].mxu1  ;;  %v249_v17 = vpop.f32.mrb[7].mxu0 }
 0x106   :  { %v548_v18 = vadd.f32 %v938_v51, %v366_v16  ;;  %v547_v19 = vadd.f32 %v940_v52, %v249_v17  ;;  %v368_v20 = vpop.f32.mrb[7].mxu1 }
 0x107   :  { %582 = vst [vmem:[%s1091_s3 + $0x60] sm:$0xff] %v546_v15  ;;  %v549_v21 = vadd.f32 %v942_v53, %v368_v20 }
 0x108   :  { %584 = vst [vmem:[%s1091_s3 + $0x70] sm:$0xff] %v548_v18  ;;  %583 = vst [vmem:[%s1091_s3 + $0x68] sm:$0xff] %v547_v19  ;;  %v253_v22 = vpop.f32.mrb[8].mxu0 }
 0x109   :  { %585 = vst [vmem:[%s1091_s3 + $0x78] sm:$0xff] %v549_v21  ;;  %v550_v23 = vadd.f32 %v936_v50, %v253_v22  ;;  %v372_v24 = vpop.f32.mrb[8].mxu1  ;;  %v255_v25 = vpop.f32.mrb[9].mxu0 }
 0x10a   :  { %v552_v26 = vadd.f32 %v938_v51, %v372_v24  ;;  %v551_v27 = vadd.f32 %v940_v52, %v255_v25  ;;  %v374_v28 = vpop.f32.mrb[9].mxu1 }
 0x10b   :  { %586 = vst [vmem:[%s1091_s3 + $0x80] sm:$0xff] %v550_v23  ;;  %v553_v29 = vadd.f32 %v942_v53, %v374_v28 }
 0x10c   :  { %588 = vst [vmem:[%s1091_s3 + $0x90] sm:$0xff] %v552_v26  ;;  %587 = vst [vmem:[%s1091_s3 + $0x88] sm:$0xff] %v551_v27  ;;  %v259_v30 = vpop.f32.mrb[10].mxu0 }
 0x10d   :  { %589 = vst [vmem:[%s1091_s3 + $0x98] sm:$0xff] %v553_v29  ;;  %v554_v31 = vadd.f32 %v936_v50, %v259_v30  ;;  %v378_v32 = vpop.f32.mrb[10].mxu1  ;;  %v261_v33 = vpop.f32.mrb[11].mxu0 }
 0x10e   :  { %v556_v34 = vadd.f32 %v938_v51, %v378_v32  ;;  %v555_v35 = vadd.f32 %v940_v52, %v261_v33  ;;  %v380_v36 = vpop.f32.mrb[11].mxu1 }
 0x10f   :  { %590 = vst [vmem:[%s1091_s3 + $0xa0] sm:$0xff] %v554_v31  ;;  %v557_v37 = vadd.f32 %v942_v53, %v380_v36 }
 0x110   :  { %592 = vst [vmem:[%s1091_s3 + $0xb0] sm:$0xff] %v556_v34  ;;  %591 = vst [vmem:[%s1091_s3 + $0xa8] sm:$0xff] %v555_v35  ;;  %v265_v38 = vpop.f32.mrb[12].mxu0 }
 0x111   :  { %593 = vst [vmem:[%s1091_s3 + $0xb8] sm:$0xff] %v557_v37  ;;  %v558_v39 = vadd.f32 %v936_v50, %v265_v38  ;;  %v384_v40 = vpop.f32.mrb[12].mxu1  ;;  %v267_v41 = vpop.f32.mrb[13].mxu0 }
 0x112   :  { %v560_v42 = vadd.f32 %v938_v51, %v384_v40  ;;  %v559_v43 = vadd.f32 %v940_v52, %v267_v41  ;;  %v386_v44 = vpop.f32.mrb[13].mxu1 }
 0x113   :  { %594 = vst [vmem:[%s1091_s3 + $0xc0] sm:$0xff] %v558_v39  ;;  %v561_v45 = vadd.f32 %v942_v53, %v386_v44 }
 0x114   :  { %596 = vst [vmem:[%s1091_s3 + $0xd0] sm:$0xff] %v560_v42  ;;  %595 = vst [vmem:[%s1091_s3 + $0xc8] sm:$0xff] %v559_v43  ;;  %v271_v46 = vpop.f32.mrb[14].mxu0 }
 0x115   :  { %597 = vst [vmem:[%s1091_s3 + $0xd8] sm:$0xff] %v561_v45  ;;  %v562_v47 = vadd.f32 %v936_v50, %v271_v46  ;;  %v390_v48 = vpop.f32.mrb[14].mxu1  ;;  %v273_v49 = vpop.f32.mrb[15].mxu0 }
 0x116   :  { %v564_v3 = vadd.f32 %v938_v51, %v390_v48  ;;  %v563_v54 = vadd.f32 %v940_v52, %v273_v49  ;;  %v392_v55 = vpop.f32.mrb[15].mxu1 }
 0x117   :  { %598 = vst [vmem:[%s1091_s3 + $0xe0] sm:$0xff] %v562_v47  ;;  %v565_v56 = vadd.f32 %v942_v53, %v392_v55 }
 0x118   :  { %600 = vst [vmem:[%s1091_s3 + $0xf0] sm:$0xff] %v564_v3  ;;  %599 = vst [vmem:[%s1091_s3 + $0xe8] sm:$0xff] %v563_v54  ;;  %v277_v57 = vpop.f32.mrb[16].mxu0 }
 0x119   :  { %601 = vst [vmem:[%s1091_s3 + $0xf8] sm:$0xff] %v565_v56  ;;  %v566_v58 = vadd.f32 %v936_v50, %v277_v57  ;;  %v396_v59 = vpop.f32.mrb[16].mxu1  ;;  %v279_v60 = vpop.f32.mrb[17].mxu0 }
 0x11a   :  { %v568_v61 = vadd.f32 %v938_v51, %v396_v59  ;;  %v567_v62 = vadd.f32 %v940_v52, %v279_v60  ;;  %v398_v63 = vpop.f32.mrb[17].mxu1 }
 0x11b   :  { %602 = vst [vmem:[%s1091_s3 + $0x100] sm:$0xff] %v566_v58  ;;  %v569_v0 = vadd.f32 %v942_v53, %v398_v63 }
 0x11c   :  { %604 = vst [vmem:[%s1091_s3 + $0x110] sm:$0xff] %v568_v61  ;;  %603 = vst [vmem:[%s1091_s3 + $0x108] sm:$0xff] %v567_v62 }
 0x11d   :  { %605 = vst [vmem:[%s1091_s3 + $0x118] sm:$0xff] %v569_v0 }

// kernel: decoder_rnn_forward.6
= control target key start
LH: loop header
LB: loop body
LE: loop exit
PB: predicated region body
PF: predicated region fallthrough
CT: control target
= control target key end

     0   :  { %v2500_v3 = vmov 0.0   ;;  %s3243_s1 = inlined_call_operand.vmem [shape: f32[128,512], index: 1, kind: input, shape index: {}]   ;;  %s3244_s0 = inlined_call_operand.vmem [shape: f32[9,8,512], index: 0, kind: input, shape index: {}]   ;;  %s3245_s2 = inlined_call_operand.vmem [shape: f32[9,8,128], index: 2, kind: output, shape index: {}]  }
   0x1   :  { %v18_v0 = vld [vmem:[%s3243_s1 + $0x8] sm:$0xff]  ;;  %v17_v2 = vld [vmem:[%s3243_s1] sm:$0xff]  ;;  %150 = vmatprep.mubr.f32.mxu0 %v2500_v3  ;;  %221 = vmatprep.mubr.f32.mxu1 %v2500_v3  ;;  %v20_v19 = vld [vmem:[%s3243_s1 + $0x18] sm:$0xff] }
   0x2   :  { %v22_v1 = vld [vmem:[%s3243_s1 + $0x28] sm:$0xff]  ;;  %v21_v5 = vld [vmem:[%s3243_s1 + $0x20] sm:$0xff]  ;;  %v24_v20 = vld [vmem:[%s3243_s1 + $0x38] sm:$0xff] }
   0x3   :  { %v2527_v4 = vpack.c.bf16 %v22_v1, %v18_v0  ;;  %v26_v6 = vld [vmem:[%s3243_s1 + $0x48] sm:$0xff]  ;;  %v2538_v8 = vpack.c.bf16 %v21_v5, %v17_v2  ;;  %v25_v10 = vld [vmem:[%s3243_s1 + $0x40] sm:$0xff]  ;;  %v2579_v22 = vpack.c.bf16 %v24_v20, %v20_v19  ;;  %v19_v23 = vld [vmem:[%s3243_s1 + $0x10] sm:$0xff] }
   0x4   :  { %v30_v7 = vld [vmem:[%s3243_s1 + $0x68] sm:$0xff]  ;;  %v29_v11 = vld [vmem:[%s3243_s1 + $0x60] sm:$0xff]  ;;  %v23_v24 = vld [vmem:[%s3243_s1 + $0x30] sm:$0xff] }
   0x5   :  { %v2540_v9 = vpack.c.bf16 %v30_v7, %v26_v6  ;;  %v34_v12 = vld [vmem:[%s3243_s1 + $0x88] sm:$0xff]  ;;  %1780 = vmatprep.subr.bf16.mxu0 %v2527_v4  ;;  %v2556_v14 = vpack.c.bf16 %v29_v11, %v25_v10  ;;  %v33_v15 = vld [vmem:[%s3243_s1 + $0x80] sm:$0xff]  ;;  %v2587_v25 = vpack.c.bf16 %v23_v24, %v19_v23  ;;  %1812 = vmatprep.subr.bf16.mxu1 %v2579_v22  ;;  %v28_v27 = vld [vmem:[%s3243_s1 + $0x58] sm:$0xff] }
   0x6   :  { %v38_v13 = vld [vmem:[%s3243_s1 + $0xa8] sm:$0xff]  ;;  %1782 = vmatpush1.bf16.msra.mxu0 %v2538_v8  ;;  %v37_v16 = vld [vmem:[%s3243_s1 + $0xa0] sm:$0xff]  ;;  %v32_v28 = vld [vmem:[%s3243_s1 + $0x78] sm:$0xff] }
   0x7   :  { %1784 = vmatprep.subr.bf16.mxu0 %v2540_v9  ;;  %v2565_v17 = vpack.c.bf16 %v38_v13, %v34_v12  ;;  %v42_v18 = vld [vmem:[%s3243_s1 + $0xc8] sm:$0xff]  ;;  %v2590_v26 = vpack.c.bf16 %v37_v16, %v33_v15  ;;  %v27_v29 = vld [vmem:[%s3243_s1 + $0x50] sm:$0xff]  ;;  %v41_v31 = vld [vmem:[%s3243_s1 + $0xc0] sm:$0xff]  ;;  %1814 = vmatpush1.bf16.msra.mxu1 %v2587_v25  ;;  %v2612_v33 = vpack.c.bf16 %v32_v28, %v28_v27 }
   0x8   :  { %v46_v21 = vld [vmem:[%s3243_s1 + $0xe8] sm:$0xff]  ;;  %v45_v32 = vld [vmem:[%s3243_s1 + $0xe0] sm:$0xff]  ;;  %v31_v34 = vld [vmem:[%s3243_s1 + $0x70] sm:$0xff] }
   0x9   :  { %v2603_v30 = vpack.c.bf16 %v46_v21, %v42_v18  ;;  %v50_v35 = vld [vmem:[%s3243_s1 + $0x108] sm:$0xff]  ;;  %v2623_v37 = vpack.c.bf16 %v31_v34, %v27_v29  ;;  %v36_v38 = vld [vmem:[%s3243_s1 + $0x98] sm:$0xff]  ;;  %1816 = vmatprep.subr.bf16.mxu1 %v2612_v33  ;;  %v35_v40 = vld [vmem:[%s3243_s1 + $0x90] sm:$0xff]  ;;  %v2639_v42 = vpack.c.bf16 %v45_v32, %v41_v31 }
   0xa   :  { %1786 = vmatpush1.bf16.msra.mxu0 %v2556_v14  ;;  %v54_v36 = vld [vmem:[%s3243_s1 + $0x128] sm:$0xff]  ;;  %v40_v39 = vld [vmem:[%s3243_s1 + $0xb8] sm:$0xff]  ;;  %v39_v41 = vld [vmem:[%s3243_s1 + $0xb0] sm:$0xff] }
   0xb   :  { %1788 = vmatprep.subr.bf16.mxu0 %v2565_v17  ;;  %v49_v43 = vld [vmem:[%s3243_s1 + $0x100] sm:$0xff]  ;;  %v2647_v45 = vpack.c.bf16 %v40_v39, %v36_v38  ;;  %v2650_v46 = vpack.c.bf16 %v54_v36, %v50_v35  ;;  %1818 = vmatpush1.bf16.msra.mxu1 %v2623_v37  ;;  %v58_v47 = vld [vmem:[%s3243_s1 + $0x148] sm:$0xff]  ;;  %v2656_v48 = vpack.c.bf16 %v39_v41, %v35_v40  ;;  %v44_v49 = vld [vmem:[%s3243_s1 + $0xd8] sm:$0xff] }
   0xc   :  { %v53_v44 = vld [vmem:[%s3243_s1 + $0x120] sm:$0xff]  ;;  %v48_v50 = vld [vmem:[%s3243_s1 + $0xf8] sm:$0xff]  ;;  %v62_v51 = vld [vmem:[%s3243_s1 + $0x168] sm:$0xff] }
   0xd   :  { %1820 = vmatprep.subr.bf16.mxu1 %v2647_v45  ;;  %v2668_v52 = vpack.c.bf16 %v48_v50, %v44_v49  ;;  %v43_v53 = vld [vmem:[%s3243_s1 + $0xd0] sm:$0xff]  ;;  %v2677_v55 = vpack.c.bf16 %v53_v44, %v49_v43  ;;  %v52_v56 = vld [vmem:[%s3243_s1 + $0x118] sm:$0xff]  ;;  %v2686_v58 = vpack.c.bf16 %v62_v51, %v58_v47  ;;  %v57_v59 = vld [vmem:[%s3243_s1 + $0x140] sm:$0xff] }
   0xe   :  { %1790 = vmatpush1.bf16.msra.mxu0 %v2590_v26  ;;  %v47_v54 = vld [vmem:[%s3243_s1 + $0xf0] sm:$0xff]  ;;  %v56_v57 = vld [vmem:[%s3243_s1 + $0x138] sm:$0xff]  ;;  %v61_v60 = vld [vmem:[%s3243_s1 + $0x160] sm:$0xff] }
   0xf   :  { %1792 = vmatprep.subr.bf16.mxu0 %v2603_v30  ;;  %1822 = vmatpush1.bf16.msra.mxu1 %v2656_v48  ;;  %v66_v61 = vld [vmem:[%s3243_s1 + $0x188] sm:$0xff]  ;;  %v2698_v62 = vpack.c.bf16 %v47_v54, %v43_v53  ;;  %v2704_v0 = vpack.c.bf16 %v56_v57, %v52_v56  ;;  %v51_v1 = vld [vmem:[%s3243_s1 + $0x110] sm:$0xff]  ;;  %v60_v5 = vld [vmem:[%s3243_s1 + $0x158] sm:$0xff]  ;;  %v2719_v7 = vpack.c.bf16 %v61_v60, %v57_v59 }
  0x10   :  { %v70_v63 = vld [vmem:[%s3243_s1 + $0x1a8] sm:$0xff]  ;;  %1824 = vmatprep.subr.bf16.mxu1 %v2668_v52  ;;  %v55_v2 = vld [vmem:[%s3243_s1 + $0x130] sm:$0xff]  ;;  %v64_v6 = vld [vmem:[%s3243_s1 + $0x178] sm:$0xff] }
  0x11   :  { %v2722_v10 = vpack.c.bf16 %v70_v63, %v66_v61  ;;  %v65_v11 = vld [vmem:[%s3243_s1 + $0x180] sm:$0xff]  ;;  %v74_v13 = vld [vmem:[%s3243_s1 + $0x1c8] sm:$0xff]  ;;  %v2734_v15 = vpack.c.bf16 %v55_v2, %v51_v1  ;;  %v2740_v18 = vpack.c.bf16 %v64_v6, %v60_v5  ;;  %v59_v19 = vld [vmem:[%s3243_s1 + $0x150] sm:$0xff] }
  0x12   :  { %1794 = vmatpush1.bf16.msra.mxu0 %v2639_v42  ;;  %v69_v12 = vld [vmem:[%s3243_s1 + $0x1a0] sm:$0xff]  ;;  %v78_v16 = vld [vmem:[%s3243_s1 + $0x1e8] sm:$0xff]  ;;  %v63_v20 = vld [vmem:[%s3243_s1 + $0x170] sm:$0xff] }
  0x13   :  { %1796 = vmatprep.subr.bf16.mxu0 %v2650_v46  ;;  %1826 = vmatpush1.bf16.msra.mxu1 %v2698_v62  ;;  %v68_v21 = vld [vmem:[%s3243_s1 + $0x198] sm:$0xff]  ;;  %v2755_v24 = vpack.c.bf16 %v69_v12, %v65_v11  ;;  %v2758_v27 = vpack.c.bf16 %v78_v16, %v74_v13  ;;  %v73_v28 = vld [vmem:[%s3243_s1 + $0x1c0] sm:$0xff]  ;;  %v2767_v31 = vpack.c.bf16 %v63_v20, %v59_v19  ;;  %v67_v34 = vld [vmem:[%s3243_s1 + $0x190] sm:$0xff] }
  0x14   :  { %1828 = vmatprep.subr.bf16.mxu1 %v2704_v0  ;;  %v72_v23 = vld [vmem:[%s3243_s1 + $0x1b8] sm:$0xff]  ;;  %v77_v29 = vld [vmem:[%s3243_s1 + $0x1e0] sm:$0xff]  ;;  %v71_v35 = vld [vmem:[%s3243_s1 + $0x1b0] sm:$0xff] }
  0x15   :  { %v2770_v32 = vpack.c.bf16 %v72_v23, %v68_v21  ;;  %v76_v36 = vld [vmem:[%s3243_s1 + $0x1d8] sm:$0xff]  ;;  %v2785_v39 = vpack.c.bf16 %v77_v29, %v73_v28  ;;  %v2789_v40 = vpack.c.bf16 %v71_v35, %v67_v34  ;;  %v75_v43 = vld [vmem:[%s3243_s1 + $0x1d0] sm:$0xff]  ;;  %v81_v49 = vld [vmem:[%s3244_s0] sm:$0xff] }
  0x16   :  { %1798 = vmatpush1.bf16.msra.mxu0 %v2677_v55  ;;  %v80_v38 = vld [vmem:[%s3243_s1 + $0x1f8] sm:$0xff]  ;;  %v79_v44 = vld [vmem:[%s3243_s1 + $0x1f0] sm:$0xff]  ;;  %v82_v50 = vld [vmem:[%s3244_s0 + $0x8] sm:$0xff] }
  0x17   :  { %1800 = vmatprep.subr.bf16.mxu0 %v2686_v58  ;;  %1830 = vmatpush1.bf16.msra.mxu1 %v2734_v15  ;;  %v2792_v41 = vpack.c.bf16 %v80_v38, %v76_v36  ;;  %v2802_v47 = vpack.c.bf16 %v79_v44, %v75_v43  ;;  %v84_v60 = vld [vmem:[%s3244_s0 + $0x18] sm:$0xff]  ;;  %v83_v2 = vld [vmem:[%s3244_s0 + $0x10] sm:$0xff]  ;;  %v1715_v44 = vld [vmem:[%s3244_s0 + $0x20] sm:$0xff] }
  0x18   :  { %1832 = vmatprep.subr.bf16.mxu1 %v2740_v18 }
  0x1a   :  { %1802 = vmatpush1.bf16.msra.mxu0 %v2719_v7 }
  0x1b   :  { %1804 = vmatprep.subr.bf16.mxu0 %v2722_v10  ;;  %1834 = vmatpush1.bf16.msra.mxu1 %v2767_v31 }
  0x1c   :  { %1836 = vmatprep.subr.bf16.mxu1 %v2770_v32 }
  0x1e   :  { %1806 = vmatpush1.bf16.msra.mxu0 %v2755_v24 }
  0x1f   :  { %1808 = vmatprep.subr.bf16.mxu0 %v2758_v27  ;;  %1838 = vmatpush1.bf16.msra.mxu1 %v2789_v40 }
  0x20   :  { %1840 = vmatprep.subr.bf16.mxu1 %v2792_v41 }
  0x22   :  { %1810 = vmatpush1.bf16.msra.mxu0 %v2785_v39 }
  0x23   :  { %1844 = vmatprep.subr.bf16.mxu0 %v2527_v4  ;;  %1842 = vmatpush1.bf16.msra.mxu1 %v2802_v47 }
  0x24   :  { %1876 = vmatprep.subr.bf16.mxu1 %v2579_v22 }
  0x25   :  { %151 = vmatmul.mubr.f32.vlgmr.msra.gmra.mrb[0].mxu0 %v2500_v3 }
  0x26   :  { %1846 = vmatpush1.bf16.msra.mxu0 %v2538_v8  ;;  %330 = vmatprep.mubr.f32.mxu0 %v2500_v3 }
  0x27   :  { %1848 = vmatprep.subr.bf16.mxu0 %v2540_v9  ;;  %222 = vmatmul.mubr.f32.vlgmr.msra.gmra.mrb[0].mxu1 %v2500_v3 }
  0x28   :  { %1878 = vmatpush1.bf16.msra.mxu1 %v2587_v25  ;;  %401 = vmatprep.mubr.f32.mxu1 %v2500_v3 }
  0x29   :  { %1880 = vmatprep.subr.bf16.mxu1 %v2612_v33 }
  0x2a   :  { %1850 = vmatpush1.bf16.msra.mxu0 %v2556_v14 }
  0x2b   :  { %1852 = vmatprep.subr.bf16.mxu0 %v2565_v17 }
  0x2c   :  { %1882 = vmatpush1.bf16.msra.mxu1 %v2623_v37 }
  0x2d   :  { %1884 = vmatprep.subr.bf16.mxu1 %v2647_v45 }
  0x2e   :  { %1854 = vmatpush1.bf16.msra.mxu0 %v2590_v26 }
  0x2f   :  { %1856 = vmatprep.subr.bf16.mxu0 %v2603_v30 }
  0x30   :  { %1886 = vmatpush1.bf16.msra.mxu1 %v2656_v48 }
  0x31   :  { %1888 = vmatprep.subr.bf16.mxu1 %v2668_v52 }
  0x32   :  { %1858 = vmatpush1.bf16.msra.mxu0 %v2639_v42 }
  0x33   :  { %1860 = vmatprep.subr.bf16.mxu0 %v2650_v46 }
  0x34   :  { %1890 = vmatpush1.bf16.msra.mxu1 %v2698_v62 }
  0x35   :  { %1892 = vmatprep.subr.bf16.mxu1 %v2704_v0 }
  0x36   :  { %1862 = vmatpush1.bf16.msra.mxu0 %v2677_v55 }
  0x37   :  { %1864 = vmatprep.subr.bf16.mxu0 %v2686_v58 }
  0x38   :  { %1894 = vmatpush1.bf16.msra.mxu1 %v2734_v15 }
  0x39   :  { %1896 = vmatprep.subr.bf16.mxu1 %v2740_v18 }
  0x3a   :  { %1866 = vmatpush1.bf16.msra.mxu0 %v2719_v7 }
  0x3b   :  { %1868 = vmatprep.subr.bf16.mxu0 %v2722_v10 }
  0x3c   :  { %1898 = vmatpush1.bf16.msra.mxu1 %v2767_v31 }
  0x3d   :  { %1900 = vmatprep.subr.bf16.mxu1 %v2770_v32 }
  0x3e   :  { %1870 = vmatpush1.bf16.msra.mxu0 %v2755_v24 }
  0x3f   :  { %1872 = vmatprep.subr.bf16.mxu0 %v2758_v27 }
  0x40   :  { %1902 = vmatpush1.bf16.msra.mxu1 %v2789_v40 }
  0x41   :  { %1904 = vmatprep.subr.bf16.mxu1 %v2792_v41 }
  0x42   :  { %1874 = vmatpush1.bf16.msra.mxu0 %v2785_v39 }
  0x43   :  { %1908 = vmatprep.subr.bf16.mxu0 %v2527_v4 }
  0x44   :  { %1906 = vmatpush1.bf16.msra.mxu1 %v2802_v47 }
  0x45   :  { %1940 = vmatprep.subr.bf16.mxu1 %v2579_v22 }
  0xf8   :  { %v152_v51 = vpop.f32.mrb[0].mxu0 }
  0xf9   :  { %v228_v53 = vadd.f32 %v152_v51, %v81_v49  ;;  %v154_v54 = vpop.f32.mrb[1].mxu0  ;;  %v1716_v49 = vld [vmem:[%s3244_s0 + $0x28] sm:$0xff] }
  0xfa   :  { %v229_v56 = vadd.f32 %v154_v54, %v82_v50  ;;  %v223_v61 = vpop.f32.mrb[0].mxu1 }
  0xfb   :  { %v1712_v57 = vmul.f32 -1.442695, %v228_v53  ;;  %v225_v63 = vpop.f32.mrb[1].mxu1  ;;  %v230_v6 = vadd.f32 %v223_v61, %v83_v2  ;;  %v1718_v61 = vld [vmem:[%s3244_s0 + $0x38] sm:$0xff] }
  0xfc   :  { %v1713_v59 = vmul.f32 -1.442695, %v229_v56  ;;  %v231_v1 = vadd.f32 %v225_v63, %v84_v60 }
  0xfd   :  { %2356 = vpow2.f32 %v1712_v57 }
  0xfe   :  { %2358 = vpow2.f32 %v1713_v59  ;;  %v1714_v5 = vmul.f32 -1.442695, %v231_v1  ;;  %v1717_v1 = vld [vmem:[%s3244_s0 + $0x30] sm:$0xff] }
 0x100   :  { %2360 = vpow2.f32 %v1714_v5 }
 0x101   :  { %2362 = vtanh.f32 %v230_v6 }
 0x107   :  { %v2357_v11 = vpop.eup %2356 }
 0x108   :  { %v2359_v12 = vpop.eup %2358  ;;  %v235_v13 = vadd.f32 1.0, %v2357_v11 }
 0x109   :  { %v241_v16 = vadd.f32 1.0, %v2359_v12 }
 0x10a   :  { %2364 = vrcp.f32 %v235_v13  ;;  %v2361_v19 = vpop.eup %2360 }
 0x10b   :  { %2366 = vrcp.f32 %v241_v16  ;;  %v2363_v20 = vpop.eup %2362  ;;  %v248_v23 = vadd.f32 1.0, %v2361_v19 }
 0x10d   :  { %2368 = vrcp.f32 %v248_v23 }
 0x114   :  { %v2365_v21 = vpop.eup %2364 }
 0x115   :  { %v2367_v28 = vpop.eup %2366  ;;  %v253_v29 = vmul.f32 %v2365_v21, %v2363_v20 }
 0x116   :  { %v252_v34 = vmul.f32 0.0, %v2367_v28 }
 0x117   :  { %v2369_v36 = vpop.eup %2368 }
 0x118   :  { %v2856_v35 = vadd.f32 %v253_v29, %v252_v34 }
 0x11a   :  { %2370 = vtanh.f32 %v2856_v35 }
 0x124   :  { %v2371_v38 = vpop.eup %2370 }
 0x125   :  { %v256_v43 = vmul.f32 %v2371_v38, %v2369_v36 }
 0x127   :  { %259 = vst [vmem:[%s3245_s2] sm:$0xff] %v256_v43  ;;  %331 = vmatmul.mubr.f32.vlgmr.msra.gmra.mrb[2].mxu0 %v256_v43  ;;  %402 = vmatmul.mubr.f32.vlgmr.msra.gmra.mrb[2].mxu1 %v256_v43 }
 0x128   :  { %1910 = vmatpush1.bf16.msra.mxu0 %v2538_v8  ;;  %1942 = vmatpush1.bf16.msra.mxu1 %v2587_v25 }
 0x129   :  { %1912 = vmatprep.subr.bf16.mxu0 %v2540_v9  ;;  %1944 = vmatprep.subr.bf16.mxu1 %v2612_v33 }
 0x12a   :  { %511 = vmatprep.mubr.f32.mxu0 %v2500_v3  ;;  %582 = vmatprep.mubr.f32.mxu1 %v2500_v3 }
 0x12c   :  { %1914 = vmatpush1.bf16.msra.mxu0 %v2556_v14  ;;  %1946 = vmatpush1.bf16.msra.mxu1 %v2623_v37 }
 0x12d   :  { %1916 = vmatprep.subr.bf16.mxu0 %v2565_v17  ;;  %1948 = vmatprep.subr.bf16.mxu1 %v2647_v45 }
 0x130   :  { %1918 = vmatpush1.bf16.msra.mxu0 %v2590_v26  ;;  %1950 = vmatpush1.bf16.msra.mxu1 %v2656_v48 }
 0x131   :  { %1920 = vmatprep.subr.bf16.mxu0 %v2603_v30  ;;  %1952 = vmatprep.subr.bf16.mxu1 %v2668_v52 }
 0x134   :  { %1922 = vmatpush1.bf16.msra.mxu0 %v2639_v42  ;;  %1954 = vmatpush1.bf16.msra.mxu1 %v2698_v62 }
 0x135   :  { %1924 = vmatprep.subr.bf16.mxu0 %v2650_v46  ;;  %1956 = vmatprep.subr.bf16.mxu1 %v2704_v0 }
 0x138   :  { %1926 = vmatpush1.bf16.msra.mxu0 %v2677_v55  ;;  %1958 = vmatpush1.bf16.msra.mxu1 %v2734_v15 }
 0x139   :  { %1928 = vmatprep.subr.bf16.mxu0 %v2686_v58  ;;  %1960 = vmatprep.subr.bf16.mxu1 %v2740_v18 }
 0x13c   :  { %1930 = vmatpush1.bf16.msra.mxu0 %v2719_v7  ;;  %1962 = vmatpush1.bf16.msra.mxu1 %v2767_v31 }
 0x13d   :  { %1932 = vmatprep.subr.bf16.mxu0 %v2722_v10  ;;  %1964 = vmatprep.subr.bf16.mxu1 %v2770_v32 }
 0x140   :  { %1934 = vmatpush1.bf16.msra.mxu0 %v2755_v24  ;;  %1966 = vmatpush1.bf16.msra.mxu1 %v2789_v40 }
 0x141   :  { %1936 = vmatprep.subr.bf16.mxu0 %v2758_v27  ;;  %1968 = vmatprep.subr.bf16.mxu1 %v2792_v41 }
 0x144   :  { %1938 = vmatpush1.bf16.msra.mxu0 %v2785_v39  ;;  %1970 = vmatpush1.bf16.msra.mxu1 %v2802_v47 }
 0x145   :  { %1972 = vmatprep.subr.bf16.mxu0 %v2527_v4  ;;  %2004 = vmatprep.subr.bf16.mxu1 %v2579_v22 }
 0x1fa   :  { %v332_v50 = vpop.f32.mrb[2].mxu0  ;;  %v403_v51 = vpop.f32.mrb[2].mxu1 }
 0x1fb   :  { %v408_v53 = vadd.f32 %v1715_v44, %v332_v50  ;;  %v334_v54 = vpop.f32.mrb[3].mxu0  ;;  %v405_v56 = vpop.f32.mrb[3].mxu1  ;;  %v410_v5 = vadd.f32 %v1717_v1, %v403_v51  ;;  %v1724_v44 = vld [vmem:[%s3244_s0 + $0x48] sm:$0xff] }
 0x1fc   :  { %v409_v57 = vadd.f32 %v1716_v49, %v334_v54  ;;  %v411_v63 = vadd.f32 %v1718_v61, %v405_v56 }
 0x1fd   :  { %v1719_v59 = vmul.f32 -1.442695, %v408_v53 }
 0x1fe   :  { %v1720_v60 = vmul.f32 -1.442695, %v409_v57  ;;  %v1721_v2 = vmul.f32 -1.442695, %v411_v63  ;;  %v1725_v63 = vld [vmem:[%s3244_s0 + $0x50] sm:$0xff] }
 0x1ff   :  { %2372 = vpow2.f32 %v1719_v59 }
 0x200   :  { %2374 = vpow2.f32 %v1720_v60  ;;  %v1726_v60 = vld [vmem:[%s3244_s0 + $0x58] sm:$0xff] }
 0x201   :  { %2376 = vpow2.f32 %v1721_v2 }
 0x202   :  { %2378 = vtanh.f32 %v410_v5 }
 0x209   :  { %v2373_v6 = vpop.eup %2372 }
 0x20a   :  { %v2375_v11 = vpop.eup %2374  ;;  %v415_v12 = vadd.f32 1.0, %v2373_v6 }
 0x20b   :  { %v421_v13 = vadd.f32 1.0, %v2375_v11  ;;  %v2377_v16 = vpop.eup %2376 }
 0x20c   :  { %2380 = vrcp.f32 %v415_v12  ;;  %v2379_v19 = vpop.eup %2378  ;;  %v428_v28 = vadd.f32 1.0, %v2377_v16 }
 0x20d   :  { %2382 = vrcp.f32 %v421_v13 }
 0x20e   :  { %2384 = vrcp.f32 %v428_v28 }
 0x216   :  { %v2381_v20 = vpop.eup %2380 }
 0x217   :  { %v2383_v21 = vpop.eup %2382  ;;  %v433_v23 = vmul.f32 %v2381_v20, %v2379_v19 }
 0x218   :  { %v432_v29 = vmul.f32 %v2383_v21, %v2856_v35  ;;  %v2385_v36 = vpop.eup %2384  ;;  %v1723_v35 = vld [vmem:[%s3244_s0 + $0x40] sm:$0xff] }
 0x21a   :  { %v2909_v34 = vadd.f32 %v433_v23, %v432_v29 }
 0x21c   :  { %2386 = vtanh.f32 %v2909_v34 }
 0x226   :  { %v2387_v38 = vpop.eup %2386 }
 0x227   :  { %v436_v43 = vmul.f32 %v2387_v38, %v2385_v36 }
 0x229   :  { %1722 = vst [vmem:[%s3245_s2 + $0x8] sm:$0xff] %v436_v43  ;;  %512 = vmatmul.mubr.f32.vlgmr.msra.gmra.mrb[4].mxu0 %v436_v43  ;;  %583 = vmatmul.mubr.f32.vlgmr.msra.gmra.mrb[4].mxu1 %v436_v43 }
 0x22a   :  { %1974 = vmatpush1.bf16.msra.mxu0 %v2538_v8  ;;  %2006 = vmatpush1.bf16.msra.mxu1 %v2587_v25 }
 0x22b   :  { %1976 = vmatprep.subr.bf16.mxu0 %v2540_v9  ;;  %2008 = vmatprep.subr.bf16.mxu1 %v2612_v33 }
 0x22c   :  { %692 = vmatprep.mubr.f32.mxu0 %v2500_v3  ;;  %763 = vmatprep.mubr.f32.mxu1 %v2500_v3 }
 0x22e   :  { %1978 = vmatpush1.bf16.msra.mxu0 %v2556_v14  ;;  %2010 = vmatpush1.bf16.msra.mxu1 %v2623_v37 }
 0x22f   :  { %1980 = vmatprep.subr.bf16.mxu0 %v2565_v17  ;;  %2012 = vmatprep.subr.bf16.mxu1 %v2647_v45 }
 0x232   :  { %1982 = vmatpush1.bf16.msra.mxu0 %v2590_v26  ;;  %2014 = vmatpush1.bf16.msra.mxu1 %v2656_v48 }
 0x233   :  { %1984 = vmatprep.subr.bf16.mxu0 %v2603_v30  ;;  %2016 = vmatprep.subr.bf16.mxu1 %v2668_v52 }
 0x236   :  { %1986 = vmatpush1.bf16.msra.mxu0 %v2639_v42  ;;  %2018 = vmatpush1.bf16.msra.mxu1 %v2698_v62 }
 0x237   :  { %1988 = vmatprep.subr.bf16.mxu0 %v2650_v46  ;;  %2020 = vmatprep.subr.bf16.mxu1 %v2704_v0 }
 0x23a   :  { %1990 = vmatpush1.bf16.msra.mxu0 %v2677_v55  ;;  %2022 = vmatpush1.bf16.msra.mxu1 %v2734_v15 }
 0x23b   :  { %1992 = vmatprep.subr.bf16.mxu0 %v2686_v58  ;;  %2024 = vmatprep.subr.bf16.mxu1 %v2740_v18 }
 0x23e   :  { %1994 = vmatpush1.bf16.msra.mxu0 %v2719_v7  ;;  %2026 = vmatpush1.bf16.msra.mxu1 %v2767_v31 }
 0x23f   :  { %1996 = vmatprep.subr.bf16.mxu0 %v2722_v10  ;;  %2028 = vmatprep.subr.bf16.mxu1 %v2770_v32 }
 0x242   :  { %1998 = vmatpush1.bf16.msra.mxu0 %v2755_v24  ;;  %2030 = vmatpush1.bf16.msra.mxu1 %v2789_v40 }
 0x243   :  { %2000 = vmatprep.subr.bf16.mxu0 %v2758_v27  ;;  %2032 = vmatprep.subr.bf16.mxu1 %v2792_v41 }
 0x246   :  { %2002 = vmatpush1.bf16.msra.mxu0 %v2785_v39  ;;  %2034 = vmatpush1.bf16.msra.mxu1 %v2802_v47 }
 0x247   :  { %2036 = vmatprep.subr.bf16.mxu0 %v2527_v4  ;;  %2068 = vmatprep.subr.bf16.mxu1 %v2579_v22 }
 0x2fc   :  { %v513_v49 = vpop.f32.mrb[4].mxu0  ;;  %v584_v50 = vpop.f32.mrb[4].mxu1 }
 0x2fd   :  { %v589_v51 = vadd.f32 %v1723_v35, %v513_v49  ;;  %v515_v53 = vpop.f32.mrb[5].mxu0  ;;  %v586_v54 = vpop.f32.mrb[5].mxu1  ;;  %v591_v2 = vadd.f32 %v1725_v63, %v584_v50  ;;  %v1732_v35 = vld [vmem:[%s3244_s0 + $0x68] sm:$0xff] }
 0x2fe   :  { %v590_v56 = vadd.f32 %v1724_v44, %v515_v53  ;;  %v592_v61 = vadd.f32 %v1726_v60, %v586_v54 }
 0x2ff   :  { %v1727_v57 = vmul.f32 -1.442695, %v589_v51 }
 0x300   :  { %v1728_v59 = vmul.f32 -1.442695, %v590_v56  ;;  %v1729_v1 = vmul.f32 -1.442695, %v592_v61  ;;  %v1733_v61 = vld [vmem:[%s3244_s0 + $0x70] sm:$0xff] }
 0x301   :  { %2388 = vpow2.f32 %v1727_v57 }
 0x302   :  { %2390 = vpow2.f32 %v1728_v59  ;;  %v1734_v59 = vld [vmem:[%s3244_s0 + $0x78] sm:$0xff] }
 0x303   :  { %2392 = vpow2.f32 %v1729_v1 }
 0x304   :  { %2394 = vtanh.f32 %v591_v2 }
 0x30b   :  { %v2389_v5 = vpop.eup %2388 }
 0x30c   :  { %v2391_v6 = vpop.eup %2390  ;;  %v596_v11 = vadd.f32 1.0, %v2389_v5 }
 0x30d   :  { %v602_v12 = vadd.f32 1.0, %v2391_v6  ;;  %v2393_v13 = vpop.eup %2392 }
 0x30e   :  { %2396 = vrcp.f32 %v596_v11  ;;  %v2395_v16 = vpop.eup %2394  ;;  %v609_v23 = vadd.f32 1.0, %v2393_v13 }
 0x30f   :  { %2398 = vrcp.f32 %v602_v12 }
 0x310   :  { %2400 = vrcp.f32 %v609_v23 }
 0x318   :  { %v2397_v19 = vpop.eup %2396 }
 0x319   :  { %v2399_v20 = vpop.eup %2398  ;;  %v614_v21 = vmul.f32 %v2397_v19, %v2395_v16 }
 0x31a   :  { %v613_v28 = vmul.f32 %v2399_v20, %v2909_v34  ;;  %v2401_v36 = vpop.eup %2400  ;;  %v1731_v34 = vld [vmem:[%s3244_s0 + $0x60] sm:$0xff] }
 0x31c   :  { %v2962_v29 = vadd.f32 %v614_v21, %v613_v28 }
 0x31e   :  { %2402 = vtanh.f32 %v2962_v29 }
 0x328   :  { %v2403_v38 = vpop.eup %2402 }
 0x329   :  { %v617_v43 = vmul.f32 %v2403_v38, %v2401_v36 }
 0x32b   :  { %1730 = vst [vmem:[%s3245_s2 + $0x10] sm:$0xff] %v617_v43  ;;  %693 = vmatmul.mubr.f32.vlgmr.msra.gmra.mrb[6].mxu0 %v617_v43  ;;  %764 = vmatmul.mubr.f32.vlgmr.msra.gmra.mrb[6].mxu1 %v617_v43 }
 0x32c   :  { %2038 = vmatpush1.bf16.msra.mxu0 %v2538_v8  ;;  %2070 = vmatpush1.bf16.msra.mxu1 %v2587_v25 }
 0x32d   :  { %2040 = vmatprep.subr.bf16.mxu0 %v2540_v9  ;;  %2072 = vmatprep.subr.bf16.mxu1 %v2612_v33 }
 0x32e   :  { %873 = vmatprep.mubr.f32.mxu0 %v2500_v3  ;;  %944 = vmatprep.mubr.f32.mxu1 %v2500_v3 }
 0x330   :  { %2042 = vmatpush1.bf16.msra.mxu0 %v2556_v14  ;;  %2074 = vmatpush1.bf16.msra.mxu1 %v2623_v37 }
 0x331   :  { %2044 = vmatprep.subr.bf16.mxu0 %v2565_v17  ;;  %2076 = vmatprep.subr.bf16.mxu1 %v2647_v45 }
 0x334   :  { %2046 = vmatpush1.bf16.msra.mxu0 %v2590_v26  ;;  %2078 = vmatpush1.bf16.msra.mxu1 %v2656_v48 }
 0x335   :  { %2048 = vmatprep.subr.bf16.mxu0 %v2603_v30  ;;  %2080 = vmatprep.subr.bf16.mxu1 %v2668_v52 }
 0x338   :  { %2050 = vmatpush1.bf16.msra.mxu0 %v2639_v42  ;;  %2082 = vmatpush1.bf16.msra.mxu1 %v2698_v62 }
 0x339   :  { %2052 = vmatprep.subr.bf16.mxu0 %v2650_v46  ;;  %2084 = vmatprep.subr.bf16.mxu1 %v2704_v0 }
 0x33c   :  { %2054 = vmatpush1.bf16.msra.mxu0 %v2677_v55  ;;  %2086 = vmatpush1.bf16.msra.mxu1 %v2734_v15 }
 0x33d   :  { %2056 = vmatprep.subr.bf16.mxu0 %v2686_v58  ;;  %2088 = vmatprep.subr.bf16.mxu1 %v2740_v18 }
 0x340   :  { %2058 = vmatpush1.bf16.msra.mxu0 %v2719_v7  ;;  %2090 = vmatpush1.bf16.msra.mxu1 %v2767_v31 }
 0x341   :  { %2060 = vmatprep.subr.bf16.mxu0 %v2722_v10  ;;  %2092 = vmatprep.subr.bf16.mxu1 %v2770_v32 }
 0x344   :  { %2062 = vmatpush1.bf16.msra.mxu0 %v2755_v24  ;;  %2094 = vmatpush1.bf16.msra.mxu1 %v2789_v40 }
 0x345   :  { %2064 = vmatprep.subr.bf16.mxu0 %v2758_v27  ;;  %2096 = vmatprep.subr.bf16.mxu1 %v2792_v41 }
 0x348   :  { %2066 = vmatpush1.bf16.msra.mxu0 %v2785_v39  ;;  %2098 = vmatpush1.bf16.msra.mxu1 %v2802_v47 }
 0x349   :  { %2100 = vmatprep.subr.bf16.mxu0 %v2527_v4  ;;  %2132 = vmatprep.subr.bf16.mxu1 %v2579_v22 }
 0x3fe   :  { %v694_v44 = vpop.f32.mrb[6].mxu0  ;;  %v765_v49 = vpop.f32.mrb[6].mxu1 }
 0x3ff   :  { %v770_v50 = vadd.f32 %v1731_v34, %v694_v44  ;;  %v696_v51 = vpop.f32.mrb[7].mxu0  ;;  %v767_v53 = vpop.f32.mrb[7].mxu1  ;;  %v772_v1 = vadd.f32 %v1733_v61, %v765_v49  ;;  %v1740_v34 = vld [vmem:[%s3244_s0 + $0x88] sm:$0xff] }
 0x400   :  { %v771_v54 = vadd.f32 %v1732_v35, %v696_v51  ;;  %v773_v60 = vadd.f32 %v1734_v59, %v767_v53 }
 0x401   :  { %v1735_v56 = vmul.f32 -1.442695, %v770_v50 }
 0x402   :  { %v1736_v57 = vmul.f32 -1.442695, %v771_v54  ;;  %v1737_v63 = vmul.f32 -1.442695, %v773_v60  ;;  %v1741_v60 = vld [vmem:[%s3244_s0 + $0x90] sm:$0xff] }
 0x403   :  { %2404 = vpow2.f32 %v1735_v56 }
 0x404   :  { %2406 = vpow2.f32 %v1736_v57  ;;  %v1742_v57 = vld [vmem:[%s3244_s0 + $0x98] sm:$0xff] }
 0x405   :  { %2408 = vpow2.f32 %v1737_v63 }
 0x406   :  { %2410 = vtanh.f32 %v772_v1 }
 0x40d   :  { %v2405_v2 = vpop.eup %2404 }
 0x40e   :  { %v2407_v5 = vpop.eup %2406  ;;  %v777_v6 = vadd.f32 1.0, %v2405_v2 }
 0x40f   :  { %v783_v11 = vadd.f32 1.0, %v2407_v5  ;;  %v2409_v12 = vpop.eup %2408 }
 0x410   :  { %2412 = vrcp.f32 %v777_v6  ;;  %v2411_v13 = vpop.eup %2410  ;;  %v790_v21 = vadd.f32 1.0, %v2409_v12 }
 0x411   :  { %2414 = vrcp.f32 %v783_v11 }
 0x412   :  { %2416 = vrcp.f32 %v790_v21 }
 0x41a   :  { %v2413_v16 = vpop.eup %2412 }
 0x41b   :  { %v2415_v19 = vpop.eup %2414  ;;  %v795_v20 = vmul.f32 %v2413_v16, %v2411_v13 }
 0x41c   :  { %v794_v23 = vmul.f32 %v2415_v19, %v2962_v29  ;;  %v2417_v36 = vpop.eup %2416  ;;  %v1739_v29 = vld [vmem:[%s3244_s0 + $0x80] sm:$0xff] }
 0x41e   :  { %v3015_v28 = vadd.f32 %v795_v20, %v794_v23 }
 0x420   :  { %2418 = vtanh.f32 %v3015_v28 }
 0x42a   :  { %v2419_v38 = vpop.eup %2418 }
 0x42b   :  { %v798_v43 = vmul.f32 %v2419_v38, %v2417_v36 }
 0x42d   :  { %1738 = vst [vmem:[%s3245_s2 + $0x18] sm:$0xff] %v798_v43  ;;  %874 = vmatmul.mubr.f32.vlgmr.msra.gmra.mrb[8].mxu0 %v798_v43  ;;  %945 = vmatmul.mubr.f32.vlgmr.msra.gmra.mrb[8].mxu1 %v798_v43 }
 0x42e   :  { %2102 = vmatpush1.bf16.msra.mxu0 %v2538_v8  ;;  %2134 = vmatpush1.bf16.msra.mxu1 %v2587_v25 }
 0x42f   :  { %2104 = vmatprep.subr.bf16.mxu0 %v2540_v9  ;;  %2136 = vmatprep.subr.bf16.mxu1 %v2612_v33 }
 0x430   :  { %1054 = vmatprep.mubr.f32.mxu0 %v2500_v3  ;;  %1125 = vmatprep.mubr.f32.mxu1 %v2500_v3 }
 0x432   :  { %2106 = vmatpush1.bf16.msra.mxu0 %v2556_v14  ;;  %2138 = vmatpush1.bf16.msra.mxu1 %v2623_v37 }
 0x433   :  { %2108 = vmatprep.subr.bf16.mxu0 %v2565_v17  ;;  %2140 = vmatprep.subr.bf16.mxu1 %v2647_v45 }
 0x436   :  { %2110 = vmatpush1.bf16.msra.mxu0 %v2590_v26  ;;  %2142 = vmatpush1.bf16.msra.mxu1 %v2656_v48 }
 0x437   :  { %2112 = vmatprep.subr.bf16.mxu0 %v2603_v30  ;;  %2144 = vmatprep.subr.bf16.mxu1 %v2668_v52 }
 0x43a   :  { %2114 = vmatpush1.bf16.msra.mxu0 %v2639_v42  ;;  %2146 = vmatpush1.bf16.msra.mxu1 %v2698_v62 }
 0x43b   :  { %2116 = vmatprep.subr.bf16.mxu0 %v2650_v46  ;;  %2148 = vmatprep.subr.bf16.mxu1 %v2704_v0 }
 0x43e   :  { %2118 = vmatpush1.bf16.msra.mxu0 %v2677_v55  ;;  %2150 = vmatpush1.bf16.msra.mxu1 %v2734_v15 }
 0x43f   :  { %2120 = vmatprep.subr.bf16.mxu0 %v2686_v58  ;;  %2152 = vmatprep.subr.bf16.mxu1 %v2740_v18 }
 0x442   :  { %2122 = vmatpush1.bf16.msra.mxu0 %v2719_v7  ;;  %2154 = vmatpush1.bf16.msra.mxu1 %v2767_v31 }
 0x443   :  { %2124 = vmatprep.subr.bf16.mxu0 %v2722_v10  ;;  %2156 = vmatprep.subr.bf16.mxu1 %v2770_v32 }
 0x446   :  { %2126 = vmatpush1.bf16.msra.mxu0 %v2755_v24  ;;  %2158 = vmatpush1.bf16.msra.mxu1 %v2789_v40 }
 0x447   :  { %2128 = vmatprep.subr.bf16.mxu0 %v2758_v27  ;;  %2160 = vmatprep.subr.bf16.mxu1 %v2792_v41 }
 0x44a   :  { %2130 = vmatpush1.bf16.msra.mxu0 %v2785_v39  ;;  %2162 = vmatpush1.bf16.msra.mxu1 %v2802_v47 }
 0x44b   :  { %2164 = vmatprep.subr.bf16.mxu0 %v2527_v4  ;;  %2196 = vmatprep.subr.bf16.mxu1 %v2579_v22 }
 0x500   :  { %v875_v35 = vpop.f32.mrb[8].mxu0  ;;  %v946_v44 = vpop.f32.mrb[8].mxu1 }
 0x501   :  { %v951_v49 = vadd.f32 %v1739_v29, %v875_v35  ;;  %v877_v50 = vpop.f32.mrb[9].mxu0  ;;  %v948_v51 = vpop.f32.mrb[9].mxu1  ;;  %v953_v63 = vadd.f32 %v1741_v60, %v946_v44  ;;  %v1748_v29 = vld [vmem:[%s3244_s0 + $0xa8] sm:$0xff] }
 0x502   :  { %v952_v53 = vadd.f32 %v1740_v34, %v877_v50  ;;  %v954_v59 = vadd.f32 %v1742_v57, %v948_v51 }
 0x503   :  { %v1743_v54 = vmul.f32 -1.442695, %v951_v49 }
 0x504   :  { %v1744_v56 = vmul.f32 -1.442695, %v952_v53  ;;  %v1745_v61 = vmul.f32 -1.442695, %v954_v59  ;;  %v1749_v59 = vld [vmem:[%s3244_s0 + $0xb0] sm:$0xff] }
 0x505   :  { %2420 = vpow2.f32 %v1743_v54 }
 0x506   :  { %2422 = vpow2.f32 %v1744_v56  ;;  %v1750_v56 = vld [vmem:[%s3244_s0 + $0xb8] sm:$0xff] }
 0x507   :  { %2424 = vpow2.f32 %v1745_v61 }
 0x508   :  { %2426 = vtanh.f32 %v953_v63 }
 0x50f   :  { %v2421_v1 = vpop.eup %2420 }
 0x510   :  { %v2423_v2 = vpop.eup %2422  ;;  %v958_v5 = vadd.f32 1.0, %v2421_v1 }
 0x511   :  { %v964_v6 = vadd.f32 1.0, %v2423_v2  ;;  %v2425_v11 = vpop.eup %2424 }
 0x512   :  { %2428 = vrcp.f32 %v958_v5  ;;  %v2427_v12 = vpop.eup %2426  ;;  %v971_v20 = vadd.f32 1.0, %v2425_v11 }
 0x513   :  { %2430 = vrcp.f32 %v964_v6 }
 0x514   :  { %2432 = vrcp.f32 %v971_v20 }
 0x51c   :  { %v2429_v13 = vpop.eup %2428 }
 0x51d   :  { %v2431_v16 = vpop.eup %2430  ;;  %v976_v19 = vmul.f32 %v2429_v13, %v2427_v12 }
 0x51e   :  { %v975_v21 = vmul.f32 %v2431_v16, %v3015_v28  ;;  %v2433_v36 = vpop.eup %2432  ;;  %v1747_v28 = vld [vmem:[%s3244_s0 + $0xa0] sm:$0xff] }
 0x520   :  { %v3068_v23 = vadd.f32 %v976_v19, %v975_v21 }
 0x522   :  { %2434 = vtanh.f32 %v3068_v23 }
 0x52c   :  { %v2435_v38 = vpop.eup %2434 }
 0x52d   :  { %v979_v43 = vmul.f32 %v2435_v38, %v2433_v36 }
 0x52f   :  { %1746 = vst [vmem:[%s3245_s2 + $0x20] sm:$0xff] %v979_v43  ;;  %1055 = vmatmul.mubr.f32.vlgmr.msra.gmra.mrb[10].mxu0 %v979_v43  ;;  %1126 = vmatmul.mubr.f32.vlgmr.msra.gmra.mrb[10].mxu1 %v979_v43 }
 0x530   :  { %2166 = vmatpush1.bf16.msra.mxu0 %v2538_v8  ;;  %2198 = vmatpush1.bf16.msra.mxu1 %v2587_v25 }
 0x531   :  { %2168 = vmatprep.subr.bf16.mxu0 %v2540_v9  ;;  %2200 = vmatprep.subr.bf16.mxu1 %v2612_v33 }
 0x532   :  { %1235 = vmatprep.mubr.f32.mxu0 %v2500_v3  ;;  %1306 = vmatprep.mubr.f32.mxu1 %v2500_v3 }
 0x534   :  { %2170 = vmatpush1.bf16.msra.mxu0 %v2556_v14  ;;  %2202 = vmatpush1.bf16.msra.mxu1 %v2623_v37 }
 0x535   :  { %2172 = vmatprep.subr.bf16.mxu0 %v2565_v17  ;;  %2204 = vmatprep.subr.bf16.mxu1 %v2647_v45 }
 0x538   :  { %2174 = vmatpush1.bf16.msra.mxu0 %v2590_v26  ;;  %2206 = vmatpush1.bf16.msra.mxu1 %v2656_v48 }
 0x539   :  { %2176 = vmatprep.subr.bf16.mxu0 %v2603_v30  ;;  %2208 = vmatprep.subr.bf16.mxu1 %v2668_v52 }
 0x53c   :  { %2178 = vmatpush1.bf16.msra.mxu0 %v2639_v42  ;;  %2210 = vmatpush1.bf16.msra.mxu1 %v2698_v62 }
 0x53d   :  { %2180 = vmatprep.subr.bf16.mxu0 %v2650_v46  ;;  %2212 = vmatprep.subr.bf16.mxu1 %v2704_v0 }
 0x540   :  { %2182 = vmatpush1.bf16.msra.mxu0 %v2677_v55  ;;  %2214 = vmatpush1.bf16.msra.mxu1 %v2734_v15 }
 0x541   :  { %2184 = vmatprep.subr.bf16.mxu0 %v2686_v58  ;;  %2216 = vmatprep.subr.bf16.mxu1 %v2740_v18 }
 0x544   :  { %2186 = vmatpush1.bf16.msra.mxu0 %v2719_v7  ;;  %2218 = vmatpush1.bf16.msra.mxu1 %v2767_v31 }
 0x545   :  { %2188 = vmatprep.subr.bf16.mxu0 %v2722_v10  ;;  %2220 = vmatprep.subr.bf16.mxu1 %v2770_v32 }
 0x548   :  { %2190 = vmatpush1.bf16.msra.mxu0 %v2755_v24  ;;  %2222 = vmatpush1.bf16.msra.mxu1 %v2789_v40 }
 0x549   :  { %2192 = vmatprep.subr.bf16.mxu0 %v2758_v27  ;;  %2224 = vmatprep.subr.bf16.mxu1 %v2792_v41 }
 0x54c   :  { %2194 = vmatpush1.bf16.msra.mxu0 %v2785_v39  ;;  %2226 = vmatpush1.bf16.msra.mxu1 %v2802_v47 }
 0x54d   :  { %2228 = vmatprep.subr.bf16.mxu0 %v2527_v4  ;;  %2260 = vmatprep.subr.bf16.mxu1 %v2579_v22 }
 0x602   :  { %v1056_v34 = vpop.f32.mrb[10].mxu0  ;;  %v1127_v35 = vpop.f32.mrb[10].mxu1 }
 0x603   :  { %v1132_v44 = vadd.f32 %v1747_v28, %v1056_v34  ;;  %v1058_v49 = vpop.f32.mrb[11].mxu0  ;;  %v1129_v50 = vpop.f32.mrb[11].mxu1  ;;  %v1134_v61 = vadd.f32 %v1749_v59, %v1127_v35  ;;  %v1756_v28 = vld [vmem:[%s3244_s0 + $0xc8] sm:$0xff] }
 0x604   :  { %v1133_v51 = vadd.f32 %v1748_v29, %v1058_v49  ;;  %v1135_v57 = vadd.f32 %v1750_v56, %v1129_v50 }
 0x605   :  { %v1751_v53 = vmul.f32 -1.442695, %v1132_v44 }
 0x606   :  { %v1752_v54 = vmul.f32 -1.442695, %v1133_v51  ;;  %v1753_v60 = vmul.f32 -1.442695, %v1135_v57 }
 0x607   :  { %2436 = vpow2.f32 %v1751_v53 }
 0x608   :  { %2438 = vpow2.f32 %v1752_v54  ;;  %v1757_v54 = vld [vmem:[%s3244_s0 + $0xd0] sm:$0xff] }
 0x609   :  { %2440 = vpow2.f32 %v1753_v60 }
 0x60a   :  { %2442 = vtanh.f32 %v1134_v61 }
 0x611   :  { %v2437_v63 = vpop.eup %2436 }
 0x612   :  { %v2439_v1 = vpop.eup %2438  ;;  %v1139_v2 = vadd.f32 1.0, %v2437_v63 }
 0x613   :  { %v1145_v5 = vadd.f32 1.0, %v2439_v1  ;;  %v2441_v6 = vpop.eup %2440 }
 0x614   :  { %2444 = vrcp.f32 %v1139_v2  ;;  %v2443_v11 = vpop.eup %2442  ;;  %v1152_v19 = vadd.f32 1.0, %v2441_v6 }
 0x615   :  { %2446 = vrcp.f32 %v1145_v5 }
 0x616   :  { %2448 = vrcp.f32 %v1152_v19 }
 0x61e   :  { %v2445_v12 = vpop.eup %2444 }
 0x61f   :  { %v2447_v13 = vpop.eup %2446  ;;  %v1157_v16 = vmul.f32 %v2445_v12, %v2443_v11 }
 0x620   :  { %v1156_v20 = vmul.f32 %v2447_v13, %v3068_v23  ;;  %v2449_v36 = vpop.eup %2448  ;;  %v1755_v23 = vld [vmem:[%s3244_s0 + $0xc0] sm:$0xff] }
 0x622   :  { %v3121_v21 = vadd.f32 %v1157_v16, %v1156_v20 }
 0x624   :  { %2450 = vtanh.f32 %v3121_v21 }
 0x62e   :  { %v2451_v38 = vpop.eup %2450 }
 0x62f   :  { %v1160_v43 = vmul.f32 %v2451_v38, %v2449_v36 }
 0x631   :  { %1754 = vst [vmem:[%s3245_s2 + $0x28] sm:$0xff] %v1160_v43  ;;  %1236 = vmatmul.mubr.f32.vlgmr.msra.gmra.mrb[12].mxu0 %v1160_v43  ;;  %1307 = vmatmul.mubr.f32.vlgmr.msra.gmra.mrb[12].mxu1 %v1160_v43 }
 0x632   :  { %2230 = vmatpush1.bf16.msra.mxu0 %v2538_v8  ;;  %2262 = vmatpush1.bf16.msra.mxu1 %v2587_v25 }
 0x633   :  { %2232 = vmatprep.subr.bf16.mxu0 %v2540_v9  ;;  %2264 = vmatprep.subr.bf16.mxu1 %v2612_v33 }
 0x634   :  { %1416 = vmatprep.mubr.f32.mxu0 %v2500_v3  ;;  %1487 = vmatprep.mubr.f32.mxu1 %v2500_v3 }
 0x636   :  { %2234 = vmatpush1.bf16.msra.mxu0 %v2556_v14  ;;  %2266 = vmatpush1.bf16.msra.mxu1 %v2623_v37 }
 0x637   :  { %2236 = vmatprep.subr.bf16.mxu0 %v2565_v17  ;;  %2268 = vmatprep.subr.bf16.mxu1 %v2647_v45 }
 0x63a   :  { %2238 = vmatpush1.bf16.msra.mxu0 %v2590_v26  ;;  %2270 = vmatpush1.bf16.msra.mxu1 %v2656_v48 }
 0x63b   :  { %2240 = vmatprep.subr.bf16.mxu0 %v2603_v30  ;;  %2272 = vmatprep.subr.bf16.mxu1 %v2668_v52 }
 0x63e   :  { %2242 = vmatpush1.bf16.msra.mxu0 %v2639_v42  ;;  %2274 = vmatpush1.bf16.msra.mxu1 %v2698_v62 }
 0x63f   :  { %2244 = vmatprep.subr.bf16.mxu0 %v2650_v46  ;;  %2276 = vmatprep.subr.bf16.mxu1 %v2704_v0 }
 0x642   :  { %2246 = vmatpush1.bf16.msra.mxu0 %v2677_v55  ;;  %2278 = vmatpush1.bf16.msra.mxu1 %v2734_v15 }
 0x643   :  { %2248 = vmatprep.subr.bf16.mxu0 %v2686_v58  ;;  %2280 = vmatprep.subr.bf16.mxu1 %v2740_v18 }
 0x646   :  { %2250 = vmatpush1.bf16.msra.mxu0 %v2719_v7  ;;  %2282 = vmatpush1.bf16.msra.mxu1 %v2767_v31 }
 0x647   :  { %2252 = vmatprep.subr.bf16.mxu0 %v2722_v10  ;;  %2284 = vmatprep.subr.bf16.mxu1 %v2770_v32 }
 0x64a   :  { %2254 = vmatpush1.bf16.msra.mxu0 %v2755_v24  ;;  %2286 = vmatpush1.bf16.msra.mxu1 %v2789_v40 }
 0x64b   :  { %2256 = vmatprep.subr.bf16.mxu0 %v2758_v27  ;;  %2288 = vmatprep.subr.bf16.mxu1 %v2792_v41 }
 0x64e   :  { %2258 = vmatpush1.bf16.msra.mxu0 %v2785_v39  ;;  %2290 = vmatpush1.bf16.msra.mxu1 %v2802_v47 }
 0x64f   :  { %2292 = vmatprep.subr.bf16.mxu0 %v2527_v4  ;;  %2324 = vmatprep.subr.bf16.mxu1 %v2579_v22  ;;  %v1758_v4 = vld [vmem:[%s3244_s0 + $0xd8] sm:$0xff] }
 0x704   :  { %v1237_v29 = vpop.f32.mrb[12].mxu0  ;;  %v1308_v34 = vpop.f32.mrb[12].mxu1 }
 0x705   :  { %v1313_v35 = vadd.f32 %v1755_v23, %v1237_v29  ;;  %v1239_v44 = vpop.f32.mrb[13].mxu0  ;;  %v1310_v49 = vpop.f32.mrb[13].mxu1  ;;  %v1315_v57 = vadd.f32 %v1757_v54, %v1308_v34 }
 0x706   :  { %v1314_v50 = vadd.f32 %v1756_v28, %v1239_v44  ;;  %v1316_v22 = vadd.f32 %v1758_v4, %v1310_v49  ;;  %v1774_v49 = vld [vmem:[%s3244_s0 + $0x118] sm:$0xff] }
 0x707   :  { %v1759_v51 = vmul.f32 -1.442695, %v1313_v35 }
 0x708   :  { %v1760_v53 = vmul.f32 -1.442695, %v1314_v50  ;;  %v1761_v56 = vmul.f32 -1.442695, %v1316_v22 }
 0x709   :  { %2452 = vpow2.f32 %v1759_v51  ;;  %v1773_v51 = vld [vmem:[%s3244_s0 + $0x110] sm:$0xff] }
 0x70a   :  { %2454 = vpow2.f32 %v1760_v53 }
 0x70b   :  { %2456 = vpow2.f32 %v1761_v56 }
 0x70c   :  { %2458 = vtanh.f32 %v1315_v57 }
 0x713   :  { %v2453_v59 = vpop.eup %2452 }
 0x714   :  { %v2455_v60 = vpop.eup %2454  ;;  %v1320_v61 = vadd.f32 1.0, %v2453_v59 }
 0x715   :  { %v1326_v63 = vadd.f32 1.0, %v2455_v60  ;;  %v2457_v1 = vpop.eup %2456 }
 0x716   :  { %2460 = vrcp.f32 %v1320_v61  ;;  %v2459_v2 = vpop.eup %2458  ;;  %v1333_v12 = vadd.f32 1.0, %v2457_v1 }
 0x717   :  { %2462 = vrcp.f32 %v1326_v63 }
 0x718   :  { %2464 = vrcp.f32 %v1333_v12 }
 0x720   :  { %v2461_v5 = vpop.eup %2460 }
 0x721   :  { %v2463_v6 = vpop.eup %2462  ;;  %v1338_v11 = vmul.f32 %v2461_v5, %v2459_v2 }
 0x722   :  { %v1337_v13 = vmul.f32 %v2463_v6, %v3121_v21  ;;  %v2465_v19 = vpop.eup %2464  ;;  %v1772_v21 = vld [vmem:[%s3244_s0 + $0x108] sm:$0xff] }
 0x724   :  { %v3174_v16 = vadd.f32 %v1338_v11, %v1337_v13 }
 0x726   :  { %2466 = vtanh.f32 %v3174_v16 }
 0x730   :  { %v2467_v20 = vpop.eup %2466 }
 0x731   :  { %v1341_v36 = vmul.f32 %v2467_v20, %v2465_v19 }
 0x733   :  { %1762 = vst [vmem:[%s3245_s2 + $0x30] sm:$0xff] %v1341_v36  ;;  %1417 = vmatmul.mubr.f32.vlgmr.msra.gmra.mrb[14].mxu0 %v1341_v36  ;;  %1488 = vmatmul.mubr.f32.vlgmr.msra.gmra.mrb[14].mxu1 %v1341_v36 }
 0x734   :  { %2294 = vmatpush1.bf16.msra.mxu0 %v2538_v8  ;;  %2326 = vmatpush1.bf16.msra.mxu1 %v2587_v25  ;;  %v1764_v8 = vld [vmem:[%s3244_s0 + $0xe8] sm:$0xff] }
 0x735   :  { %2296 = vmatprep.subr.bf16.mxu0 %v2540_v9  ;;  %2328 = vmatprep.subr.bf16.mxu1 %v2612_v33 }
 0x736   :  { %1597 = vmatprep.mubr.f32.mxu0 %v2500_v3  ;;  %1668 = vmatprep.mubr.f32.mxu1 %v2500_v3  ;;  %v1763_v3 = vld [vmem:[%s3244_s0 + $0xe0] sm:$0xff] }
 0x738   :  { %2298 = vmatpush1.bf16.msra.mxu0 %v2556_v14  ;;  %2330 = vmatpush1.bf16.msra.mxu1 %v2623_v37 }
 0x739   :  { %2300 = vmatprep.subr.bf16.mxu0 %v2565_v17  ;;  %2332 = vmatprep.subr.bf16.mxu1 %v2647_v45 }
 0x73c   :  { %2302 = vmatpush1.bf16.msra.mxu0 %v2590_v26  ;;  %2334 = vmatpush1.bf16.msra.mxu1 %v2656_v48 }
 0x73d   :  { %2304 = vmatprep.subr.bf16.mxu0 %v2603_v30  ;;  %2336 = vmatprep.subr.bf16.mxu1 %v2668_v52 }
 0x740   :  { %2306 = vmatpush1.bf16.msra.mxu0 %v2639_v42  ;;  %2338 = vmatpush1.bf16.msra.mxu1 %v2698_v62  ;;  %v1766_v42 = vld [vmem:[%s3244_s0 + $0xf8] sm:$0xff] }
 0x741   :  { %2308 = vmatprep.subr.bf16.mxu0 %v2650_v46  ;;  %2340 = vmatprep.subr.bf16.mxu1 %v2704_v0  ;;  %v1765_v46 = vld [vmem:[%s3244_s0 + $0xf0] sm:$0xff] }
 0x744   :  { %2310 = vmatpush1.bf16.msra.mxu0 %v2677_v55  ;;  %2342 = vmatpush1.bf16.msra.mxu1 %v2734_v15 }
 0x745   :  { %2312 = vmatprep.subr.bf16.mxu0 %v2686_v58  ;;  %2344 = vmatprep.subr.bf16.mxu1 %v2740_v18 }
 0x748   :  { %2314 = vmatpush1.bf16.msra.mxu0 %v2719_v7  ;;  %2346 = vmatpush1.bf16.msra.mxu1 %v2767_v31 }
 0x749   :  { %2316 = vmatprep.subr.bf16.mxu0 %v2722_v10  ;;  %2348 = vmatprep.subr.bf16.mxu1 %v2770_v32 }
 0x74c   :  { %2318 = vmatpush1.bf16.msra.mxu0 %v2755_v24  ;;  %2350 = vmatpush1.bf16.msra.mxu1 %v2789_v40 }
 0x74d   :  { %2320 = vmatprep.subr.bf16.mxu0 %v2758_v27  ;;  %2352 = vmatprep.subr.bf16.mxu1 %v2792_v41 }
 0x750   :  { %2322 = vmatpush1.bf16.msra.mxu0 %v2785_v39  ;;  %2354 = vmatpush1.bf16.msra.mxu1 %v2802_v47  ;;  %v1771_v47 = vld [vmem:[%s3244_s0 + $0x100] sm:$0xff] }
 0x806   :  { %v1418_v9 = vpop.f32.mrb[14].mxu0  ;;  %v1489_v14 = vpop.f32.mrb[14].mxu1 }
 0x807   :  { %v1494_v17 = vadd.f32 %v1763_v3, %v1418_v9  ;;  %v1420_v25 = vpop.f32.mrb[15].mxu0  ;;  %v1491_v26 = vpop.f32.mrb[15].mxu1  ;;  %v1496_v52 = vadd.f32 %v1765_v46, %v1489_v14 }
 0x808   :  { %v1495_v30 = vadd.f32 %v1764_v8, %v1420_v25  ;;  %v1497_v45 = vadd.f32 %v1766_v42, %v1491_v26 }
 0x809   :  { %v1767_v33 = vmul.f32 -1.442695, %v1494_v17 }
 0x80a   :  { %v1768_v37 = vmul.f32 -1.442695, %v1495_v30  ;;  %v1769_v48 = vmul.f32 -1.442695, %v1497_v45 }
 0x80b   :  { %2468 = vpow2.f32 %v1767_v33 }
 0x80c   :  { %2470 = vpow2.f32 %v1768_v37 }
 0x80d   :  { %2472 = vpow2.f32 %v1769_v48 }
 0x80e   :  { %2474 = vtanh.f32 %v1496_v52 }
 0x815   :  { %v2469_v55 = vpop.eup %2468 }
 0x816   :  { %v2471_v58 = vpop.eup %2470  ;;  %v1501_v62 = vadd.f32 1.0, %v2469_v55 }
 0x817   :  { %v1507_v0 = vadd.f32 1.0, %v2471_v58  ;;  %v2473_v7 = vpop.eup %2472 }
 0x818   :  { %2476 = vrcp.f32 %v1501_v62  ;;  %v2475_v10 = vpop.eup %2474  ;;  %v1514_v27 = vadd.f32 1.0, %v2473_v7 }
 0x819   :  { %2478 = vrcp.f32 %v1507_v0 }
 0x81a   :  { %2480 = vrcp.f32 %v1514_v27 }
 0x822   :  { %v2477_v15 = vpop.eup %2476 }
 0x823   :  { %v2479_v18 = vpop.eup %2478  ;;  %v1519_v24 = vmul.f32 %v2477_v15, %v2475_v10 }
 0x824   :  { %v1518_v31 = vmul.f32 %v2479_v18, %v3174_v16  ;;  %v2481_v39 = vpop.eup %2480 }
 0x826   :  { %v1520_v32 = vadd.f32 %v1519_v24, %v1518_v31 }
 0x828   :  { %2482 = vtanh.f32 %v1520_v32 }
 0x832   :  { %v2483_v40 = vpop.eup %2482 }
 0x833   :  { %v1522_v41 = vmul.f32 %v2483_v40, %v2481_v39 }
 0x835   :  { %1770 = vst [vmem:[%s3245_s2 + $0x38] sm:$0xff] %v1522_v41  ;;  %1598 = vmatmul.mubr.f32.vlgmr.msra.gmra.mrb[16].mxu0 %v1522_v41  ;;  %1669 = vmatmul.mubr.f32.vlgmr.msra.gmra.mrb[16].mxu1 %v1522_v41 }
 0x908   :  { %v1599_v38 = vpop.f32.mrb[16].mxu0  ;;  %v1670_v43 = vpop.f32.mrb[16].mxu1 }
 0x909   :  { %v1675_v23 = vadd.f32 %v1771_v47, %v1599_v38  ;;  %v1601_v28 = vpop.f32.mrb[17].mxu0  ;;  %v1672_v29 = vpop.f32.mrb[17].mxu1  ;;  %v1677_v4 = vadd.f32 %v1773_v51, %v1670_v43 }
 0x90a   :  { %v1676_v34 = vadd.f32 %v1772_v21, %v1601_v28  ;;  %v1678_v50 = vadd.f32 %v1774_v49, %v1672_v29 }
 0x90b   :  { %v1775_v35 = vmul.f32 -1.442695, %v1675_v23 }
 0x90c   :  { %v1776_v44 = vmul.f32 -1.442695, %v1676_v34  ;;  %v1777_v53 = vmul.f32 -1.442695, %v1678_v50 }
 0x90d   :  { %2484 = vpow2.f32 %v1775_v35 }
 0x90e   :  { %2486 = vpow2.f32 %v1776_v44 }
 0x90f   :  { %2488 = vpow2.f32 %v1777_v53 }
 0x910   :  { %2490 = vtanh.f32 %v1677_v4 }
 0x917   :  { %v2485_v22 = vpop.eup %2484 }
 0x918   :  { %v2487_v54 = vpop.eup %2486  ;;  %v1682_v56 = vadd.f32 1.0, %v2485_v22 }
 0x919   :  { %v1688_v57 = vadd.f32 1.0, %v2487_v54  ;;  %v2489_v59 = vpop.eup %2488 }
 0x91a   :  { %2492 = vrcp.f32 %v1682_v56  ;;  %v2491_v60 = vpop.eup %2490  ;;  %v1695_v2 = vadd.f32 1.0, %v2489_v59 }
 0x91b   :  { %2494 = vrcp.f32 %v1688_v57 }
 0x91c   :  { %2496 = vrcp.f32 %v1695_v2 }
 0x924   :  { %v2493_v61 = vpop.eup %2492 }
 0x925   :  { %v2495_v63 = vpop.eup %2494  ;;  %v1700_v1 = vmul.f32 %v2493_v61, %v2491_v60 }
 0x926   :  { %v1699_v5 = vmul.f32 %v2495_v63, %v1520_v32  ;;  %v2497_v11 = vpop.eup %2496 }
 0x928   :  { %v1701_v6 = vadd.f32 %v1700_v1, %v1699_v5 }
 0x92a   :  { %2498 = vtanh.f32 %v1701_v6 }
 0x934   :  { %v2499_v12 = vpop.eup %2498 }
 0x935   :  { %v1703_v13 = vmul.f32 %v2499_v12, %v2497_v11 }
 0x937   :  { %1778 = vst [vmem:[%s3245_s2 + $0x40] sm:$0xff] %v1703_v13 }

</bundles_post_ra>
